<compile_context>
chip_gen: v6e
topology: v6e:2x2x1
jax: 0.10.0
libtpu: 0.0.40
codegen_flags: <defaults>
</compile_context>

<pallas_src>
import functools

import jax
import jax.numpy as jnp
from jax.experimental import pallas as pl
from jax.experimental.pallas import tpu as pltpu

NEG_SLOPE = 0.01   # nn.LeakyReLU() default
BN_EPS = 1e-5      # nn.BatchNorm1d default


# ----------------------------------------------------------------------------
# Pallas kernels
# ----------------------------------------------------------------------------
def _conv_bn_leaky_kernel(x_ref, mu_ref, w_ref, o_ref, stat_ref, *,
                          shift, mask_period):
    """Fused stage:  subtract previous-BN mean (istd is folded into the banded
    weights wrapper-side) -> 3 whole-block matmuls (one per L tap, W taps and the
    Cin contraction live in the banded weight matrix) -> LeakyReLU -> store +
    per-lane sum / sum-of-squares side output for the next BatchNorm.

    x_ref    : (1, A, B, kw) f32 activation rows (row = one (a, b) voxel line)
    mu_ref   : (1, kw)       f32 per-lane mean of the previous BN (zeros if none)
    w_ref    : (3, kw, nout) f32 banded weight matrices (istd pre-folded)
    o_ref    : (1, A, B, nout) f32 post-LeakyReLU activation
    stat_ref : (1, 2, nout)  f32 [sum; sum of squares]
    shift    : L-tap neighbour distance in rows (1 if L is the inner row dim,
               inner-tile-size if L is the outer row dim)
    mask_period : 0, or the inner row period at which L-boundaries occur
    """
    kw = x_ref.shape[-1]
    rows = 1
    for s in x_ref.shape[:-1]:
        rows *= s
    z = x_ref[...].reshape(rows, kw) - mu_ref[...]        # mean-centre (prev BN)

    zero = jnp.zeros((shift, kw), jnp.float32)
    zu = jnp.concatenate([zero, z[:-shift, :]], axis=0)    # L-tap at position -1
    zd = jnp.concatenate([z[shift:, :], zero], axis=0)     # L-tap at position +1
    if mask_period:
        r = jax.lax.broadcasted_iota(jnp.int32, (rows, 1), 0) % mask_period
        zu = jnp.where(r == 0, 0.0, zu)                    # zero-pad at L == 0
        zd = jnp.where(r == mask_period - 1, 0.0, zd)      # zero-pad at L == L-1

    acc = jnp.dot(zu, w_ref[0], preferred_element_type=jnp.float32)
    acc = acc + jnp.dot(z, w_ref[1], preferred_element_type=jnp.float32)
    acc = acc + jnp.dot(zd, w_ref[2], preferred_element_type=jnp.float32)

    y = jnp.where(acc >= 0.0, acc, NEG_SLOPE * acc)        # LeakyReLU
    o_ref[...] = y.reshape(o_ref.shape)
    # Two direct stores, no concat (next BatchNorm's batch statistics).
    # TODO(synk): for production voxel counts use a Welford-style combine instead
    # of E[y^2]-E[y]^2 to avoid f32 cancellation.
    stat_ref[0, 0:1, :] = jnp.sum(y, axis=0, keepdims=True)
    stat_ref[0, 1:2, :] = jnp.sum(y * y, axis=0, keepdims=True)


def _bn_bn_add_kernel(r_ref, s_ref, ar_ref, as_ref, o_ref):
    """Final fused epilogue: BatchNorm(resA) + BatchNorm(shortcut)."""
    o_ref[...] = (r_ref[...] * ar_ref[0:1, :] + ar_ref[1:2, :]
                  + s_ref[...] * as_ref[0:1, :] + as_ref[1:2, :])


# ----------------------------------------------------------------------------
# Tile selection (budgets the real VMEM footprint, keeps >= 2 grid steps)
# ----------------------------------------------------------------------------
def _pick_tile(extent, bytes_per_unit, *, multiple_of=1, budget=6 << 20):
    """Largest divisor t of `extent` with (t % multiple_of == 0 or t == extent),
    t*bytes_per_unit <= budget, preferring choices that leave >= 2 grid steps
    (double-buffering overlap + megacore sharding)."""
    cands = [t for t in range(1, extent + 1)
             if extent % t == 0 and (t % multiple_of == 0 or t == extent)]
    good = [t for t in cands if t * bytes_per_unit <= budget and extent // t >= 2]
    if good:
        return max(good)
    fits = [t for t in cands if t * bytes_per_unit <= budget]
    if fits:
        return max(fits)
    return min(cands)


# ----------------------------------------------------------------------------
# Wrapper-side helpers
# ----------------------------------------------------------------------------
def _banded_weights(w, wsp, istd=None):
    """(3, 3, Cin, Cout) taps -> 3 banded matrices B_i with
    B_i[wpos*Cin + c, t*Cout + o] = w[i, j, c, o] where wpos = t + (j - 1).
    Out-of-range W taps are simply omitted (== zero padding of the normalized
    activation).  Optionally folds the previous BatchNorm's istd into the rows."""
    _, _, cin, cout = w.shape
    mats = []
    for i in range(3):
        b = jnp.zeros((wsp, cin, wsp, cout), jnp.float32)
        for j in range(3):
            sel = jnp.eye(wsp, wsp, k=1 - j, dtype=jnp.float32)  # wpos = t + j - 1
            b = b + jnp.einsum('wt,co->wcto', sel, w[i, j].astype(jnp.float32))
        mats.append(b.reshape(wsp * cin, wsp * cout))
    wb = jnp.stack(mats, axis=0)
    if istd is not None:
        wb = wb * jnp.tile(istd.astype(jnp.float32), wsp)[None, :, None]
    return wb


def conv_stage(x4, w, mean, istd, *, l_dim, budget=6 << 20):
    """One "prev-BN -> conv -> LeakyReLU (+ BN-stats side output)" stage.

    x4   : (N, D, H, W*Cin) f32 activation, rows in (n, d, h) order, lanes (w, c)
    w    : (3, 3, Cin, Cout) taps over (L, W) where L is `l_dim` ('h' or 'd')
    mean, istd : (Cin,) f32 previous BatchNorm stats (None => no previous BN)

    Returns y4 (N, D, H, W*Cout) f32 (post-LeakyReLU, pre-BN), mean_y, istd_y.
    """
    n, d, h, kwin = x4.shape
    cin, cout = w.shape[2], w.shape[3]
    wsp = kwin // cin
    nout = wsp * cout

    wb = _banded_weights(w, wsp, istd)
    mu = (jnp.tile(mean.astype(jnp.float32), wsp) if mean is not None
          else jnp.zeros((kwin,), jnp.float32))[None, :]

    if l_dim == "h":
        # taps along H (inner row dim): shift +-1, boundary mask every H rows;
        # tile over D (a leading block dim => no (8,128) constraint on the tile).
        unit_bytes = h * 4 * (5 * kwin + 2 * nout)     # dbl-buffered in/out + temps
        tile = _pick_tile(d, unit_bytes, multiple_of=1, budget=budget)
        grid = (n, d // tile)
        xblk, oblk = (1, tile, h, kwin), (1, tile, h, nout)
        idx_map = lambda ni, pi: (ni, pi, 0, 0)
        shift, period = 1, h
        steps_per_n = d // tile
    else:
        # taps along D (outer row dim): shift +-tile, no interior mask;
        # tile over H (second-minor block dim => multiple of 8 or full extent).
        unit_bytes = d * 4 * (5 * kwin + 2 * nout)
        tile = _pick_tile(h, unit_bytes, multiple_of=8, budget=budget)
        grid = (n, h // tile)
        xblk, oblk = (1, d, tile, kwin), (1, d, tile, nout)
        idx_map = lambda ni, pi: (ni, 0, pi, 0)
        shift, period = tile, 0
        steps_per_n = h // tile

    n_steps = n * steps_per_n
    kernel = functools.partial(_conv_bn_leaky_kernel,
                               shift=shift, mask_period=period)
    y4, stats = pl.pallas_call(
        kernel,
        out_shape=(jax.ShapeDtypeStruct((n, d, h, nout), jnp.float32),
                   jax.ShapeDtypeStruct((n_steps, 2, nout), jnp.float32)),
        grid_spec=pltpu.PrefetchScalarGridSpec(
            num_scalar_prefetch=0,
            grid=grid,
            in_specs=[
                pl.BlockSpec(xblk, idx_map),
                pl.BlockSpec((1, kwin), lambda ni, pi: (0, 0)),
                pl.BlockSpec((3, kwin, nout), lambda ni, pi: (0, 0, 0)),
            ],
            out_specs=[
                pl.BlockSpec(oblk, idx_map),
                pl.BlockSpec((1, 2, nout),
                             lambda ni, pi: (ni * steps_per_n + pi, 0, 0)),
            ],
        ),
        compiler_params=pltpu.CompilerParams(
            dimension_semantics=("parallel", "parallel")),
    )(x4, mu, wb)

    # Finalize training-mode BatchNorm statistics (biased variance, gamma=1,
    # beta=0) from the fused per-step partial sums.
    per_ch = stats.sum(axis=0).reshape(2, wsp, cout).sum(axis=1)   # (2, Cout)
    cnt = n * d * h * wsp
    mean_y = per_ch[0] / cnt
    var_y = per_ch[1] / cnt - mean_y * mean_y
    istd_y = jax.lax.rsqrt(var_y + BN_EPS)
    return y4, mean_y, istd_y


def bn_bn_add(r_rows, s_rows, aff_r, aff_s):
    """out = BN(resA) + BN(shortcut), one fused elementwise kernel, tiled rows."""
    rsz, nl = r_rows.shape
    tr = _pick_tile(rsz, nl * 4 * 4, multiple_of=8, budget=4 << 20)
    return pl.pallas_call(
        _bn_bn_add_kernel,
        out_shape=jax.ShapeDtypeStruct((rsz, nl), jnp.float32),
        grid_spec=pltpu.PrefetchScalarGridSpec(
            num_scalar_prefetch=0,
            grid=(rsz // tr,),
            in_specs=[
                pl.BlockSpec((tr, nl), lambda i: (i, 0)),
                pl.BlockSpec((tr, nl), lambda i: (i, 0)),
                pl.BlockSpec((2, nl), lambda i: (0, 0)),
                pl.BlockSpec((2, nl), lambda i: (0, 0)),
            ],
            out_specs=pl.BlockSpec((tr, nl), lambda i: (i, 0)),
        ),
        compiler_params=pltpu.CompilerParams(
            dimension_semantics=("parallel",)),
    )(r_rows, s_rows, aff_r, aff_s)


# ----------------------------------------------------------------------------
# ResContextBlock forward
# ----------------------------------------------------------------------------
def init_params(key, in_filters, out_filters):
    """Synthetic conv weights, layout (tap_L, tap_W, Cin, Cout).  BatchNorm
    gamma=1 / beta=0 (per weight_initialization) is implicit in the kernels."""
    k1, k2, k3, k4 = jax.random.split(key, 4)

    def w(k, cin, cout):
        return jax.random.normal(k, (3, 3, cin, cout), jnp.float32) * 0.1

    return {
        "w1":   w(k1, in_filters,  out_filters),   # conv1   : kernel (1,3,3) taps (H,W)
        "w1_2": w(k2, out_filters, out_filters),   # conv1_2 : kernel (3,1,3) taps (D,W)
        "w2":   w(k3, in_filters,  out_filters),   # conv2   : kernel (3,1,3) taps (D,W)
        "w3":   w(k4, out_filters, out_filters),   # conv3   : kernel (1,3,3) taps (H,W)
    }


def res_context_block(x, params):
    """x: (N, D, H, W, Cin) dense voxel features -> (N, D, H, W, Cout)."""
    n, d, h, wsp, cin = x.shape
    cout = params["w1"].shape[-1]
    x4 = x.astype(jnp.float32).reshape(n, d, h, wsp * cin)   # rows (n,d,h), lanes (w,c)

    # shortcut branch: conv1 (1,3,3) -> LReLU -> BN -> conv1_2 (3,1,3) -> LReLU -> BN
    t1, m1, i1 = conv_stage(x4, params["w1"], None, None, l_dim="h")
    s_pre, ms, is_ = conv_stage(t1, params["w1_2"], m1, i1, l_dim="d")

    # main branch: conv2 (3,1,3) -> LReLU -> BN -> conv3 (1,3,3) -> LReLU -> BN
    t2, m2, i2 = conv_stage(x4, params["w2"], None, None, l_dim="d")
    r_pre, mr, ir = conv_stage(t2, params["w3"], m2, i2, l_dim="h")

    # fused epilogue: BN(resA) + BN(shortcut)   (residual add of the module)
    nout = wsp * cout
    aff_r = jnp.stack([jnp.tile(ir, wsp), jnp.tile(-mr * ir, wsp)], axis=0)
    aff_s = jnp.stack([jnp.tile(is_, wsp), jnp.tile(-ms * is_, wsp)], axis=0)
    out = bn_bn_add(r_pre.reshape(n * d * h, nout),
                    s_pre.reshape(n * d * h, nout), aff_r, aff_s)
    return out.reshape(n, d, h, wsp, cout)


# ----------------------------------------------------------------------------
# Pure-jnp reference (same f32 math)
# ----------------------------------------------------------------------------
def _ref_conv(a, w, axes):
    """Dense 'same' conv with 3 taps along each axis in `axes` (zero padding)."""
    pad = [(0, 0)] * a.ndim
    for ax in axes:
        pad[ax] = (1, 1)
    ap = jnp.pad(a, pad)
    s0, s1 = a.shape[axes[0]], a.shape[axes[1]]
    out = jnp.zeros(a.shape[:-1] + (w.shape[-1],), jnp.float32)
    for i in range(3):
        for j in range(3):
            sl = [slice(None)] * a.ndim
            sl[axes[0]] = slice(i, i + s0)
            sl[axes[1]] = slice(j, j + s1)
            out = out + jnp.einsum('ndhwc,co->ndhwo', ap[tuple(sl)], w[i, j],
                                   preferred_element_type=jnp.float32)
    return out


def res_context_block_ref(x, params):
    leaky = lambda v: jnp.where(v >= 0, v, NEG_SLOPE * v)

    def bn(y):
        m = jnp.mean(y, axis=(0, 1, 2, 3))
        var = jnp.mean(y * y, axis=(0, 1, 2, 3)) - m * m
        return (y - m) * jax.lax.rsqrt(var + BN_EPS)

    xf = x.astype(jnp.float32)
    # shortcut branch
    s = bn(leaky(_ref_conv(xf, params["w1"], (2, 3))))       # conv1   (1,3,3)
    s = bn(leaky(_ref_conv(s, params["w1_2"], (1, 3))))      # conv1_2 (3,1,3)
    # main branch
    r = bn(leaky(_ref_conv(xf, params["w2"], (1, 3))))       # conv2   (3,1,3)
    r = bn(leaky(_ref_conv(r, params["w3"], (2, 3))))        # conv3   (1,3,3)
    return r + s


# ----------------------------------------------------------------------------
if __name__ == "__main__":
    key = jax.random.PRNGKey(0)
    kx, kp = jax.random.split(key)

    # Shapes chosen so W*Cout == 128 (lane-dense stores) while staying small.
    n, d, h, wsp = 2, 16, 16, 16
    in_filters, out_filters = 4, 8

    x = jax.random.normal(kx, (n, d, h, wsp, in_filters), jnp.float32)
    params = init_params(kp, in_filters, out_filters)

    fwd = jax.jit(res_context_block)
    out = jax.block_until_ready(fwd(x, params))

    ref = jax.block_until_ready(res_context_block_ref(x, params))
    assert out.shape == (n, d, h, wsp, out_filters)
    # f32 math end-to-end in both paths; differences are reduction-order only.
    err = float(jnp.max(jnp.abs(out - ref)))
    assert jnp.allclose(out, ref, atol=1e-3, rtol=1e-3), f"max abs err {err}"
    print("KERNEL_OK")
</pallas_src>

<mosaic_0001>
module attributes {stable_mosaic.version = 11 : i64} {
  func.func @_conv_bn_leaky_kernel(%arg0: i32, %arg1: i32, %arg2: memref<1x8x16x64xf32, #tpu.memory_space<vmem>>, %arg3: memref<1x64xf32, #tpu.memory_space<vmem>>, %arg4: memref<3x64x128xf32, #tpu.memory_space<vmem>>, %arg5: memref<1x8x16x128xf32, #tpu.memory_space<vmem>>, %arg6: memref<1x2x128xf32, #tpu.memory_space<vmem>>) attributes {dimension_semantics = [#tpu.dimension_semantics<parallel>, #tpu.dimension_semantics<parallel>], iteration_bounds = array<i64: 2, 2>, scalar_prefetch = 0 : i64, scratch_operands = 0 : i64, tpu.core_type = #tpu.core_type<tc>, window_params = [{transform_indices = @transform_0, window_bounds = array<i64: 1, 8, 16, 64>}, {pipeline_mode = #tpu.pipeline_mode<synchronous>, transform_indices = @transform_1, window_bounds = array<i64: 1, 64>}, {pipeline_mode = #tpu.pipeline_mode<synchronous>, transform_indices = @transform_2, window_bounds = array<i64: 3, 64, 128>}, {transform_indices = @transform_3, window_bounds = array<i64: 1, 8, 16, 128>}, {transform_indices = @transform_4, window_bounds = array<i64: 1, 2, 128>}]} {
    %c0 = arith.constant 0 : index
    %c0_0 = arith.constant 0 : index
    %c0_1 = arith.constant 0 : index
    %c0_2 = arith.constant 0 : index
    %0 = vector.load %arg2[%c0, %c0_0, %c0_1, %c0_2] : memref<1x8x16x64xf32, #tpu.memory_space<vmem>>, vector<1x8x16x64xf32>
    %1 = vector.shape_cast %0 : vector<1x8x16x64xf32> to vector<128x64xf32>
    %c0_3 = arith.constant 0 : index
    %c0_4 = arith.constant 0 : index
    %2 = vector.load %arg3[%c0_3, %c0_4] : memref<1x64xf32, #tpu.memory_space<vmem>>, vector<1x64xf32>
    %3 = vector.broadcast %2 : vector<1x64xf32> to vector<128x64xf32>
    %4 = arith.subf %1, %3 : vector<128x64xf32>
    %cst = arith.constant 0.000000e+00 : f32
    %5 = vector.broadcast %cst : f32 to vector<1x64xf32>
    %6 = vector.extract_strided_slice %4 {offsets = [0, 0], sizes = [127, 64], strides = [1, 1]} : vector<128x64xf32> to vector<127x64xf32>
    %7 = tpu.concatenate %5, %6 in 0 : vector<1x64xf32>, vector<127x64xf32> -> vector<128x64xf32>
    %8 = vector.extract_strided_slice %4 {offsets = [1, 0], sizes = [127, 64], strides = [1, 1]} : vector<128x64xf32> to vector<127x64xf32>
    %9 = tpu.concatenate %8, %5 in 0 : vector<127x64xf32>, vector<1x64xf32> -> vector<128x64xf32>
    %10 = tpu.iota {dimensions = array<i32: 0>} : vector<128x1xi32>
    %c16_i32 = arith.constant 16 : i32
    %c0_i32 = arith.constant 0 : i32
    %11 = arith.cmpi eq, %c16_i32, %c0_i32 : i32
    %c1_i32 = arith.constant 1 : i32
    %12 = arith.select %11, %c1_i32, %c16_i32 : i32
    %13 = vector.broadcast %12 : i32 to vector<128x1xi32>
    %14 = arith.remsi %10, %13 : vector<128x1xi32>
    %c0_i32_5 = arith.constant 0 : i32
    %15 = vector.broadcast %c0_i32_5 : i32 to vector<128x1xi32>
    %16 = arith.cmpi ne, %14, %15 : vector<128x1xi32>
    %c0_i32_6 = arith.constant 0 : i32
    %17 = vector.broadcast %c0_i32_6 : i32 to vector<128x1xi32>
    %18 = arith.cmpi slt, %14, %17 : vector<128x1xi32>
    %c0_i32_7 = arith.constant 0 : i32
    %19 = arith.cmpi slt, %12, %c0_i32_7 : i32
    %20 = vector.broadcast %19 : i1 to vector<128x1xi1>
    %21 = vector.broadcast %20 : vector<128x1xi1> to vector<128x1xi1>
    %22 = arith.xori %18, %21 : vector<128x1xi1>
    %23 = arith.andi %22, %16 : vector<128x1xi1>
    %24 = vector.broadcast %12 : i32 to vector<128x1xi32>
    %25 = arith.addi %14, %24 : vector<128x1xi32>
    %26 = arith.select %23, %25, %14 : vector<128x1xi1>, vector<128x1xi32>
    %c0_i32_8 = arith.constant 0 : i32
    %27 = vector.broadcast %c0_i32_8 : i32 to vector<128x1xi32>
    %28 = arith.cmpi eq, %26, %27 : vector<128x1xi32>
    %cst_9 = arith.constant 0.000000e+00 : f32
    %29 = vector.shape_cast %28 : vector<128x1xi1> to vector<128x1xi1>
    %30 = vector.broadcast %29 : vector<128x1xi1> to vector<128x64xi1>
    %31 = vector.broadcast %cst_9 : f32 to vector<128x64xf32>
    %32 = arith.select %30, %31, %7 : vector<128x64xi1>, vector<128x64xf32>
    %c15_i32 = arith.constant 15 : i32
    %33 = vector.broadcast %c15_i32 : i32 to vector<128x1xi32>
    %34 = arith.cmpi eq, %26, %33 : vector<128x1xi32>
    %cst_10 = arith.constant 0.000000e+00 : f32
    %35 = vector.shape_cast %34 : vector<128x1xi1> to vector<128x1xi1>
    %36 = vector.broadcast %35 : vector<128x1xi1> to vector<128x64xi1>
    %37 = vector.broadcast %cst_10 : f32 to vector<128x64xf32>
    %38 = arith.select %36, %37, %9 : vector<128x64xi1>, vector<128x64xf32>
    %c0_11 = arith.constant 0 : index
    %c0_12 = arith.constant 0 : index
    %c0_13 = arith.constant 0 : index
    %39 = vector.load %arg4[%c0_11, %c0_12, %c0_13] : memref<3x64x128xf32, #tpu.memory_space<vmem>>, vector<1x64x128xf32>
    %40 = vector.shape_cast %39 : vector<1x64x128xf32> to vector<64x128xf32>
    %cst_14 = arith.constant dense<0.000000e+00> : vector<128x128xf32>
    %41 = tpu.matmul %32, %40, %cst_14 {dimension_numbers = #tpu.dot_dimension_numbers<[1], [0], [0], [1], [0, 0, 1, 1], [], []>} : vector<128x64xf32>, vector<64x128xf32>, vector<128x128xf32> -> vector<128x128xf32>
    %c1 = arith.constant 1 : index
    %c0_15 = arith.constant 0 : index
    %c0_16 = arith.constant 0 : index
    %42 = vector.load %arg4[%c1, %c0_15, %c0_16] : memref<3x64x128xf32, #tpu.memory_space<vmem>>, vector<1x64x128xf32>
    %43 = vector.shape_cast %42 : vector<1x64x128xf32> to vector<64x128xf32>
    %cst_17 = arith.constant dense<0.000000e+00> : vector<128x128xf32>
    %44 = tpu.matmul %4, %43, %cst_17 {dimension_numbers = #tpu.dot_dimension_numbers<[1], [0], [0], [1], [0, 0, 1, 1], [], []>} : vector<128x64xf32>, vector<64x128xf32>, vector<128x128xf32> -> vector<128x128xf32>
    %45 = arith.addf %41, %44 : vector<128x128xf32>
    %c2 = arith.constant 2 : index
    %c0_18 = arith.constant 0 : index
    %c0_19 = arith.constant 0 : index
    %46 = vector.load %arg4[%c2, %c0_18, %c0_19] : memref<3x64x128xf32, #tpu.memory_space<vmem>>, vector<1x64x128xf32>
    %47 = vector.shape_cast %46 : vector<1x64x128xf32> to vector<64x128xf32>
    %cst_20 = arith.constant dense<0.000000e+00> : vector<128x128xf32>
    %48 = tpu.matmul %38, %47, %cst_20 {dimension_numbers = #tpu.dot_dimension_numbers<[1], [0], [0], [1], [0, 0, 1, 1], [], []>} : vector<128x64xf32>, vector<64x128xf32>, vector<128x128xf32> -> vector<128x128xf32>
    %49 = arith.addf %45, %48 : vector<128x128xf32>
    %cst_21 = arith.constant 0.000000e+00 : f32
    %50 = vector.broadcast %cst_21 : f32 to vector<128x128xf32>
    %51 = arith.cmpf oge, %49, %50 : vector<128x128xf32>
    %cst_22 = arith.constant 0.00999999977 : f32
    %52 = vector.broadcast %cst_22 : f32 to vector<128x128xf32>
    %53 = arith.mulf %52, %49 : vector<128x128xf32>
    %54 = arith.select %51, %49, %53 : vector<128x128xi1>, vector<128x128xf32>
    %55 = vector.shape_cast %54 : vector<128x128xf32> to vector<1x8x16x128xf32>
    %c0_23 = arith.constant 0 : index
    %c0_24 = arith.constant 0 : index
    %c0_25 = arith.constant 0 : index
    %c0_26 = arith.constant 0 : index
    %56 = vector.load %arg5[%c0_23, %c0_24, %c0_25, %c0_26] : memref<1x8x16x128xf32, #tpu.memory_space<vmem>>, vector<1x8x16x128xf32>
    tpu.vector_store %arg5[%c0_23, %c0_24, %c0_25, %c0_26], %55 {strides = array<i32>} : memref<1x8x16x128xf32, #tpu.memory_space<vmem>>, vector<1x8x16x128xf32>,
    %cst_27 = arith.constant dense<0.000000e+00> : vector<128xf32>
    %57 = vector.multi_reduction <add>, %54, %cst_27 [0] : vector<128x128xf32> to vector<128xf32>
    %58 = vector.shape_cast %57 : vector<128xf32> to vector<1x128xf32>
    %c0_28 = arith.constant 0 : index
    %c0_29 = arith.constant 0 : index
    %c0_30 = arith.constant 0 : index
    %59 = vector.load %arg6[%c0_28, %c0_29, %c0_30] : memref<1x2x128xf32, #tpu.memory_space<vmem>>, vector<1x1x128xf32>
    %60 = vector.shape_cast %59 : vector<1x1x128xf32> to vector<1x128xf32>
    %61 = vector.shape_cast %58 : vector<1x128xf32> to vector<1x1x128xf32>
    tpu.vector_store %arg6[%c0_28, %c0_29, %c0_30], %61 {strides = array<i32>} : memref<1x2x128xf32, #tpu.memory_space<vmem>>, vector<1x1x128xf32>,
    %62 = arith.mulf %54, %54 : vector<128x128xf32>
    %cst_31 = arith.constant dense<0.000000e+00> : vector<128xf32>
    %63 = vector.multi_reduction <add>, %62, %cst_31 [0] : vector<128x128xf32> to vector<128xf32>
    %64 = vector.shape_cast %63 : vector<128xf32> to vector<1x128xf32>
    %c0_32 = arith.constant 0 : index
    %c1_33 = arith.constant 1 : index
    %c0_34 = arith.constant 0 : index
    %65 = vector.load %arg6[%c0_32, %c1_33, %c0_34] : memref<1x2x128xf32, #tpu.memory_space<vmem>>, vector<1x1x128xf32>
    %66 = vector.shape_cast %65 : vector<1x1x128xf32> to vector<1x128xf32>
    %67 = vector.shape_cast %64 : vector<1x128xf32> to vector<1x1x128xf32>
    tpu.vector_store %arg6[%c0_32, %c1_33, %c0_34], %67 {strides = array<i32>} : memref<1x2x128xf32, #tpu.memory_space<vmem>>, vector<1x1x128xf32>,
    return
  }
  func.func @transform_0(%arg0: i32, %arg1: i32) -> (i32, i32, i32, i32) {
    %c0_i32 = arith.constant 0 : i32
    %c0_i32_0 = arith.constant 0 : i32
    %c0_i32_1 = arith.constant 0 : i32
    return %arg0, %arg1, %c0_i32, %c0_i32_0 : i32, i32, i32, i32
  }
  func.func @transform_1(%arg0: i32, %arg1: i32) -> (i32, i32) {
    %c0_i32 = arith.constant 0 : i32
    %c0_i32_0 = arith.constant 0 : i32
    %c0_i32_1 = arith.constant 0 : i32
    return %c0_i32, %c0_i32_0 : i32, i32
  }
  func.func @transform_2(%arg0: i32, %arg1: i32) -> (i32, i32, i32) {
    %c0_i32 = arith.constant 0 : i32
    %c0_i32_0 = arith.constant 0 : i32
    %c0_i32_1 = arith.constant 0 : i32
    %c0_i32_2 = arith.constant 0 : i32
    return %c0_i32, %c0_i32_0, %c0_i32_1 : i32, i32, i32
  }
  func.func @transform_3(%arg0: i32, %arg1: i32) -> (i32, i32, i32, i32) {
    %c0_i32 = arith.constant 0 : i32
    %c0_i32_0 = arith.constant 0 : i32
    %c0_i32_1 = arith.constant 0 : i32
    return %arg0, %arg1, %c0_i32, %c0_i32_0 : i32, i32, i32, i32
  }
  func.func @transform_4(%arg0: i32, %arg1: i32) -> (i32, i32, i32) {
    %c2_i32 = arith.constant 2 : i32
    %0 = arith.muli %arg0, %c2_i32 : i32
    %1 = arith.addi %0, %arg1 : i32
    %c0_i32 = arith.constant 0 : i32
    %c0_i32_0 = arith.constant 0 : i32
    %c0_i32_1 = arith.constant 0 : i32
    return %1, %c0_i32, %c0_i32_0 : i32, i32, i32
  }
}

module attributes {stable_mosaic.version = 11 : i64} {
  func.func @_conv_bn_leaky_kernel(%arg0: i32, %arg1: i32, %arg2: memref<1x16x8x64xf32, #tpu.memory_space<vmem>>, %arg3: memref<1x64xf32, #tpu.memory_space<vmem>>, %arg4: memref<3x64x128xf32, #tpu.memory_space<vmem>>, %arg5: memref<1x16x8x128xf32, #tpu.memory_space<vmem>>, %arg6: memref<1x2x128xf32, #tpu.memory_space<vmem>>) attributes {dimension_semantics = [#tpu.dimension_semantics<parallel>, #tpu.dimension_semantics<parallel>], iteration_bounds = array<i64: 2, 2>, scalar_prefetch = 0 : i64, scratch_operands = 0 : i64, tpu.core_type = #tpu.core_type<tc>, window_params = [{transform_indices = @transform_0, window_bounds = array<i64: 1, 16, 8, 64>}, {pipeline_mode = #tpu.pipeline_mode<synchronous>, transform_indices = @transform_1, window_bounds = array<i64: 1, 64>}, {pipeline_mode = #tpu.pipeline_mode<synchronous>, transform_indices = @transform_2, window_bounds = array<i64: 3, 64, 128>}, {transform_indices = @transform_3, window_bounds = array<i64: 1, 16, 8, 128>}, {transform_indices = @transform_4, window_bounds = array<i64: 1, 2, 128>}]} {
    %c0 = arith.constant 0 : index
    %c0_0 = arith.constant 0 : index
    %c0_1 = arith.constant 0 : index
    %c0_2 = arith.constant 0 : index
    %0 = vector.load %arg2[%c0, %c0_0, %c0_1, %c0_2] : memref<1x16x8x64xf32, #tpu.memory_space<vmem>>, vector<1x16x8x64xf32>
    %1 = vector.shape_cast %0 : vector<1x16x8x64xf32> to vector<128x64xf32>
    %c0_3 = arith.constant 0 : index
    %c0_4 = arith.constant 0 : index
    %2 = vector.load %arg3[%c0_3, %c0_4] : memref<1x64xf32, #tpu.memory_space<vmem>>, vector<1x64xf32>
    %3 = vector.broadcast %2 : vector<1x64xf32> to vector<128x64xf32>
    %4 = arith.subf %1, %3 : vector<128x64xf32>
    %cst = arith.constant 0.000000e+00 : f32
    %5 = vector.broadcast %cst : f32 to vector<8x64xf32>
    %6 = vector.extract_strided_slice %4 {offsets = [0, 0], sizes = [120, 64], strides = [1, 1]} : vector<128x64xf32> to vector<120x64xf32>
    %7 = tpu.concatenate %5, %6 in 0 : vector<8x64xf32>, vector<120x64xf32> -> vector<128x64xf32>
    %8 = vector.extract_strided_slice %4 {offsets = [8, 0], sizes = [120, 64], strides = [1, 1]} : vector<128x64xf32> to vector<120x64xf32>
    %9 = tpu.concatenate %8, %5 in 0 : vector<120x64xf32>, vector<8x64xf32> -> vector<128x64xf32>
    %c0_5 = arith.constant 0 : index
    %c0_6 = arith.constant 0 : index
    %c0_7 = arith.constant 0 : index
    %10 = vector.load %arg4[%c0_5, %c0_6, %c0_7] : memref<3x64x128xf32, #tpu.memory_space<vmem>>, vector<1x64x128xf32>
    %11 = vector.shape_cast %10 : vector<1x64x128xf32> to vector<64x128xf32>
    %cst_8 = arith.constant dense<0.000000e+00> : vector<128x128xf32>
    %12 = tpu.matmul %7, %11, %cst_8 {dimension_numbers = #tpu.dot_dimension_numbers<[1], [0], [0], [1], [0, 0, 1, 1], [], []>} : vector<128x64xf32>, vector<64x128xf32>, vector<128x128xf32> -> vector<128x128xf32>
    %c1 = arith.constant 1 : index
    %c0_9 = arith.constant 0 : index
    %c0_10 = arith.constant 0 : index
    %13 = vector.load %arg4[%c1, %c0_9, %c0_10] : memref<3x64x128xf32, #tpu.memory_space<vmem>>, vector<1x64x128xf32>
    %14 = vector.shape_cast %13 : vector<1x64x128xf32> to vector<64x128xf32>
    %cst_11 = arith.constant dense<0.000000e+00> : vector<128x128xf32>
    %15 = tpu.matmul %4, %14, %cst_11 {dimension_numbers = #tpu.dot_dimension_numbers<[1], [0], [0], [1], [0, 0, 1, 1], [], []>} : vector<128x64xf32>, vector<64x128xf32>, vector<128x128xf32> -> vector<128x128xf32>
    %16 = arith.addf %12, %15 : vector<128x128xf32>
    %c2 = arith.constant 2 : index
    %c0_12 = arith.constant 0 : index
    %c0_13 = arith.constant 0 : index
    %17 = vector.load %arg4[%c2, %c0_12, %c0_13] : memref<3x64x128xf32, #tpu.memory_space<vmem>>, vector<1x64x128xf32>
    %18 = vector.shape_cast %17 : vector<1x64x128xf32> to vector<64x128xf32>
    %cst_14 = arith.constant dense<0.000000e+00> : vector<128x128xf32>
    %19 = tpu.matmul %9, %18, %cst_14 {dimension_numbers = #tpu.dot_dimension_numbers<[1], [0], [0], [1], [0, 0, 1, 1], [], []>} : vector<128x64xf32>, vector<64x128xf32>, vector<128x128xf32> -> vector<128x128xf32>
    %20 = arith.addf %16, %19 : vector<128x128xf32>
    %cst_15 = arith.constant 0.000000e+00 : f32
    %21 = vector.broadcast %cst_15 : f32 to vector<128x128xf32>
    %22 = arith.cmpf oge, %20, %21 : vector<128x128xf32>
    %cst_16 = arith.constant 0.00999999977 : f32
    %23 = vector.broadcast %cst_16 : f32 to vector<128x128xf32>
    %24 = arith.mulf %23, %20 : vector<128x128xf32>
    %25 = arith.select %22, %20, %24 : vector<128x128xi1>, vector<128x128xf32>
    %26 = vector.shape_cast %25 : vector<128x128xf32> to vector<1x16x8x128xf32>
    %c0_17 = arith.constant 0 : index
    %c0_18 = arith.constant 0 : index
    %c0_19 = arith.constant 0 : index
    %c0_20 = arith.constant 0 : index
    %27 = vector.load %arg5[%c0_17, %c0_18, %c0_19, %c0_20] : memref<1x16x8x128xf32, #tpu.memory_space<vmem>>, vector<1x16x8x128xf32>
    tpu.vector_store %arg5[%c0_17, %c0_18, %c0_19, %c0_20], %26 {strides = array<i32>} : memref<1x16x8x128xf32, #tpu.memory_space<vmem>>, vector<1x16x8x128xf32>,
    %cst_21 = arith.constant dense<0.000000e+00> : vector<128xf32>
    %28 = vector.multi_reduction <add>, %25, %cst_21 [0] : vector<128x128xf32> to vector<128xf32>
    %29 = vector.shape_cast %28 : vector<128xf32> to vector<1x128xf32>
    %c0_22 = arith.constant 0 : index
    %c0_23 = arith.constant 0 : index
    %c0_24 = arith.constant 0 : index
    %30 = vector.load %arg6[%c0_22, %c0_23, %c0_24] : memref<1x2x128xf32, #tpu.memory_space<vmem>>, vector<1x1x128xf32>
    %31 = vector.shape_cast %30 : vector<1x1x128xf32> to vector<1x128xf32>
    %32 = vector.shape_cast %29 : vector<1x128xf32> to vector<1x1x128xf32>
    tpu.vector_store %arg6[%c0_22, %c0_23, %c0_24], %32 {strides = array<i32>} : memref<1x2x128xf32, #tpu.memory_space<vmem>>, vector<1x1x128xf32>,
    %33 = arith.mulf %25, %25 : vector<128x128xf32>
    %cst_25 = arith.constant dense<0.000000e+00> : vector<128xf32>
    %34 = vector.multi_reduction <add>, %33, %cst_25 [0] : vector<128x128xf32> to vector<128xf32>
    %35 = vector.shape_cast %34 : vector<128xf32> to vector<1x128xf32>
    %c0_26 = arith.constant 0 : index
    %c1_27 = arith.constant 1 : index
    %c0_28 = arith.constant 0 : index
    %36 = vector.load %arg6[%c0_26, %c1_27, %c0_28] : memref<1x2x128xf32, #tpu.memory_space<vmem>>, vector<1x1x128xf32>
    %37 = vector.shape_cast %36 : vector<1x1x128xf32> to vector<1x128xf32>
    %38 = vector.shape_cast %35 : vector<1x128xf32> to vector<1x1x128xf32>
    tpu.vector_store %arg6[%c0_26, %c1_27, %c0_28], %38 {strides = array<i32>} : memref<1x2x128xf32, #tpu.memory_space<vmem>>, vector<1x1x128xf32>,
    return
  }
  func.func @transform_0(%arg0: i32, %arg1: i32) -> (i32, i32, i32, i32) {
    %c0_i32 = arith.constant 0 : i32
    %c0_i32_0 = arith.constant 0 : i32
    %c0_i32_1 = arith.constant 0 : i32
    return %arg0, %c0_i32, %arg1, %c0_i32_0 : i32, i32, i32, i32
  }
  func.func @transform_1(%arg0: i32, %arg1: i32) -> (i32, i32) {
    %c0_i32 = arith.constant 0 : i32
    %c0_i32_0 = arith.constant 0 : i32
    %c0_i32_1 = arith.constant 0 : i32
    return %c0_i32, %c0_i32_0 : i32, i32
  }
  func.func @transform_2(%arg0: i32, %arg1: i32) -> (i32, i32, i32) {
    %c0_i32 = arith.constant 0 : i32
    %c0_i32_0 = arith.constant 0 : i32
    %c0_i32_1 = arith.constant 0 : i32
    %c0_i32_2 = arith.constant 0 : i32
    return %c0_i32, %c0_i32_0, %c0_i32_1 : i32, i32, i32
  }
  func.func @transform_3(%arg0: i32, %arg1: i32) -> (i32, i32, i32, i32) {
    %c0_i32 = arith.constant 0 : i32
    %c0_i32_0 = arith.constant 0 : i32
    %c0_i32_1 = arith.constant 0 : i32
    return %arg0, %c0_i32, %arg1, %c0_i32_0 : i32, i32, i32, i32
  }
  func.func @transform_4(%arg0: i32, %arg1: i32) -> (i32, i32, i32) {
    %c2_i32 = arith.constant 2 : i32
    %0 = arith.muli %arg0, %c2_i32 : i32
    %1 = arith.addi %0, %arg1 : i32
    %c0_i32 = arith.constant 0 : i32
    %c0_i32_0 = arith.constant 0 : i32
    %c0_i32_1 = arith.constant 0 : i32
    return %1, %c0_i32, %c0_i32_0 : i32, i32, i32
  }
}

module attributes {stable_mosaic.version = 11 : i64} {
  func.func @_conv_bn_leaky_kernel(%arg0: i32, %arg1: i32, %arg2: memref<1x8x16x128xf32, #tpu.memory_space<vmem>>, %arg3: memref<1x128xf32, #tpu.memory_space<vmem>>, %arg4: memref<3x128x128xf32, #tpu.memory_space<vmem>>, %arg5: memref<1x8x16x128xf32, #tpu.memory_space<vmem>>, %arg6: memref<1x2x128xf32, #tpu.memory_space<vmem>>) attributes {dimension_semantics = [#tpu.dimension_semantics<parallel>, #tpu.dimension_semantics<parallel>], iteration_bounds = array<i64: 2, 2>, scalar_prefetch = 0 : i64, scratch_operands = 0 : i64, tpu.core_type = #tpu.core_type<tc>, window_params = [{transform_indices = @transform_0, window_bounds = array<i64: 1, 8, 16, 128>}, {pipeline_mode = #tpu.pipeline_mode<synchronous>, transform_indices = @transform_1, window_bounds = array<i64: 1, 128>}, {pipeline_mode = #tpu.pipeline_mode<synchronous>, transform_indices = @transform_2, window_bounds = array<i64: 3, 128, 128>}, {transform_indices = @transform_3, window_bounds = array<i64: 1, 8, 16, 128>}, {transform_indices = @transform_4, window_bounds = array<i64: 1, 2, 128>}]} {
    %c0 = arith.constant 0 : index
    %c0_0 = arith.constant 0 : index
    %c0_1 = arith.constant 0 : index
    %c0_2 = arith.constant 0 : index
    %0 = vector.load %arg2[%c0, %c0_0, %c0_1, %c0_2] : memref<1x8x16x128xf32, #tpu.memory_space<vmem>>, vector<1x8x16x128xf32>
    %1 = vector.shape_cast %0 : vector<1x8x16x128xf32> to vector<128x128xf32>
    %c0_3 = arith.constant 0 : index
    %c0_4 = arith.constant 0 : index
    %2 = vector.load %arg3[%c0_3, %c0_4] : memref<1x128xf32, #tpu.memory_space<vmem>>, vector<1x128xf32>
    %3 = vector.broadcast %2 : vector<1x128xf32> to vector<128x128xf32>
    %4 = arith.subf %1, %3 : vector<128x128xf32>
    %cst = arith.constant 0.000000e+00 : f32
    %5 = vector.broadcast %cst : f32 to vector<1x128xf32>
    %6 = vector.extract_strided_slice %4 {offsets = [0, 0], sizes = [127, 128], strides = [1, 1]} : vector<128x128xf32> to vector<127x128xf32>
    %7 = tpu.concatenate %5, %6 in 0 : vector<1x128xf32>, vector<127x128xf32> -> vector<128x128xf32>
    %8 = vector.extract_strided_slice %4 {offsets = [1, 0], sizes = [127, 128], strides = [1, 1]} : vector<128x128xf32> to vector<127x128xf32>
    %9 = tpu.concatenate %8, %5 in 0 : vector<127x128xf32>, vector<1x128xf32> -> vector<128x128xf32>
    %10 = tpu.iota {dimensions = array<i32: 0>} : vector<128x1xi32>
    %c16_i32 = arith.constant 16 : i32
    %c0_i32 = arith.constant 0 : i32
    %11 = arith.cmpi eq, %c16_i32, %c0_i32 : i32
    %c1_i32 = arith.constant 1 : i32
    %12 = arith.select %11, %c1_i32, %c16_i32 : i32
    %13 = vector.broadcast %12 : i32 to vector<128x1xi32>
    %14 = arith.remsi %10, %13 : vector<128x1xi32>
    %c0_i32_5 = arith.constant 0 : i32
    %15 = vector.broadcast %c0_i32_5 : i32 to vector<128x1xi32>
    %16 = arith.cmpi ne, %14, %15 : vector<128x1xi32>
    %c0_i32_6 = arith.constant 0 : i32
    %17 = vector.broadcast %c0_i32_6 : i32 to vector<128x1xi32>
    %18 = arith.cmpi slt, %14, %17 : vector<128x1xi32>
    %c0_i32_7 = arith.constant 0 : i32
    %19 = arith.cmpi slt, %12, %c0_i32_7 : i32
    %20 = vector.broadcast %19 : i1 to vector<128x1xi1>
    %21 = vector.broadcast %20 : vector<128x1xi1> to vector<128x1xi1>
    %22 = arith.xori %18, %21 : vector<128x1xi1>
    %23 = arith.andi %22, %16 : vector<128x1xi1>
    %24 = vector.broadcast %12 : i32 to vector<128x1xi32>
    %25 = arith.addi %14, %24 : vector<128x1xi32>
    %26 = arith.select %23, %25, %14 : vector<128x1xi1>, vector<128x1xi32>
    %c0_i32_8 = arith.constant 0 : i32
    %27 = vector.broadcast %c0_i32_8 : i32 to vector<128x1xi32>
    %28 = arith.cmpi eq, %26, %27 : vector<128x1xi32>
    %cst_9 = arith.constant 0.000000e+00 : f32
    %29 = vector.shape_cast %28 : vector<128x1xi1> to vector<128x1xi1>
    %30 = vector.broadcast %29 : vector<128x1xi1> to vector<128x128xi1>
    %31 = vector.broadcast %cst_9 : f32 to vector<128x128xf32>
    %32 = arith.select %30, %31, %7 : vector<128x128xi1>, vector<128x128xf32>
    %c15_i32 = arith.constant 15 : i32
    %33 = vector.broadcast %c15_i32 : i32 to vector<128x1xi32>
    %34 = arith.cmpi eq, %26, %33 : vector<128x1xi32>
    %cst_10 = arith.constant 0.000000e+00 : f32
    %35 = vector.shape_cast %34 : vector<128x1xi1> to vector<128x1xi1>
    %36 = vector.broadcast %35 : vector<128x1xi1> to vector<128x128xi1>
    %37 = vector.broadcast %cst_10 : f32 to vector<128x128xf32>
    %38 = arith.select %36, %37, %9 : vector<128x128xi1>, vector<128x128xf32>
    %c0_11 = arith.constant 0 : index
    %c0_12 = arith.constant 0 : index
    %c0_13 = arith.constant 0 : index
    %39 = vector.load %arg4[%c0_11, %c0_12, %c0_13] : memref<3x128x128xf32, #tpu.memory_space<vmem>>, vector<1x128x128xf32>
    %40 = vector.shape_cast %39 : vector<1x128x128xf32> to vector<128x128xf32>
    %cst_14 = arith.constant dense<0.000000e+00> : vector<128x128xf32>
    %41 = tpu.matmul %32, %40, %cst_14 {dimension_numbers = #tpu.dot_dimension_numbers<[1], [0], [0], [1], [0, 0, 1, 1], [], []>} : vector<128x128xf32>, vector<128x128xf32>, vector<128x128xf32> -> vector<128x128xf32>
    %c1 = arith.constant 1 : index
    %c0_15 = arith.constant 0 : index
    %c0_16 = arith.constant 0 : index
    %42 = vector.load %arg4[%c1, %c0_15, %c0_16] : memref<3x128x128xf32, #tpu.memory_space<vmem>>, vector<1x128x128xf32>
    %43 = vector.shape_cast %42 : vector<1x128x128xf32> to vector<128x128xf32>
    %cst_17 = arith.constant dense<0.000000e+00> : vector<128x128xf32>
    %44 = tpu.matmul %4, %43, %cst_17 {dimension_numbers = #tpu.dot_dimension_numbers<[1], [0], [0], [1], [0, 0, 1, 1], [], []>} : vector<128x128xf32>, vector<128x128xf32>, vector<128x128xf32> -> vector<128x128xf32>
    %45 = arith.addf %41, %44 : vector<128x128xf32>
    %c2 = arith.constant 2 : index
    %c0_18 = arith.constant 0 : index
    %c0_19 = arith.constant 0 : index
    %46 = vector.load %arg4[%c2, %c0_18, %c0_19] : memref<3x128x128xf32, #tpu.memory_space<vmem>>, vector<1x128x128xf32>
    %47 = vector.shape_cast %46 : vector<1x128x128xf32> to vector<128x128xf32>
    %cst_20 = arith.constant dense<0.000000e+00> : vector<128x128xf32>
    %48 = tpu.matmul %38, %47, %cst_20 {dimension_numbers = #tpu.dot_dimension_numbers<[1], [0], [0], [1], [0, 0, 1, 1], [], []>} : vector<128x128xf32>, vector<128x128xf32>, vector<128x128xf32> -> vector<128x128xf32>
    %49 = arith.addf %45, %48 : vector<128x128xf32>
    %cst_21 = arith.constant 0.000000e+00 : f32
    %50 = vector.broadcast %cst_21 : f32 to vector<128x128xf32>
    %51 = arith.cmpf oge, %49, %50 : vector<128x128xf32>
    %cst_22 = arith.constant 0.00999999977 : f32
    %52 = vector.broadcast %cst_22 : f32 to vector<128x128xf32>
    %53 = arith.mulf %52, %49 : vector<128x128xf32>
    %54 = arith.select %51, %49, %53 : vector<128x128xi1>, vector<128x128xf32>
    %55 = vector.shape_cast %54 : vector<128x128xf32> to vector<1x8x16x128xf32>
    %c0_23 = arith.constant 0 : index
    %c0_24 = arith.constant 0 : index
    %c0_25 = arith.constant 0 : index
    %c0_26 = arith.constant 0 : index
    %56 = vector.load %arg5[%c0_23, %c0_24, %c0_25, %c0_26] : memref<1x8x16x128xf32, #tpu.memory_space<vmem>>, vector<1x8x16x128xf32>
    tpu.vector_store %arg5[%c0_23, %c0_24, %c0_25, %c0_26], %55 {strides = array<i32>} : memref<1x8x16x128xf32, #tpu.memory_space<vmem>>, vector<1x8x16x128xf32>,
    %cst_27 = arith.constant dense<0.000000e+00> : vector<128xf32>
    %57 = vector.multi_reduction <add>, %54, %cst_27 [0] : vector<128x128xf32> to vector<128xf32>
    %58 = vector.shape_cast %57 : vector<128xf32> to vector<1x128xf32>
    %c0_28 = arith.constant 0 : index
    %c0_29 = arith.constant 0 : index
    %c0_30 = arith.constant 0 : index
    %59 = vector.load %arg6[%c0_28, %c0_29, %c0_30] : memref<1x2x128xf32, #tpu.memory_space<vmem>>, vector<1x1x128xf32>
    %60 = vector.shape_cast %59 : vector<1x1x128xf32> to vector<1x128xf32>
    %61 = vector.shape_cast %58 : vector<1x128xf32> to vector<1x1x128xf32>
    tpu.vector_store %arg6[%c0_28, %c0_29, %c0_30], %61 {strides = array<i32>} : memref<1x2x128xf32, #tpu.memory_space<vmem>>, vector<1x1x128xf32>,
    %62 = arith.mulf %54, %54 : vector<128x128xf32>
    %cst_31 = arith.constant dense<0.000000e+00> : vector<128xf32>
    %63 = vector.multi_reduction <add>, %62, %cst_31 [0] : vector<128x128xf32> to vector<128xf32>
    %64 = vector.shape_cast %63 : vector<128xf32> to vector<1x128xf32>
    %c0_32 = arith.constant 0 : index
    %c1_33 = arith.constant 1 : index
    %c0_34 = arith.constant 0 : index
    %65 = vector.load %arg6[%c0_32, %c1_33, %c0_34] : memref<1x2x128xf32, #tpu.memory_space<vmem>>, vector<1x1x128xf32>
    %66 = vector.shape_cast %65 : vector<1x1x128xf32> to vector<1x128xf32>
    %67 = vector.shape_cast %64 : vector<1x128xf32> to vector<1x1x128xf32>
    tpu.vector_store %arg6[%c0_32, %c1_33, %c0_34], %67 {strides = array<i32>} : memref<1x2x128xf32, #tpu.memory_space<vmem>>, vector<1x1x128xf32>,
    return
  }
  func.func @transform_0(%arg0: i32, %arg1: i32) -> (i32, i32, i32, i32) {
    %c0_i32 = arith.constant 0 : i32
    %c0_i32_0 = arith.constant 0 : i32
    %c0_i32_1 = arith.constant 0 : i32
    return %arg0, %arg1, %c0_i32, %c0_i32_0 : i32, i32, i32, i32
  }
  func.func @transform_1(%arg0: i32, %arg1: i32) -> (i32, i32) {
    %c0_i32 = arith.constant 0 : i32
    %c0_i32_0 = arith.constant 0 : i32
    %c0_i32_1 = arith.constant 0 : i32
    return %c0_i32, %c0_i32_0 : i32, i32
  }
  func.func @transform_2(%arg0: i32, %arg1: i32) -> (i32, i32, i32) {
    %c0_i32 = arith.constant 0 : i32
    %c0_i32_0 = arith.constant 0 : i32
    %c0_i32_1 = arith.constant 0 : i32
    %c0_i32_2 = arith.constant 0 : i32
    return %c0_i32, %c0_i32_0, %c0_i32_1 : i32, i32, i32
  }
  func.func @transform_3(%arg0: i32, %arg1: i32) -> (i32, i32, i32, i32) {
    %c0_i32 = arith.constant 0 : i32
    %c0_i32_0 = arith.constant 0 : i32
    %c0_i32_1 = arith.constant 0 : i32
    return %arg0, %arg1, %c0_i32, %c0_i32_0 : i32, i32, i32, i32
  }
  func.func @transform_4(%arg0: i32, %arg1: i32) -> (i32, i32, i32) {
    %c2_i32 = arith.constant 2 : i32
    %0 = arith.muli %arg0, %c2_i32 : i32
    %1 = arith.addi %0, %arg1 : i32
    %c0_i32 = arith.constant 0 : i32
    %c0_i32_0 = arith.constant 0 : i32
    %c0_i32_1 = arith.constant 0 : i32
    return %1, %c0_i32, %c0_i32_0 : i32, i32, i32
  }
}

module attributes {stable_mosaic.version = 11 : i64} {
  func.func @_conv_bn_leaky_kernel(%arg0: i32, %arg1: i32, %arg2: memref<1x16x8x128xf32, #tpu.memory_space<vmem>>, %arg3: memref<1x128xf32, #tpu.memory_space<vmem>>, %arg4: memref<3x128x128xf32, #tpu.memory_space<vmem>>, %arg5: memref<1x16x8x128xf32, #tpu.memory_space<vmem>>, %arg6: memref<1x2x128xf32, #tpu.memory_space<vmem>>) attributes {dimension_semantics = [#tpu.dimension_semantics<parallel>, #tpu.dimension_semantics<parallel>], iteration_bounds = array<i64: 2, 2>, scalar_prefetch = 0 : i64, scratch_operands = 0 : i64, tpu.core_type = #tpu.core_type<tc>, window_params = [{transform_indices = @transform_0, window_bounds = array<i64: 1, 16, 8, 128>}, {pipeline_mode = #tpu.pipeline_mode<synchronous>, transform_indices = @transform_1, window_bounds = array<i64: 1, 128>}, {pipeline_mode = #tpu.pipeline_mode<synchronous>, transform_indices = @transform_2, window_bounds = array<i64: 3, 128, 128>}, {transform_indices = @transform_3, window_bounds = array<i64: 1, 16, 8, 128>}, {transform_indices = @transform_4, window_bounds = array<i64: 1, 2, 128>}]} {
    %c0 = arith.constant 0 : index
    %c0_0 = arith.constant 0 : index
    %c0_1 = arith.constant 0 : index
    %c0_2 = arith.constant 0 : index
    %0 = vector.load %arg2[%c0, %c0_0, %c0_1, %c0_2] : memref<1x16x8x128xf32, #tpu.memory_space<vmem>>, vector<1x16x8x128xf32>
    %1 = vector.shape_cast %0 : vector<1x16x8x128xf32> to vector<128x128xf32>
    %c0_3 = arith.constant 0 : index
    %c0_4 = arith.constant 0 : index
    %2 = vector.load %arg3[%c0_3, %c0_4] : memref<1x128xf32, #tpu.memory_space<vmem>>, vector<1x128xf32>
    %3 = vector.broadcast %2 : vector<1x128xf32> to vector<128x128xf32>
    %4 = arith.subf %1, %3 : vector<128x128xf32>
    %cst = arith.constant 0.000000e+00 : f32
    %5 = vector.broadcast %cst : f32 to vector<8x128xf32>
    %6 = vector.extract_strided_slice %4 {offsets = [0, 0], sizes = [120, 128], strides = [1, 1]} : vector<128x128xf32> to vector<120x128xf32>
    %7 = tpu.concatenate %5, %6 in 0 : vector<8x128xf32>, vector<120x128xf32> -> vector<128x128xf32>
    %8 = vector.extract_strided_slice %4 {offsets = [8, 0], sizes = [120, 128], strides = [1, 1]} : vector<128x128xf32> to vector<120x128xf32>
    %9 = tpu.concatenate %8, %5 in 0 : vector<120x128xf32>, vector<8x128xf32> -> vector<128x128xf32>
    %c0_5 = arith.constant 0 : index
    %c0_6 = arith.constant 0 : index
    %c0_7 = arith.constant 0 : index
    %10 = vector.load %arg4[%c0_5, %c0_6, %c0_7] : memref<3x128x128xf32, #tpu.memory_space<vmem>>, vector<1x128x128xf32>
    %11 = vector.shape_cast %10 : vector<1x128x128xf32> to vector<128x128xf32>
    %cst_8 = arith.constant dense<0.000000e+00> : vector<128x128xf32>
    %12 = tpu.matmul %7, %11, %cst_8 {dimension_numbers = #tpu.dot_dimension_numbers<[1], [0], [0], [1], [0, 0, 1, 1], [], []>} : vector<128x128xf32>, vector<128x128xf32>, vector<128x128xf32> -> vector<128x128xf32>
    %c1 = arith.constant 1 : index
    %c0_9 = arith.constant 0 : index
    %c0_10 = arith.constant 0 : index
    %13 = vector.load %arg4[%c1, %c0_9, %c0_10] : memref<3x128x128xf32, #tpu.memory_space<vmem>>, vector<1x128x128xf32>
    %14 = vector.shape_cast %13 : vector<1x128x128xf32> to vector<128x128xf32>
    %cst_11 = arith.constant dense<0.000000e+00> : vector<128x128xf32>
    %15 = tpu.matmul %4, %14, %cst_11 {dimension_numbers = #tpu.dot_dimension_numbers<[1], [0], [0], [1], [0, 0, 1, 1], [], []>} : vector<128x128xf32>, vector<128x128xf32>, vector<128x128xf32> -> vector<128x128xf32>
    %16 = arith.addf %12, %15 : vector<128x128xf32>
    %c2 = arith.constant 2 : index
    %c0_12 = arith.constant 0 : index
    %c0_13 = arith.constant 0 : index
    %17 = vector.load %arg4[%c2, %c0_12, %c0_13] : memref<3x128x128xf32, #tpu.memory_space<vmem>>, vector<1x128x128xf32>
    %18 = vector.shape_cast %17 : vector<1x128x128xf32> to vector<128x128xf32>
    %cst_14 = arith.constant dense<0.000000e+00> : vector<128x128xf32>
    %19 = tpu.matmul %9, %18, %cst_14 {dimension_numbers = #tpu.dot_dimension_numbers<[1], [0], [0], [1], [0, 0, 1, 1], [], []>} : vector<128x128xf32>, vector<128x128xf32>, vector<128x128xf32> -> vector<128x128xf32>
    %20 = arith.addf %16, %19 : vector<128x128xf32>
    %cst_15 = arith.constant 0.000000e+00 : f32
    %21 = vector.broadcast %cst_15 : f32 to vector<128x128xf32>
    %22 = arith.cmpf oge, %20, %21 : vector<128x128xf32>
    %cst_16 = arith.constant 0.00999999977 : f32
    %23 = vector.broadcast %cst_16 : f32 to vector<128x128xf32>
    %24 = arith.mulf %23, %20 : vector<128x128xf32>
    %25 = arith.select %22, %20, %24 : vector<128x128xi1>, vector<128x128xf32>
    %26 = vector.shape_cast %25 : vector<128x128xf32> to vector<1x16x8x128xf32>
    %c0_17 = arith.constant 0 : index
    %c0_18 = arith.constant 0 : index
    %c0_19 = arith.constant 0 : index
    %c0_20 = arith.constant 0 : index
    %27 = vector.load %arg5[%c0_17, %c0_18, %c0_19, %c0_20] : memref<1x16x8x128xf32, #tpu.memory_space<vmem>>, vector<1x16x8x128xf32>
    tpu.vector_store %arg5[%c0_17, %c0_18, %c0_19, %c0_20], %26 {strides = array<i32>} : memref<1x16x8x128xf32, #tpu.memory_space<vmem>>, vector<1x16x8x128xf32>,
    %cst_21 = arith.constant dense<0.000000e+00> : vector<128xf32>
    %28 = vector.multi_reduction <add>, %25, %cst_21 [0] : vector<128x128xf32> to vector<128xf32>
    %29 = vector.shape_cast %28 : vector<128xf32> to vector<1x128xf32>
    %c0_22 = arith.constant 0 : index
    %c0_23 = arith.constant 0 : index
    %c0_24 = arith.constant 0 : index
    %30 = vector.load %arg6[%c0_22, %c0_23, %c0_24] : memref<1x2x128xf32, #tpu.memory_space<vmem>>, vector<1x1x128xf32>
    %31 = vector.shape_cast %30 : vector<1x1x128xf32> to vector<1x128xf32>
    %32 = vector.shape_cast %29 : vector<1x128xf32> to vector<1x1x128xf32>
    tpu.vector_store %arg6[%c0_22, %c0_23, %c0_24], %32 {strides = array<i32>} : memref<1x2x128xf32, #tpu.memory_space<vmem>>, vector<1x1x128xf32>,
    %33 = arith.mulf %25, %25 : vector<128x128xf32>
    %cst_25 = arith.constant dense<0.000000e+00> : vector<128xf32>
    %34 = vector.multi_reduction <add>, %33, %cst_25 [0] : vector<128x128xf32> to vector<128xf32>
    %35 = vector.shape_cast %34 : vector<128xf32> to vector<1x128xf32>
    %c0_26 = arith.constant 0 : index
    %c1_27 = arith.constant 1 : index
    %c0_28 = arith.constant 0 : index
    %36 = vector.load %arg6[%c0_26, %c1_27, %c0_28] : memref<1x2x128xf32, #tpu.memory_space<vmem>>, vector<1x1x128xf32>
    %37 = vector.shape_cast %36 : vector<1x1x128xf32> to vector<1x128xf32>
    %38 = vector.shape_cast %35 : vector<1x128xf32> to vector<1x1x128xf32>
    tpu.vector_store %arg6[%c0_26, %c1_27, %c0_28], %38 {strides = array<i32>} : memref<1x2x128xf32, #tpu.memory_space<vmem>>, vector<1x1x128xf32>,
    return
  }
  func.func @transform_0(%arg0: i32, %arg1: i32) -> (i32, i32, i32, i32) {
    %c0_i32 = arith.constant 0 : i32
    %c0_i32_0 = arith.constant 0 : i32
    %c0_i32_1 = arith.constant 0 : i32
    return %arg0, %c0_i32, %arg1, %c0_i32_0 : i32, i32, i32, i32
  }
  func.func @transform_1(%arg0: i32, %arg1: i32) -> (i32, i32) {
    %c0_i32 = arith.constant 0 : i32
    %c0_i32_0 = arith.constant 0 : i32
    %c0_i32_1 = arith.constant 0 : i32
    return %c0_i32, %c0_i32_0 : i32, i32
  }
  func.func @transform_2(%arg0: i32, %arg1: i32) -> (i32, i32, i32) {
    %c0_i32 = arith.constant 0 : i32
    %c0_i32_0 = arith.constant 0 : i32
    %c0_i32_1 = arith.constant 0 : i32
    %c0_i32_2 = arith.constant 0 : i32
    return %c0_i32, %c0_i32_0, %c0_i32_1 : i32, i32, i32
  }
  func.func @transform_3(%arg0: i32, %arg1: i32) -> (i32, i32, i32, i32) {
    %c0_i32 = arith.constant 0 : i32
    %c0_i32_0 = arith.constant 0 : i32
    %c0_i32_1 = arith.constant 0 : i32
    return %arg0, %c0_i32, %arg1, %c0_i32_0 : i32, i32, i32, i32
  }
  func.func @transform_4(%arg0: i32, %arg1: i32) -> (i32, i32, i32) {
    %c2_i32 = arith.constant 2 : i32
    %0 = arith.muli %arg0, %c2_i32 : i32
    %1 = arith.addi %0, %arg1 : i32
    %c0_i32 = arith.constant 0 : i32
    %c0_i32_0 = arith.constant 0 : i32
    %c0_i32_1 = arith.constant 0 : i32
    return %1, %c0_i32, %c0_i32_0 : i32, i32, i32
  }
}

module attributes {stable_mosaic.version = 11 : i64} {
  func.func @_bn_bn_add_kernel(%arg0: i32, %arg1: memref<256x128xf32, #tpu.memory_space<vmem>>, %arg2: memref<256x128xf32, #tpu.memory_space<vmem>>, %arg3: memref<2x128xf32, #tpu.memory_space<vmem>>, %arg4: memref<2x128xf32, #tpu.memory_space<vmem>>, %arg5: memref<256x128xf32, #tpu.memory_space<vmem>>) attributes {dimension_semantics = [#tpu.dimension_semantics<parallel>], iteration_bounds = array<i64: 2>, scalar_prefetch = 0 : i64, scratch_operands = 0 : i64, tpu.core_type = #tpu.core_type<tc>, window_params = [{transform_indices = @transform_0, window_bounds = array<i64: 256, 128>}, {transform_indices = @transform_1, window_bounds = array<i64: 256, 128>}, {pipeline_mode = #tpu.pipeline_mode<synchronous>, transform_indices = @transform_2, window_bounds = array<i64: 2, 128>}, {pipeline_mode = #tpu.pipeline_mode<synchronous>, transform_indices = @transform_3, window_bounds = array<i64: 2, 128>}, {transform_indices = @transform_4, window_bounds = array<i64: 256, 128>}]} {
    %c0 = arith.constant 0 : index
    %c0_0 = arith.constant 0 : index
    %0 = vector.load %arg1[%c0, %c0_0] : memref<256x128xf32, #tpu.memory_space<vmem>>, vector<256x128xf32>
    %c0_1 = arith.constant 0 : index
    %c0_2 = arith.constant 0 : index
    %1 = vector.load %arg3[%c0_1, %c0_2] : memref<2x128xf32, #tpu.memory_space<vmem>>, vector<1x128xf32>
    %2 = vector.broadcast %1 : vector<1x128xf32> to vector<256x128xf32>
    %3 = arith.mulf %0, %2 : vector<256x128xf32>
    %c1 = arith.constant 1 : index
    %c0_3 = arith.constant 0 : index
    %4 = vector.load %arg3[%c1, %c0_3] : memref<2x128xf32, #tpu.memory_space<vmem>>, vector<1x128xf32>
    %5 = vector.broadcast %4 : vector<1x128xf32> to vector<256x128xf32>
    %6 = arith.addf %3, %5 : vector<256x128xf32>
    %c0_4 = arith.constant 0 : index
    %c0_5 = arith.constant 0 : index
    %7 = vector.load %arg2[%c0_4, %c0_5] : memref<256x128xf32, #tpu.memory_space<vmem>>, vector<256x128xf32>
    %c0_6 = arith.constant 0 : index
    %c0_7 = arith.constant 0 : index
    %8 = vector.load %arg4[%c0_6, %c0_7] : memref<2x128xf32, #tpu.memory_space<vmem>>, vector<1x128xf32>
    %9 = vector.broadcast %8 : vector<1x128xf32> to vector<256x128xf32>
    %10 = arith.mulf %7, %9 : vector<256x128xf32>
    %11 = arith.addf %6, %10 : vector<256x128xf32>
    %c1_8 = arith.constant 1 : index
    %c0_9 = arith.constant 0 : index
    %12 = vector.load %arg4[%c1_8, %c0_9] : memref<2x128xf32, #tpu.memory_space<vmem>>, vector<1x128xf32>
    %13 = vector.broadcast %12 : vector<1x128xf32> to vector<256x128xf32>
    %14 = arith.addf %11, %13 : vector<256x128xf32>
    %c0_10 = arith.constant 0 : index
    %c0_11 = arith.constant 0 : index
    %15 = vector.load %arg5[%c0_10, %c0_11] : memref<256x128xf32, #tpu.memory_space<vmem>>, vector<256x128xf32>
    tpu.vector_store %arg5[%c0_10, %c0_11], %14 {strides = array<i32>} : memref<256x128xf32, #tpu.memory_space<vmem>>, vector<256x128xf32>,
    return
  }
  func.func @transform_0(%arg0: i32) -> (i32, i32) {
    %c0_i32 = arith.constant 0 : i32
    %c0_i32_0 = arith.constant 0 : i32
    return %arg0, %c0_i32 : i32, i32
  }
  func.func @transform_1(%arg0: i32) -> (i32, i32) {
    %c0_i32 = arith.constant 0 : i32
    %c0_i32_0 = arith.constant 0 : i32
    return %arg0, %c0_i32 : i32, i32
  }
  func.func @transform_2(%arg0: i32) -> (i32, i32) {
    %c0_i32 = arith.constant 0 : i32
    %c0_i32_0 = arith.constant 0 : i32
    %c0_i32_1 = arith.constant 0 : i32
    return %c0_i32, %c0_i32_0 : i32, i32
  }
  func.func @transform_3(%arg0: i32) -> (i32, i32) {
    %c0_i32 = arith.constant 0 : i32
    %c0_i32_0 = arith.constant 0 : i32
    %c0_i32_1 = arith.constant 0 : i32
    return %c0_i32, %c0_i32_0 : i32, i32
  }
  func.func @transform_4(%arg0: i32) -> (i32, i32) {
    %c0_i32 = arith.constant 0 : i32
    %c0_i32_0 = arith.constant 0 : i32
    return %arg0, %c0_i32 : i32, i32
  }
}

</mosaic_0001>

<bundles_post_ra>
// kernel: res_context_block.7
= control target key start
LH: loop header
LB: loop body
LE: loop exit
PB: predicated region body
PF: predicated region fallthrough
CT: control target
= control target key end

     0   :  { %s1660_s15 = smov 0   ;;  %s1662_s16 = smov 0   ;;  %s2052_s0 = inlined_call_operand.vmem [shape: f32[2,16,16,64], index: 0, kind: input, shape index: {}]   ;;  %s2053_s1 = inlined_call_operand.vmem [shape: f32[1,64], index: 1, kind: input, shape index: {}]   ;;  %s2054_s2 = inlined_call_operand.vmem [shape: f32[3,64,128], index: 2, kind: input, shape index: {}]   ;;  %s2055_s3 = inlined_call_operand.vmem [shape: f32[2,16,16,128], index: 3, kind: output, shape index: {0}]   ;;  %s2056_s4 = inlined_call_operand.vmem [shape: f32[4,2,128], index: 4, kind: output, shape index: {1}]  }
   0x1   :  { %s1664_s17 = smov 0   ;;  %s1666_s18 = smov 0  }
   0x2   :  { %s1668_s19 = smov 0   ;;  %s1670_s20 = smov 0  }
   0x3   :  { %s1672_s21 = smov 0  }
   0x4 LB: > { %s24_s22 = sadd.s32 1, %s1624_s19  ;;  %s27_s23 = sadd.s32 1, %s1628_s20  ;;  %s1632_s21 = sphi %s1672_s21, %s15_s21   ;;  %s1628_s20 = sphi %s1670_s20, %s2063_s20   ;;  %s1624_s19 = sphi %s1668_s19, %s2062_s19   ;;  %s1620_s18 = sphi %s1666_s18, %s2061_s18   ;;  %s1616_s17 = sphi %s1664_s17, %s2060_s17   ;;  %s1612_s16 = sphi %s1662_s16, %s2059_s16   ;;  %s1608_s15 = sphi %s1660_s15, %s2058_s15  }
   0x5   : > { %p25_p0 = scmp.ge.s32.totalorder %s24_s22, 2  ;;  %s1231_s24 = sadd.s32 4294967295, %s1632_s21  }
   0x6   : > { %p43_p1 = scmp.ne.s32.totalorder %s1612_s16, %s1608_s15  ;;  %p44_p2 = scmp.eq.s32.totalorder %s1632_s21, 0 }
   0x7   : > { %s2065_s22 = smov (%p25_p0, %s24_s22), 0  ;;  %s2067_s23 = smov (!%p25_p0, %s27_s23), %s1628_s20 }
   0x8   : > { %p29_p3 = scmp.ge.s32.totalorder %s2067_s23, 2  ;;  %p117_p4 = scmp.eq.s32.totalorder %s1231_s24, 3 }
   0x9   : > { %s32_s25 = ssub.s32 %s1624_s19, %s2065_s22  ;;  %p45_p5 = por %p44_p2, %p43_p1 }
   0xa   : > { %s2069_s23 = smov (%p29_p3, %s2067_s23), 0  ;;  %p1708_p6 = por %p117_p4, %p43_p1 }
   0xb   : > { %s31_s27 = ssub.s32 %s1628_s20, %s2069_s23  ;;  %s36_s29 = sadd.s32 1, %s1612_s16 }
   0xc   : > { %s33_s28 = sor.u32 %s32_s25, %s31_s27  ;;  %p1236_p8 = scmp.ge.s32.totalorder %s1632_s21, 4 }
   0xd   : > { %p34_p7 = scmp.eq.s32.totalorder %s33_s28, 0 }
   0xe   : > { %175 = sbr.rel (%p1236_p8) target bundleno = 33 (0x21), region = 24 }
   0xf   : > { %s1716_s30 = scalar_select %p34_p7, %s1612_s16, %s36_s29  }
  0x13   : > { %178 = sbr.rel (!%p45_p5) target bundleno = 33 (0x21), region = 28  ;;  %s180_s5 = sand.u32 (%p45_p5), 1, %s1612_s16  }
  0x14   : > { %s1238_s6 = sshll.u32 (%p45_p5), %s1628_s20, 5  ;;  %s1237_s7 = sshll.u32 (%p45_p5), %s180_s5, 7 }
  0x15   : > { %s184_s8 = sadd.s32 (%p45_p5), %s1624_s19, %s1238_s6  ;;  %s182_s13 = scalar_lea.vmem (%p45_p5), [#allocation2], %s1237_s7 }
  0x16   : > { %s1239_s9 = sshll.u32 (%p45_p5), %s184_s8, 3 }
  0x17   : > { %s1725_s12 = scalar_lea.vmem (%p45_p5), %s2052_s0, %s1239_s9 }
  0x18   : > { %v245_v0 = vld [vmem:[%s1725_s12] sm:$0xff]  ;;  %v247_v1 = vld [vmem:[%s1725_s12 + $0x10] sm:$0xff] }
  0x19   : > { %v249_v2 = vld [vmem:[%s1725_s12 + $0x20] sm:$0xff]  ;;  %246 = vst [vmem:[%s182_s13] sm:$0xff] %v245_v0  ;;  %248 = vst [vmem:[%s182_s13 + $0x8] sm:$0xff] %v247_v1  ;;  %v251_v3 = vld [vmem:[%s1725_s12 + $0x30] sm:$0xff] }
  0x1a   : > { %250 = vst [vmem:[%s182_s13 + $0x10] sm:$0xff] %v249_v2  ;;  %v253_v4 = vld [vmem:[%s1725_s12 + $0x40] sm:$0xff]  ;;  %v255_v5 = vld [vmem:[%s1725_s12 + $0x50] sm:$0xff]  ;;  %252 = vst [vmem:[%s182_s13 + $0x18] sm:$0xff] %v251_v3 }
  0x1b   : > { %254 = vst [vmem:[%s182_s13 + $0x20] sm:$0xff] %v253_v4  ;;  %256 = vst [vmem:[%s182_s13 + $0x28] sm:$0xff] %v255_v5  ;;  %v257_v6 = vld [vmem:[%s1725_s12 + $0x60] sm:$0xff]  ;;  %v259_v7 = vld [vmem:[%s1725_s12 + $0x70] sm:$0xff] }
  0x1c   : > { %v261_v8 = vld [vmem:[%s1725_s12 + $0x80] sm:$0xff]  ;;  %258 = vst [vmem:[%s182_s13 + $0x30] sm:$0xff] %v257_v6  ;;  %260 = vst [vmem:[%s182_s13 + $0x38] sm:$0xff] %v259_v7  ;;  %v263_v9 = vld [vmem:[%s1725_s12 + $0x90] sm:$0xff] }
  0x1d   : > { %262 = vst [vmem:[%s182_s13 + $0x40] sm:$0xff] %v261_v8  ;;  %v265_v10 = vld [vmem:[%s1725_s12 + $0xa0] sm:$0xff]  ;;  %v267_v11 = vld [vmem:[%s1725_s12 + $0xb0] sm:$0xff]  ;;  %264 = vst [vmem:[%s182_s13 + $0x48] sm:$0xff] %v263_v9 }
  0x1e   : > { %266 = vst [vmem:[%s182_s13 + $0x50] sm:$0xff] %v265_v10  ;;  %268 = vst [vmem:[%s182_s13 + $0x58] sm:$0xff] %v267_v11  ;;  %v269_v12 = vld [vmem:[%s1725_s12 + $0xc0] sm:$0xff]  ;;  %v271_v13 = vld [vmem:[%s1725_s12 + $0xd0] sm:$0xff] }
  0x1f   : > { %v273_v14 = vld [vmem:[%s1725_s12 + $0xe0] sm:$0xff]  ;;  %270 = vst [vmem:[%s182_s13 + $0x60] sm:$0xff] %v269_v12  ;;  %272 = vst [vmem:[%s182_s13 + $0x68] sm:$0xff] %v271_v13  ;;  %v275_v15 = vld [vmem:[%s1725_s12 + $0xf0] sm:$0xff] }
  0x20   : > { %274 = vst [vmem:[%s182_s13 + $0x70] sm:$0xff] %v273_v14  ;;  %276 = vst [vmem:[%s182_s13 + $0x78] sm:$0xff] %v275_v15 }
  0x21 PF: > { %p1240_p9 = scmp.ge.s32.totalorder %s1632_s21, 1  ;;  %p281_p10 = scmp.lt.s32.totalorder %s1632_s21, 5 }
  0x23   : > { %p282_p11 = pnand %p1240_p9, %p281_p10 }
  0x24   : > { %s288_s28 = sand.u32 (!%p282_p11), 1, %s1608_s15  }
  0x25   : > { %285 = sbr.rel (%p282_p11) target bundleno = 333 (0x14d), region = 66  ;;  %s1755_s6 = sshll.u32 (!%p282_p11), %s288_s28, 7 }
  0x26   : > { %s1767_s12 = scalar_lea.vmem (!%p282_p11), [#allocation2], %s1755_s6  ;;  %s1977_s8 = scalar_lea.vmem (!%p282_p11), [#allocation3], %s1755_s6 }
  0x27   : > { %s1243_s6 = sshll.u32 (!%p282_p11), %s1620_s18, 1 }
  0x28   : > { %s319_s15 = sadd.s32 (!%p282_p11), %s1616_s17, %s1243_s6 }
  0x29   : > { %p320_p12 = scmp.lt.s32.totalorder (!%p282_p11), %s319_s15, 3 }
  0x2a   : > { %v1253_v16 = vld [vmem:[%s2054_s2 + $0x78] sm:$0xff]  ;;  %v1252_v17 = vld [vmem:[%s2054_s2 + $0x70] sm:$0xff]  ;;  %v1251_v18 = vld [vmem:[%s2054_s2 + $0x68] sm:$0xff]  ;;  %vm382_vm0 = vcmask 523264   ;;  %v1634_v9 = vmov 0.0   ;;  %s1309_s14 = sshll.u32 (%p1708_p6), %s1620_s18, 5 }
  0x2b   : > { %1505 = vmatprep.subr.mxu1 %v1253_v16  ;;  %1385 = vmatprep.subr.mxu0 %v1253_v16  ;;  %v1250_v19 = vld [vmem:[%s2054_s2 + $0x60] sm:$0xff]  ;;  %v1249_v20 = vld [vmem:[%s2054_s2 + $0x58] sm:$0xff]  ;;  %v1248_v21 = vld [vmem:[%s2054_s2 + $0x50] sm:$0xff]  ;;  %s2071_s15 = smov (!%p320_p12, %s319_s15), 3  ;;  %s1032_s26 = sadd.s32 (%p1708_p6), %s1616_s17, %s1309_s14 }
  0x2c   : > { %1513 = vmatpush3.msra.mxu1 %v1253_v16  ;;  %1386 = vmatpush3.msra.mxu0 %v1253_v16  ;;  %v334_v22 = vld [vmem:[%s1767_s12 + $0x40] sm:$0xff]  ;;  %v1247_v24 = vld [vmem:[%s2054_s2 + $0x48] sm:$0xff]  ;;  %v336_v32 = vld [vmem:[%s1767_s12 + $0x50] sm:$0xff]  ;;  %s1244_s9 = sshll.u32 %s2071_s15, 1  ;;  %s1310_s24 = sshll.u32 (%p1708_p6), %s1032_s26, 3 }
  0x2d   : > { %1506 = vmatprep.subr.mxu1 %v1252_v17  ;;  %1387 = vmatprep.subr.mxu0 %v1252_v17  ;;  %v1773_v23 = vld [vmem:[%s2053_s1] ss:$0 sm:$0xff]  ;;  %v335_v26 = vld [vmem:[%s1767_s12 + $0x48] sm:$0xff]  ;;  %v372_v33 = vld [vmem:[%s2054_s2 + $0x38] sm:$0xff]  ;;  %s323_s13 = scalar_lea.vmem %s2056_s4, %s1244_s9  ;;  %s1034_s27 = scalar_lea.vmem (%p1708_p6), %s2055_s3, %s1310_s24 }
  0x2e   : > { %1514 = vmatpush3.msra.mxu1 %v1252_v17  ;;  %1388 = vmatpush3.msra.mxu0 %v1252_v17  ;;  %v326_v25 = vld [vmem:[%s1767_s12] sm:$0xff]  ;;  %v1784_v28 = vsub.f32 %v334_v22, %v1773_v23  ;;  %v327_v29 = vld [vmem:[%s1767_s12 + $0x8] sm:$0xff]  ;;  %v1791_v31 = vsub.f32 %v335_v26, %v1773_v23  ;;  %v328_v35 = vld [vmem:[%s1767_s12 + $0x10] sm:$0xff]  ;;  %v1813_v39 = vsub.f32 %v336_v32, %v1773_v23 }
  0x2f   : > { %1507 = vmatprep.subr.mxu1 %v1251_v18  ;;  %1389 = vmatprep.subr.mxu0 %v1251_v18  ;;  %v1246_v27 = vld [vmem:[%s2054_s2 + $0x40] sm:$0xff]  ;;  %v1788_v30 = vsub.f32 %v326_v25, %v1773_v23  ;;  %v1798_v34 = vsub.f32 %v327_v29, %v1773_v23  ;;  %v337_v36 = vld [vmem:[%s1767_s12 + $0x58] sm:$0xff]  ;;  %v371_v38 = vld [vmem:[%s2054_s2 + $0x30] sm:$0xff]  ;;  %v1824_v42 = vsub.f32 %v328_v35, %v1773_v23 }
  0x30   : > { %1515 = vmatpush3.msra.mxu1 %v1251_v18  ;;  %1390 = vmatpush3.msra.mxu0 %v1251_v18  ;;  %v1292_v37 = vld [vmem:[%s2054_s2 + $0xb8] sm:$0xff]  ;;  %v1291_v41 = vld [vmem:[%s2054_s2 + $0xb0] sm:$0xff]  ;;  %v1827_v43 = vsub.f32 %v337_v36, %v1773_v23  ;;  %v338_v44 = vld [vmem:[%s1767_s12 + $0x60] sm:$0xff] }
  0x31   : > { %1508 = vmatprep.subr.mxu1 %v1250_v19  ;;  %1391 = vmatprep.subr.mxu0 %v1250_v19  ;;  %v329_v40 = vld [vmem:[%s1767_s12 + $0x18] sm:$0xff]  ;;  %v370_v45 = vld [vmem:[%s2054_s2 + $0x28] sm:$0xff]  ;;  %v330_v47 = vld [vmem:[%s1767_s12 + $0x20] sm:$0xff]  ;;  %v1851_v51 = vsub.f32 %v338_v44, %v1773_v23 }
  0x32   : > { %1516 = vmatpush3.msra.mxu1 %v1250_v19  ;;  %1392 = vmatpush3.msra.mxu0 %v1250_v19  ;;  %v1836_v46 = vsub.f32 %v329_v40, %v1773_v23  ;;  %v339_v48 = vld [vmem:[%s1767_s12 + $0x68] sm:$0xff]  ;;  %v369_v50 = vld [vmem:[%s2054_s2 + $0x20] sm:$0xff]  ;;  %v353_v54 = vsub.f32 %v330_v47, %v1773_v23  ;;  %v340_v56 = vld [vmem:[%s1767_s12 + $0x70] sm:$0xff] }
  0x33   : > { %1509 = vmatprep.subr.mxu1 %v1249_v20  ;;  %1393 = vmatprep.subr.mxu0 %v1249_v20  ;;  %v1290_v49 = vld [vmem:[%s2054_s2 + $0xa8] sm:$0xff]  ;;  %v1289_v53 = vld [vmem:[%s2054_s2 + $0xa0] sm:$0xff]  ;;  %v1861_v55 = vsub.f32 %v339_v48, %v1773_v23  ;;  %v368_v57 = vld [vmem:[%s2054_s2 + $0x18] sm:$0xff]  ;;  %v1882_v63 = vsub.f32 %v340_v56, %v1773_v23 }
  0x34   : > { %1517 = vmatpush3.msra.mxu1 %v1249_v20  ;;  %1394 = vmatpush3.msra.mxu0 %v1249_v20  ;;  %v331_v52 = vld [vmem:[%s1767_s12 + $0x28] sm:$0xff]  ;;  %v332_v59 = vld [vmem:[%s1767_s12 + $0x30] sm:$0xff]  ;;  %v341_v60 = vld [vmem:[%s1767_s12 + $0x78] sm:$0xff] }
  0x35   : > { %1510 = vmatprep.subr.mxu1 %v1248_v21  ;;  %1395 = vmatprep.subr.mxu0 %v1248_v21  ;;  %v354_v58 = vsub.f32 %v331_v52, %v1773_v23  ;;  %v1288_v61 = vld [vmem:[%s2054_s2 + $0x98] sm:$0xff]  ;;  %v367_v62 = vld [vmem:[%s2054_s2 + $0x10] sm:$0xff]  ;;  %v355_v2 = vsub.f32 %v332_v59, %v1773_v23  ;;  %v364_v3 = vsub.f32 %v341_v60, %v1773_v23  ;;  %v366_v4 = vld [vmem:[%s2054_s2 + $0x8] sm:$0xff] }
  0x36   : > { %1518 = vmatpush3.msra.mxu1 %v1248_v21  ;;  %1396 = vmatpush3.msra.mxu0 %v1248_v21  ;;  %v333_v0 = vld [vmem:[%s1767_s12 + $0x38] sm:$0xff]  ;;  %v1287_v1 = vld [vmem:[%s2054_s2 + $0x90] sm:$0xff]  ;;  %v1286_v6 = vld [vmem:[%s2054_s2 + $0x88] sm:$0xff] }
  0x37   : > { %1511 = vmatprep.subr.mxu1 %v1247_v24  ;;  %1397 = vmatprep.subr.mxu0 %v1247_v24  ;;  %v356_v5 = vsub.f32 %v333_v0, %v1773_v23  ;;  %v365_v7 = vld [vmem:[%s2054_s2] sm:$0xff] }
  0x38   : > { %1519 = vmatpush3.msra.mxu1 %v1247_v24  ;;  %1398 = vmatpush3.msra.mxu0 %v1247_v24  ;;  %v1285_v8 = vld [vmem:[%s2054_s2 + $0x80] sm:$0xff] }
  0x39   : > { %1512 = vmatprep.subr.mxu1 %v1246_v27  ;;  %1399 = vmatprep.subr.mxu0 %v1246_v27 }
  0x3a   : > { %1520 = vmatpush3.msra.mxu1 %v1246_v27  ;;  %1413 = vmatprep.mubr.msk.f32.mxu1 %vm382_vm0, %v1784_v28 }
  0x3b   : > { %1400 = vmatpush3.msra.mxu0 %v1246_v27  ;;  %1401 = vmatprep.mubr.msk.f32.mxu0 %vm382_vm0, %v1788_v30 }
  0x3c   : > { %1414 = vmatmul.mubr.msk.f32.vlgmr.msra.gmra.mxu1 %vm382_vm0, %v1791_v31  ;;  %1425 = vmatprep.subr.mxu1 %v372_v33 }
  0x3d   : > { %1402 = vmatmul.mubr.msk.f32.vlgmr.msra.gmra.mxu0 %vm382_vm0, %v1798_v34  ;;  %1426 = vmatpush3.msra.mxu1 %v372_v33 }
  0x3e   : > { %1465 = vmatprep.subr.mxu0 %v1292_v37  ;;  %1427 = vmatprep.subr.mxu1 %v371_v38 }
  0x3f   : > { %1466 = vmatpush3.msra.mxu0 %v1292_v37  ;;  %1416 = vmatprep.mubr.msk.f32.mxu1 %vm382_vm0, %v1813_v39 }
  0x40   : > { %1428 = vmatpush3.msra.mxu1 %v371_v38  ;;  %1467 = vmatprep.subr.mxu0 %v1291_v41 }
  0x41   : > { %1404 = vmatprep.mubr.msk.f32.mxu0 %vm382_vm0, %v1824_v42  ;;  %1417 = vmatmul.mubr.msk.f32.gmra.mxu1 %vm382_vm0, %v1827_v43 }
  0x42   : > { %1429 = vmatprep.subr.mxu1 %v370_v45  ;;  %1468 = vmatpush3.msra.mxu0 %v1291_v41 }
  0x43   : > { %1405 = vmatmul.mubr.msk.f32.gmra.mxu0 %vm382_vm0, %v1836_v46  ;;  %1430 = vmatpush3.msra.mxu1 %v370_v45 }
  0x44   : > { %1469 = vmatprep.subr.mxu0 %v1290_v49  ;;  %1431 = vmatprep.subr.mxu1 %v369_v50 }
  0x45   : > { %1470 = vmatpush3.msra.mxu0 %v1290_v49  ;;  %1419 = vmatprep.mubr.msk.f32.mxu1 %vm382_vm0, %v1851_v51 }
  0x46   : > { %1432 = vmatpush3.msra.mxu1 %v369_v50  ;;  %1471 = vmatprep.subr.mxu0 %v1289_v53 }
  0x47   : > { %1407 = vmatprep.mubr.msk.f32.mxu0 %vm382_vm0, %v353_v54  ;;  %1420 = vmatmul.mubr.msk.f32.gmra.mxu1 %vm382_vm0, %v1861_v55 }
  0x48   : > { %1433 = vmatprep.subr.mxu1 %v368_v57  ;;  %1472 = vmatpush3.msra.mxu0 %v1289_v53 }
  0x49   : > { %1408 = vmatmul.mubr.msk.f32.gmra.mxu0 %vm382_vm0, %v354_v58  ;;  %1434 = vmatpush3.msra.mxu1 %v368_v57 }
  0x4a   : > { %1473 = vmatprep.subr.mxu0 %v1288_v61  ;;  %1435 = vmatprep.subr.mxu1 %v367_v62 }
  0x4b   : > { %1474 = vmatpush3.msra.mxu0 %v1288_v61  ;;  %1422 = vmatprep.mubr.msk.f32.mxu1 %vm382_vm0, %v1882_v63 }
  0x4c   : > { %1436 = vmatpush3.msra.mxu1 %v367_v62  ;;  %1475 = vmatprep.subr.mxu0 %v1287_v1 }
  0x4d   : > { %1410 = vmatprep.mubr.msk.f32.mxu0 %vm382_vm0, %v355_v2  ;;  %1423 = vmatmul.mubr.msk.f32.gmra.mxu1 %vm382_vm0, %v364_v3 }
  0x4e   : > { %1437 = vmatprep.subr.mxu1 %v366_v4  ;;  %1476 = vmatpush3.msra.mxu0 %v1287_v1 }
  0x4f   : > { %1411 = vmatmul.mubr.msk.f32.gmra.mxu0 %vm382_vm0, %v356_v5  ;;  %1438 = vmatpush3.msra.mxu1 %v366_v4 }
  0x50   : > { %1477 = vmatprep.subr.mxu0 %v1286_v6  ;;  %1439 = vmatprep.subr.mxu1 %v365_v7 }
  0x51   : > { %1478 = vmatpush3.msra.mxu0 %v1286_v6  ;;  %1440 = vmatpush3.msra.mxu1 %v365_v7 }
  0x52   : > { %1441 = vmatprep.mubr.f32.mxu1 %v1634_v9  ;;  %1479 = vmatprep.subr.mxu0 %v1285_v8 }
  0x53   : > { %1442 = vmatmul.mubr.msk.f32.vlgmr.msra.gmra.mxu1 %vm382_vm0, %v1788_v30  ;;  %1480 = vmatpush3.msra.mxu0 %v1285_v8 }
  0x54   : > { %1481 = vmatprep.mubr.msk.f32.mxu0 %vm382_vm0, %v1798_v34  ;;  %1444 = vmatprep.mubr.msk.f32.mxu1 %vm382_vm0, %v1798_v34 }
  0x55   : > { %1482 = vmatmul.mubr.msk.f32.vlgmr.msra.gmra.mxu0 %vm382_vm0, %v1824_v42 }
  0x56   : > { %1484 = vmatprep.mubr.msk.f32.mxu0 %vm382_vm0, %v1836_v46 }
  0x57   : > { %1445 = vmatmul.mubr.msk.f32.gmra.mxu1 %vm382_vm0, %v1824_v42 }
  0x58   : > { %1447 = vmatprep.mubr.msk.f32.mxu1 %vm382_vm0, %v1836_v46 }
  0x59   : > { %1485 = vmatmul.mubr.msk.f32.gmra.mxu0 %vm382_vm0, %v353_v54 }
  0x5a   : > { %1487 = vmatprep.mubr.msk.f32.mxu0 %vm382_vm0, %v354_v58 }
  0x5b   : > { %1448 = vmatmul.mubr.msk.f32.gmra.mxu1 %vm382_vm0, %v353_v54 }
  0x5c   : > { %1450 = vmatprep.mubr.msk.f32.mxu1 %vm382_vm0, %v354_v58 }
  0x5d   : > { %1488 = vmatmul.mubr.msk.f32.gmra.mxu0 %vm382_vm0, %v355_v2 }
  0x5e   : > { %1490 = vmatprep.mubr.msk.f32.mxu0 %vm382_vm0, %v356_v5 }
  0x5f   : > { %1451 = vmatmul.mubr.msk.f32.gmra.mxu1 %vm382_vm0, %v355_v2 }
  0x60   : > { %1453 = vmatprep.mubr.msk.f32.mxu1 %vm382_vm0, %v356_v5 }
  0x61   : > { %1491 = vmatmul.mubr.msk.f32.gmra.mxu0 %vm382_vm0, %v1784_v28 }
  0x62   : > { %1493 = vmatprep.mubr.msk.f32.mxu0 %vm382_vm0, %v1791_v31 }
  0x63   : > { %1454 = vmatmul.mubr.msk.f32.gmra.mxu1 %vm382_vm0, %v1784_v28 }
  0x64   : > { %1456 = vmatprep.mubr.msk.f32.mxu1 %vm382_vm0, %v1791_v31 }
  0x65   : > { %1494 = vmatmul.mubr.msk.f32.gmra.mxu0 %vm382_vm0, %v1813_v39 }
  0x66   : > { %1496 = vmatprep.mubr.msk.f32.mxu0 %vm382_vm0, %v1827_v43 }
  0x67   : > { %1457 = vmatmul.mubr.msk.f32.gmra.mxu1 %vm382_vm0, %v1813_v39 }
  0x68   : > { %1459 = vmatprep.mubr.msk.f32.mxu1 %vm382_vm0, %v1827_v43 }
  0x69   : > { %1497 = vmatmul.mubr.msk.f32.gmra.mxu0 %vm382_vm0, %v1851_v51 }
  0x6a   : > { %1499 = vmatprep.mubr.msk.f32.mxu0 %vm382_vm0, %v1861_v55 }
  0x6b   : > { %1460 = vmatmul.mubr.msk.f32.gmra.mxu1 %vm382_vm0, %v1851_v51 }
  0x6c   : > { %1462 = vmatprep.mubr.msk.f32.mxu1 %vm382_vm0, %v1861_v55 }
  0x6d   : > { %1500 = vmatmul.mubr.msk.f32.gmra.mxu0 %vm382_vm0, %v1882_v63 }
  0x6e   : > { %1502 = vmatprep.mubr.msk.f32.mxu0 %vm382_vm0, %v364_v3 }
  0x6f   : > { %1463 = vmatmul.mubr.msk.f32.gmra.mxu1 %vm382_vm0, %v1882_v63 }
  0x71   : > { %1503 = vmatmul.mubr.f32.gmra.mxu0 %v1634_v9 }
  0xfc   : > { %v1960_v10 = vpop.f32.mrf.mxu1 }
  0xfd   : > { %v1403_v11 = vpop.f32.mrf.mxu0 }
  0xfe   : > { %v1962_v12 = vpop.f32.mrf.mxu1 }
  0xff   : > { %v497_v13 = vpop.f32.mrf.mxu0 }
 0x101   : > { %v1964_v14 = vpop.f32.mrf.mxu1 }
 0x103   : > { %v1406_v15 = vpop.f32.mrf.mxu0  ;;  %v1966_v16 = vpop.f32.mrf.mxu1 }
 0x105   : > { %v507_v17 = vpop.f32.mrf.mxu0 }
 0x107   : > { %v1968_v18 = vpop.f32.mrf.mxu1 }
 0x109   : > { %v1409_v19 = vpop.f32.mrf.mxu0  ;;  %v1970_v20 = vpop.f32.mrf.mxu1 }
 0x10b   : > { %v517_v21 = vpop.f32.mrf.mxu0 }
 0x10d   : > { %v1972_v22 = vpop.f32.mrf.mxu1 }
 0x10f   : > { %v1412_v23 = vpop.f32.mrf.mxu0  ;;  %v1974_v24 = vpop.f32.mrf.mxu1 }
 0x111   : > { %v527_v25 = vpop.f32.mrf.mxu0 }
 0x113   : > { %v1443_v26 = vpop.f32.mrf.mxu1 }
 0x114   : > { %v651_v27 = vadd.f32 %v1443_v26, %v1403_v11 }
 0x115   : > { %v1483_v28 = vpop.f32.mrf.mxu0  ;;  %v645_v29 = vpop.f32.mrf.mxu1 }
 0x116   : > { %v879_v30 = vadd.f32 %v1483_v28, %v651_v27  ;;  %v646_v31 = vadd.f32 %v645_v29, %v497_v13 }
 0x117   : > { %v799_v32 = vpop.f32.mrf.mxu0  ;;  %v1446_v33 = vpop.f32.mrf.mxu1 }
 0x118   : > { %vm895_vm1 = vcmp.ge.f32.partialorder %v879_v30, 0.0  ;;  %v911_v34 = vmul.f32 0.01, %v879_v30  ;;  %v878_v35 = vadd.f32 %v799_v32, %v646_v31  ;;  %v661_v36 = vadd.f32 %v1446_v33, %v1406_v15 }
 0x119   : > { %v1486_v37 = vpop.f32.mrf.mxu0  ;;  %v655_v38 = vpop.f32.mrf.mxu1 }
 0x11a   : > { %v927_v39 = vsel %vm895_vm1, %v879_v30, %v911_v34  ;;  %vm894_vm2 = vcmp.ge.f32.partialorder %v878_v35, 0.0  ;;  %v910_v40 = vmul.f32 0.01, %v878_v35  ;;  %v881_v41 = vadd.f32 %v1486_v37, %v661_v36 }
 0x11b   : > { %943 = vst [vmem:[%s1977_s8 + $0x8] sm:$0xff] %v927_v39  ;;  %v656_v42 = vadd.f32 %v655_v38, %v507_v17  ;;  %v809_v43 = vpop.f32.mrf.mxu0  ;;  %v1449_v44 = vpop.f32.mrf.mxu1  ;;  %v981_v55 = vmul.f32 %v927_v39, %v927_v39 }
 0x11c   : > { %v926_v45 = vsel %vm894_vm2, %v878_v35, %v910_v40  ;;  %vm897_vm3 = vcmp.ge.f32.partialorder %v881_v41, 0.0  ;;  %v913_v46 = vmul.f32 0.01, %v881_v41  ;;  %v671_v47 = vadd.f32 %v1449_v44, %v1409_v19 }
 0x11d   : > { %942 = vst [vmem:[%s1977_s8] sm:$0xff] %v926_v45  ;;  %v980_v48 = vmul.f32 %v926_v45, %v926_v45  ;;  %v880_v49 = vadd.f32 %v809_v43, %v656_v42  ;;  %v1489_v50 = vpop.f32.mrf.mxu0  ;;  %v665_v51 = vpop.f32.mrf.mxu1  ;;  %v958_v56 = vadd.f32 %v927_v39, %v926_v45 }
 0x11e   : > { %v929_v52 = vsel %vm897_vm3, %v881_v41, %v913_v46  ;;  %v883_v53 = vadd.f32 %v1489_v50, %v671_v47  ;;  %v666_v54 = vadd.f32 %v665_v51, %v517_v21 }
 0x11f   : > { %945 = vst [vmem:[%s1977_s8 + $0x18] sm:$0xff] %v929_v52  ;;  %vm896_vm4 = vcmp.ge.f32.partialorder %v880_v49, 0.0  ;;  %v912_v57 = vmul.f32 0.01, %v880_v49  ;;  %v819_v58 = vpop.f32.mrf.mxu0  ;;  %v1452_v59 = vpop.f32.mrf.mxu1  ;;  %v996_v63 = vadd.f32 %v981_v55, %v980_v48  ;;  %v983_v13 = vmul.f32 %v929_v52, %v929_v52 }
 0x120   : > { %vm899_vm5 = vcmp.ge.f32.partialorder %v883_v53, 0.0  ;;  %v915_v60 = vmul.f32 0.01, %v883_v53  ;;  %v882_v61 = vadd.f32 %v819_v58, %v666_v54  ;;  %v681_v62 = vadd.f32 %v1452_v59, %v1412_v23 }
 0x121   : > { %v928_v0 = vsel %vm896_vm4, %v880_v49, %v912_v57  ;;  %v1492_v1 = vpop.f32.mrf.mxu0  ;;  %v675_v2 = vpop.f32.mrf.mxu1 }
 0x122   : > { %944 = vst [vmem:[%s1977_s8 + $0x10] sm:$0xff] %v928_v0  ;;  %v959_v3 = vadd.f32 %v958_v56, %v928_v0  ;;  %v982_v4 = vmul.f32 %v928_v0, %v928_v0  ;;  %v931_v5 = vsel %vm899_vm5, %v883_v53, %v915_v60  ;;  %vm898_vm6 = vcmp.ge.f32.partialorder %v882_v61, 0.0 }
 0x123   : > { %947 = vst [vmem:[%s1977_s8 + $0x28] sm:$0xff] %v931_v5  ;;  %v914_v6 = vmul.f32 0.01, %v882_v61  ;;  %v885_v7 = vadd.f32 %v1492_v1, %v681_v62  ;;  %v676_v8 = vadd.f32 %v675_v2, %v527_v25  ;;  %v829_v9 = vpop.f32.mrf.mxu0  ;;  %v1455_v11 = vpop.f32.mrf.mxu1  ;;  %v985_v36 = vmul.f32 %v931_v5, %v931_v5 }
 0x124   : > { %v997_v15 = vadd.f32 %v996_v63, %v982_v4  ;;  %v960_v17 = vadd.f32 %v959_v3, %v929_v52  ;;  %v691_v19 = vadd.f32 %v1455_v11, %v1960_v10 }
 0x125   : > { %v930_v21 = vsel %vm898_vm6, %v882_v61, %v914_v6  ;;  %vm901_vm7 = vcmp.ge.f32.partialorder %v885_v7, 0.0  ;;  %v917_v23 = vmul.f32 0.01, %v885_v7  ;;  %v884_v26 = vadd.f32 %v829_v9, %v676_v8  ;;  %v1495_v27 = vpop.f32.mrf.mxu0  ;;  %v685_v28 = vpop.f32.mrf.mxu1 }
 0x126   : > { %946 = vst [vmem:[%s1977_s8 + $0x20] sm:$0xff] %v930_v21  ;;  %v961_v29 = vadd.f32 %v960_v17, %v930_v21  ;;  %v984_v30 = vmul.f32 %v930_v21, %v930_v21  ;;  %v998_v31 = vadd.f32 %v997_v15, %v983_v13  ;;  %v887_v32 = vadd.f32 %v1495_v27, %v691_v19 }
 0x127   : > { %v933_v25 = vsel %vm901_vm7, %v885_v7, %v917_v23  ;;  %vm900_vm8 = vcmp.ge.f32.partialorder %v884_v26, 0.0  ;;  %v916_v33 = vmul.f32 0.01, %v884_v26  ;;  %v686_v34 = vadd.f32 %v685_v28, %v1962_v12  ;;  %v839_v35 = vpop.f32.mrf.mxu0  ;;  %v1458_v10 = vpop.f32.mrf.mxu1 }
 0x128   : > { %v999_v37 = vadd.f32 %v998_v31, %v984_v30  ;;  %949 = vst [vmem:[%s1977_s8 + $0x38] sm:$0xff] %v933_v25  ;;  %v962_v38 = vadd.f32 %v961_v29, %v931_v5  ;;  %vm903_vm9 = vcmp.ge.f32.partialorder %v887_v32, 0.0  ;;  %v919_v40 = vmul.f32 0.01, %v887_v32 }
 0x129   : > { %v932_v39 = vsel %vm900_vm8, %v884_v26, %v916_v33  ;;  %v886_v41 = vadd.f32 %v839_v35, %v686_v34  ;;  %v701_v42 = vadd.f32 %v1458_v10, %v1964_v14  ;;  %v1498_v43 = vpop.f32.mrf.mxu0  ;;  %v695_v44 = vpop.f32.mrf.mxu1  ;;  %v987_v53 = vmul.f32 %v933_v25, %v933_v25 }
 0x12a   : > { %948 = vst [vmem:[%s1977_s8 + $0x30] sm:$0xff] %v932_v39  ;;  %v963_v45 = vadd.f32 %v962_v38, %v932_v39  ;;  %v986_v46 = vmul.f32 %v932_v39, %v932_v39  ;;  %v1000_v47 = vadd.f32 %v999_v37, %v985_v36  ;;  %v696_v12 = vadd.f32 %v695_v44, %v1966_v16 }
 0x12b   : > { %v935_v48 = vsel %vm903_vm9, %v887_v32, %v919_v40  ;;  %vm902_vm10 = vcmp.ge.f32.partialorder %v886_v41, 0.0  ;;  %v918_v49 = vmul.f32 0.01, %v886_v41  ;;  %v889_v50 = vadd.f32 %v1498_v43, %v701_v42  ;;  %v849_v51 = vpop.f32.mrf.mxu0  ;;  %v1461_v52 = vpop.f32.mrf.mxu1 }
 0x12c   : > { %v1001_v54 = vadd.f32 %v1000_v47, %v986_v46  ;;  %951 = vst [vmem:[%s1977_s8 + $0x48] sm:$0xff] %v935_v48  ;;  %v964_v14 = vadd.f32 %v963_v45, %v933_v25  ;;  %v888_v55 = vadd.f32 %v849_v51, %v696_v12  ;;  %v711_v58 = vadd.f32 %v1461_v52, %v1968_v18 }
 0x12d   : > { %v934_v56 = vsel %vm902_vm10, %v886_v41, %v918_v49  ;;  %vm905_vm11 = vcmp.ge.f32.partialorder %v889_v50, 0.0  ;;  %v921_v57 = vmul.f32 0.01, %v889_v50  ;;  %v1501_v59 = vpop.f32.mrf.mxu0  ;;  %v705_v16 = vpop.f32.mrf.mxu1  ;;  %v989_v5 = vmul.f32 %v935_v48, %v935_v48 }
 0x12e   : > { %950 = vst [vmem:[%s1977_s8 + $0x40] sm:$0xff] %v934_v56  ;;  %v965_v60 = vadd.f32 %v964_v14, %v934_v56  ;;  %v988_v61 = vmul.f32 %v934_v56, %v934_v56  ;;  %v1002_v62 = vadd.f32 %v1001_v54, %v987_v53  ;;  %vm904_vm12 = vcmp.ge.f32.partialorder %v888_v55, 0.0 }
 0x12f   : > { %v937_v63 = vsel %vm905_vm11, %v889_v50, %v921_v57  ;;  %v920_v0 = vmul.f32 0.01, %v888_v55  ;;  %v891_v1 = vadd.f32 %v1501_v59, %v711_v58  ;;  %v706_v2 = vadd.f32 %v705_v16, %v1970_v20  ;;  %v859_v3 = vpop.f32.mrf.mxu0  ;;  %v1464_v4 = vpop.f32.mrf.mxu1  ;;  %v1093_v57 = vld [vmem:[%s1977_s8] sm:$0xff] (%p1708_p6)  ;;  %v1095_v58 = vld [vmem:[%s1977_s8 + $0x8] sm:$0xff] (%p1708_p6)  ;;  %v1097_v59 = vld [vmem:[%s1977_s8 + $0x10] sm:$0xff] (%p1708_p6) }
 0x130   : > { %v1003_v6 = vadd.f32 %v1002_v62, %v988_v61  ;;  %953 = vst [vmem:[%s1977_s8 + $0x58] sm:$0xff] %v937_v63  ;;  %v966_v18 = vadd.f32 %v965_v60, %v935_v48  ;;  %v721_v7 = vadd.f32 %v1464_v4, %v1972_v22  ;;  %v991_v22 = vmul.f32 %v937_v63, %v937_v63  ;;  %v1099_v16 = vld [vmem:[%s1977_s8 + $0x18] sm:$0xff] (%p1708_p6)  ;;  %v1101_v60 = vld [vmem:[%s1977_s8 + $0x20] sm:$0xff] (%p1708_p6)  ;;  %v1103_v61 = vld [vmem:[%s1977_s8 + $0x28] sm:$0xff] (%p1708_p6) }
 0x131   : > { %v936_v8 = vsel %vm904_vm12, %v888_v55, %v920_v0  ;;  %vm907_vm13 = vcmp.ge.f32.partialorder %v891_v1, 0.0  ;;  %v923_v9 = vmul.f32 0.01, %v891_v1  ;;  %v890_v11 = vadd.f32 %v859_v3, %v706_v2  ;;  %v1504_v13 = vpop.f32.mrf.mxu0  ;;  %v715_v15 = vpop.f32.mrf.mxu1  ;;  %v1105_v62 = vld [vmem:[%s1977_s8 + $0x30] sm:$0xff] (%p1708_p6)  ;;  %1094 = vst [vmem:[%s1034_s27] sm:$0xff] (%p1708_p6), %v1093_v57  ;;  %1096 = vst [vmem:[%s1034_s27 + $0x10] sm:$0xff] (%p1708_p6), %v1095_v58 }
 0x132   : > { %952 = vst [vmem:[%s1977_s8 + $0x50] sm:$0xff] %v936_v8  ;;  %v967_v17 = vadd.f32 %v966_v18, %v936_v8  ;;  %v990_v19 = vmul.f32 %v936_v8, %v936_v8  ;;  %v1004_v20 = vadd.f32 %v1003_v6, %v989_v5  ;;  %v893_v21 = vadd.f32 %v1504_v13, %v721_v7 }
 0x133   : > { %v939_v23 = vsel %vm907_vm13, %v891_v1, %v923_v9  ;;  %vm906_vm14 = vcmp.ge.f32.partialorder %v890_v11, 0.0  ;;  %v922_v26 = vmul.f32 0.01, %v890_v11  ;;  %v716_v27 = vadd.f32 %v715_v15, %v1974_v24  ;;  %v869_v30 = vpop.f32.mrf.mxu0  ;;  %v1111_v1 = vld [vmem:[%s1977_s8 + $0x48] sm:$0xff] (%p1708_p6)  ;;  %1098 = vst [vmem:[%s1034_s27 + $0x20] sm:$0xff] (%p1708_p6), %v1097_v59  ;;  %1100 = vst [vmem:[%s1034_s27 + $0x30] sm:$0xff] (%p1708_p6), %v1099_v16 }
 0x134   : > { %v1005_v28 = vadd.f32 %v1004_v20, %v990_v19  ;;  %955 = vst [vmem:[%s1977_s8 + $0x68] sm:$0xff] %v939_v23  ;;  %v968_v29 = vadd.f32 %v967_v17, %v937_v63  ;;  %vm909_vm15 = vcmp.ge.f32.partialorder %v893_v21, 0.0  ;;  %v925_v32 = vmul.f32 0.01, %v893_v21  ;;  %v1107_v63 = vld [vmem:[%s1977_s8 + $0x38] sm:$0xff] (%p1708_p6)  ;;  %1102 = vst [vmem:[%s1034_s27 + $0x40] sm:$0xff] (%p1708_p6), %v1101_v60 }
 0x135   : > { %v938_v31 = vsel %vm906_vm14, %v890_v11, %v922_v26  ;;  %v892_v25 = vadd.f32 %v869_v30, %v716_v27  ;;  %v993_v36 = vmul.f32 %v939_v23, %v939_v23  ;;  %v1109_v0 = vld [vmem:[%s1977_s8 + $0x40] sm:$0xff] (%p1708_p6)  ;;  %1104 = vst [vmem:[%s1034_s27 + $0x50] sm:$0xff] (%p1708_p6), %v1103_v61  ;;  %1106 = vst [vmem:[%s1034_s27 + $0x60] sm:$0xff] (%p1708_p6), %v1105_v62 }
 0x136   : > { %954 = vst [vmem:[%s1977_s8 + $0x60] sm:$0xff] %v938_v31  ;;  %v969_v33 = vadd.f32 %v968_v29, %v938_v31  ;;  %v992_v34 = vmul.f32 %v938_v31, %v938_v31  ;;  %v1006_v35 = vadd.f32 %v1005_v28, %v991_v22  ;;  %v941_v10 = vsel %vm909_vm15, %v893_v21, %v925_v32 }
 0x137   : > { %vm908_vm0 = vcmp.ge.f32.partialorder %v892_v25, 0.0  ;;  %v924_v24 = vmul.f32 0.01, %v892_v25  ;;  %957 = vst [vmem:[%s1977_s8 + $0x78] sm:$0xff] %v941_v10  ;;  %v995_v43 = vmul.f32 %v941_v10, %v941_v10  ;;  %v1115_v3 = vld [vmem:[%s1977_s8 + $0x58] sm:$0xff] (%p1708_p6)  ;;  %1108 = vst [vmem:[%s1034_s27 + $0x70] sm:$0xff] (%p1708_p6), %v1107_v63 }
 0x138   : > { %v1007_v37 = vadd.f32 %v1006_v35, %v992_v34  ;;  %v970_v38 = vadd.f32 %v969_v33, %v939_v23  ;;  %1110 = vst [vmem:[%s1034_s27 + $0x80] sm:$0xff] (%p1708_p6), %v1109_v0  ;;  %1112 = vst [vmem:[%s1034_s27 + $0x90] sm:$0xff] (%p1708_p6), %v1111_v1 }
 0x139   : > { %v940_v39 = vsel %vm908_vm0, %v892_v25, %v924_v24  ;;  %v1113_v2 = vld [vmem:[%s1977_s8 + $0x50] sm:$0xff] (%p1708_p6)  ;;  %1116 = vst [vmem:[%s1034_s27 + $0xb0] sm:$0xff] (%p1708_p6), %v1115_v3 }
 0x13a   : > { %956 = vst [vmem:[%s1977_s8 + $0x70] sm:$0xff] %v940_v39  ;;  %v971_v40 = vadd.f32 %v970_v38, %v940_v39  ;;  %v994_v41 = vmul.f32 %v940_v39, %v940_v39  ;;  %v1008_v42 = vadd.f32 %v1007_v37, %v993_v36  ;;  %1114 = vst [vmem:[%s1034_s27 + $0xa0] sm:$0xff] (%p1708_p6), %v1113_v2 }
 0x13b   : > { %v1119_v5 = vld [vmem:[%s1977_s8 + $0x68] sm:$0xff] (%p1708_p6) }
 0x13c   : > { %v972_v44 = vadd.f32 %v971_v40, %v941_v10  ;;  %v1009_v45 = vadd.f32 %v1008_v42, %v994_v41  ;;  %1120 = vst [vmem:[%s1034_s27 + $0xd0] sm:$0xff] (%p1708_p6), %v1119_v5 }
 0x13d   : > { %v1117_v4 = vld [vmem:[%s1977_s8 + $0x60] sm:$0xff] (%p1708_p6) }
 0x13e   : > { %v973_v46 = vrot.slane %v972_v44, 4  ;;  %v1010_v47 = vadd.f32 %v1009_v45, %v995_v43  ;;  %1118 = vst [vmem:[%s1034_s27 + $0xc0] sm:$0xff] (%p1708_p6), %v1117_v4  ;;  %v1123_v18 = vld [vmem:[%s1977_s8 + $0x78] sm:$0xff] (%p1708_p6) }
 0x13f   : > { %1124 = vst [vmem:[%s1034_s27 + $0xf0] sm:$0xff] (%p1708_p6), %v1123_v18 }
 0x140   : > { %v974_v12 = vadd.f32 %v973_v46, %v972_v44  ;;  %v1011_v48 = vrot.slane %v1010_v47, 4 }
 0x141   : > { %v1121_v6 = vld [vmem:[%s1977_s8 + $0x70] sm:$0xff] (%p1708_p6) }
 0x142   : > { %v975_v49 = vrot.slane %v974_v12, 2  ;;  %v1012_v50 = vadd.f32 %v1011_v48, %v1010_v47  ;;  %1122 = vst [vmem:[%s1034_s27 + $0xe0] sm:$0xff] (%p1708_p6), %v1121_v6 }
 0x144   : > { %v976_v51 = vadd.f32 %v975_v49, %v974_v12  ;;  %v1013_v52 = vrot.slane %v1012_v50, 2 }
 0x146   : > { %v977_v53 = vrot.slane %v976_v51, 1  ;;  %v1014_v54 = vadd.f32 %v1013_v52, %v1012_v50 }
 0x148   : > { %v978_v14 = vadd.f32 %v977_v53, %v976_v51  ;;  %v1015_v55 = vrot.slane %v1014_v54, 1  ;;  %1030 = sbr.rel (!%p1708_p6) target bundleno = 333 (0x14d), region = 74 }
 0x14a   : > { %979 = vst [vmem:[%s323_s13] sm:$0x1] %v978_v14  ;;  %v1016_v56 = vadd.f32 %v1015_v55, %v1014_v54 }
 0x14c   : > { %1017 = vst [vmem:[%s323_s13 + $0x1] sm:$0x1] %v1016_v56 }
 0x14d PF: > { %s15_s21 = sadd.s32 1, %s1632_s21   ;;  %s2058_s15 = smov %s1612_s16 }
 0x14e   : > { %p12_p13 = scmp.ge.s32.totalorder %s15_s21, 6   ;;  %s2059_s16 = smov %s1716_s30 }
 0x14f   : > { %s2060_s17 = smov %s1624_s19  ;;  %s2061_s18 = smov %s1628_s20 }
 0x150   : > { %s2062_s19 = smov %s2065_s22  ;;  %s2063_s20 = smov %s2069_s23 }
 0x151   :  { %14 = sbr.rel (!%p12_p13) target bundleno = 4 (0x4), region = 157 }

// kernel: res_context_block.5
= control target key start
LH: loop header
LB: loop body
LE: loop exit
PB: predicated region body
PF: predicated region fallthrough
CT: control target
= control target key end

     0   :  { %s2016_s15 = smov 0   ;;  %s2018_s16 = smov 0   ;;  %s2519_s0 = inlined_call_operand.vmem [shape: f32[2,16,16,64], index: 0, kind: input, shape index: {}]   ;;  %s2520_s1 = inlined_call_operand.vmem [shape: f32[1,64], index: 1, kind: input, shape index: {}]   ;;  %s2521_s2 = inlined_call_operand.vmem [shape: f32[3,64,128], index: 2, kind: input, shape index: {}]   ;;  %s2522_s3 = inlined_call_operand.vmem [shape: f32[2,16,16,128], index: 3, kind: output, shape index: {0}]   ;;  %s2523_s4 = inlined_call_operand.vmem [shape: f32[4,2,128], index: 4, kind: output, shape index: {1}]  }
   0x1   :  { %s2020_s17 = smov 0   ;;  %s2022_s18 = smov 0  }
   0x2   :  { %s2024_s19 = smov 0  }
   0x3 LB: > { %s24_s20 = sadd.s32 1, %s1981_s17  ;;  %s27_s21 = sadd.s32 1, %s1985_s18  ;;  %s1989_s19 = sphi %s2024_s19, %s15_s19   ;;  %s1985_s18 = sphi %s2022_s18, %s2557_s18   ;;  %s1981_s17 = sphi %s2020_s17, %s2556_s17   ;;  %s1977_s16 = sphi %s2018_s16, %s2555_s16   ;;  %s1973_s15 = sphi %s2016_s15, %s2554_s15  }
   0x4   : > { %p25_p0 = scmp.ge.s32.totalorder %s24_s20, 2  ;;  %p1625_p1 = scmp.ge.s32.totalorder %s1989_s19, 1 }
   0x5   : > { %p191_p2 = scmp.lt.s32.totalorder %s1989_s19, 5 }
   0x6   : > { %s2559_s20 = smov (%p25_p0, %s24_s20), 0  ;;  %s2561_s21 = smov (!%p25_p0, %s27_s21), %s1985_s18 }
   0x7   : > { %p192_p3 = pnand %p1625_p1, %p191_p2  ;;  %p29_p4 = scmp.ge.s32.totalorder %s2561_s21, 2 }
   0x8   : > { %s1626_s26 = sshll.u32 (!%p192_p3), %s1973_s15, 3  ;;  %p234_p5 = scmp.lt.s32.totalorder (!%p192_p3), %s1977_s16, 1 }
   0x9   : > { %s2563_s21 = smov (%p29_p4, %s2561_s21), 0  ;;  %195 = sbr.rel (%p192_p3) target bundleno = 305 (0x131), region = 32 }
   0xa   : > { %p236_p6 = scmp.lt.s32.totalorder (!%p192_p3), %s1626_s26, 15 }
   0xe   : > { %v1644_v0 = vld [vmem:[%s2521_s2 + $0x78] sm:$0xff]  ;;  %v1643_v1 = vld [vmem:[%s2521_s2 + $0x70] sm:$0xff]  ;;  %v1642_v2 = vld [vmem:[%s2521_s2 + $0x68] sm:$0xff]  ;;  %s235_s29 = scalar_select %p234_p5, %s1977_s16, 1  ;;  %vm770_vm0 = vcmask 523264   ;;  %v416_v25 = vlaneseq  ;;  %vm318_vm1 = vcmask 1040384  }
   0xf   : > { %1895 = vmatprep.subr.mxu1 %v1644_v0  ;;  %1775 = vmatprep.subr.mxu0 %v1644_v0  ;;  %s2565_s26 = smov (!%p236_p6, %s1626_s26), 15  ;;  %v1641_v3 = vld [vmem:[%s2521_s2 + $0x60] sm:$0xff]  ;;  %v1640_v4 = vld [vmem:[%s2521_s2 + $0x58] sm:$0xff]  ;;  %v1639_v5 = vld [vmem:[%s2521_s2 + $0x50] sm:$0xff]  ;;  %vm367_vm3 = vcmask 1046528  }
  0x10   : > { %1903 = vmatpush3.msra.mxu1 %v1644_v0  ;;  %1776 = vmatpush3.msra.mxu0 %v1644_v0  ;;  %s1628_s6 = sshll.u32 %s235_s29, 5  ;;  %s1627_s7 = sshll.u32 %s2565_s26, 1  ;;  %v2085_v7 = vld [vmem:[%s2520_s1] ss:$0 sm:$0xff]  ;;  %v1638_v8 = vld [vmem:[%s2521_s2 + $0x48] sm:$0xff]  ;;  %v760_v17 = vld [vmem:[%s2521_s2 + $0x38] sm:$0xff] }
  0x11   : > { %1896 = vmatprep.subr.mxu1 %v1643_v1  ;;  %1777 = vmatprep.subr.mxu0 %v1643_v1  ;;  %s2068_s10 = sadd.s32 %s1628_s6, %s1627_s7  ;;  %v1637_v11 = vld [vmem:[%s2521_s2 + $0x40] sm:$0xff]  ;;  %v1684_v21 = vld [vmem:[%s2521_s2 + $0xb8] sm:$0xff]  ;;  %v759_v22 = vld [vmem:[%s2521_s2 + $0x30] sm:$0xff]  ;;  %v2152_v34 = vshrl.u32 %v416_v25, 7 }
  0x12   : > { %1904 = vmatpush3.msra.mxu1 %v1643_v1  ;;  %1778 = vmatpush3.msra.mxu0 %v1643_v1  ;;  %s1629_s11 = sshll.u32 %s2068_s10, 3  ;;  %v1683_v26 = vld [vmem:[%s2521_s2 + $0xb0] sm:$0xff]  ;;  %v758_v30 = vld [vmem:[%s2521_s2 + $0x28] sm:$0xff]  ;;  %v757_v36 = vld [vmem:[%s2521_s2 + $0x20] sm:$0xff]  ;;  %s1634_s10 = sshll.u32 %s1977_s16, 1 }
  0x13   : > { %1897 = vmatprep.subr.mxu1 %v1642_v2  ;;  %1779 = vmatprep.subr.mxu0 %v1642_v2  ;;  %s2079_s23 = scalar_lea.vmem %s2519_s0, %s1629_s11  ;;  %v1682_v35 = vld [vmem:[%s2521_s2 + $0xa8] sm:$0xff]  ;;  %v1681_v39 = vld [vmem:[%s2521_s2 + $0xa0] sm:$0xff]  ;;  %v418_v43 = vadd.s32 8, %v2152_v34  ;;  %v756_v44 = vld [vmem:[%s2521_s2 + $0x18] sm:$0xff]  ;;  %v419_v46 = vadd.s32 16, %v2152_v34  ;;  %v437_v49 = vand.u32 15, %v2152_v34  ;;  %s2473_s5 = scalar_lea.vmem %s2522_s3, %s1629_s11 }
  0x14   : > { %1905 = vmatpush3.msra.mxu1 %v1642_v2  ;;  %1780 = vmatpush3.msra.mxu0 %v1642_v2  ;;  %v271_v6 = vld [vmem:[%s2079_s23 + $0x40] sm:$0xff]  ;;  %v272_v10 = vld [vmem:[%s2079_s23 + $0x48] sm:$0xff]  ;;  %v273_v16 = vld [vmem:[%s2079_s23 + $0x50] sm:$0xff]  ;;  %v420_v50 = vadd.s32 24, %v2152_v34  ;;  %v421_v51 = vadd.s32 32, %v2152_v34  ;;  %s256_s11 = sadd.s32 %s1973_s15, %s1634_s10 }
  0x15   : > { %1898 = vmatprep.subr.mxu1 %v1641_v3  ;;  %1781 = vmatprep.subr.mxu0 %v1641_v3  ;;  %v263_v9 = vld [vmem:[%s2079_s23] sm:$0xff]  ;;  %v2096_v12 = vsub.f32 %v271_v6, %v2085_v7  ;;  %v264_v13 = vld [vmem:[%s2079_s23 + $0x8] sm:$0xff]  ;;  %v2103_v15 = vsub.f32 %v272_v10, %v2085_v7  ;;  %v265_v19 = vld [vmem:[%s2079_s23 + $0x10] sm:$0xff]  ;;  %v2125_v23 = vsub.f32 %v273_v16, %v2085_v7  ;;  %v444_v57 = vand.u32 15, %v418_v43  ;;  %p257_p7 = scmp.lt.s32.totalorder %s256_s11, 3 }
  0x16   : > { %1906 = vmatpush3.msra.mxu1 %v1641_v3  ;;  %1782 = vmatpush3.msra.mxu0 %v1641_v3  ;;  %v2100_v14 = vsub.f32 %v263_v9, %v2085_v7  ;;  %v2110_v18 = vsub.f32 %v264_v13, %v2085_v7  ;;  %v274_v20 = vld [vmem:[%s2079_s23 + $0x58] sm:$0xff]  ;;  %v2136_v27 = vsub.f32 %v265_v19, %v2085_v7  ;;  %v275_v29 = vld [vmem:[%s2079_s23 + $0x60] sm:$0xff]  ;;  %v276_v33 = vld [vmem:[%s2079_s23 + $0x68] sm:$0xff]  ;;  %v451_v62 = vand.u32 15, %v419_v46 }
  0x17   : > { %1899 = vmatprep.subr.mxu1 %v1640_v4  ;;  %1783 = vmatprep.subr.mxu0 %v1640_v4  ;;  %v266_v24 = vld [vmem:[%s2079_s23 + $0x18] sm:$0xff]  ;;  %v2139_v28 = vsub.f32 %v274_v20, %v2085_v7  ;;  %v267_v32 = vld [vmem:[%s2079_s23 + $0x20] sm:$0xff]  ;;  %v2165_v37 = vsub.f32 %v275_v29, %v2085_v7  ;;  %v268_v38 = vld [vmem:[%s2079_s23 + $0x28] sm:$0xff]  ;;  %v2177_v41 = vsub.f32 %v276_v33, %v2085_v7  ;;  %vm2222_vm2 = vcmp.eq.s32.totalorder %v437_v49, 0  ;;  %s2567_s11 = smov (!%p257_p7, %s256_s11), 3 }
  0x18   : > { %1907 = vmatpush3.msra.mxu1 %v1640_v4  ;;  %1784 = vmatpush3.msra.mxu0 %v1640_v4  ;;  %v2148_v31 = vsub.f32 %v266_v24, %v2085_v7  ;;  %v2174_v40 = vsub.f32 %v267_v32, %v2085_v7  ;;  %v277_v42 = vld [vmem:[%s2079_s23 + $0x70] sm:$0xff]  ;;  %v2187_v45 = vsub.f32 %v268_v38, %v2085_v7  ;;  %v278_v48 = vld [vmem:[%s2079_s23 + $0x78] sm:$0xff]  ;;  %v319_v56 = vrot.slane %v2100_v14, 7  ;;  %v754_v4 = vld [vmem:[%s2521_s2 + $0x8] sm:$0xff]  ;;  %s1635_s16 = sshll.u32 %s2567_s11, 1 }
  0x19   : > { %1900 = vmatprep.subr.mxu1 %v1639_v5  ;;  %1785 = vmatprep.subr.mxu0 %v1639_v5  ;;  %v269_v47 = vld [vmem:[%s2079_s23 + $0x30] sm:$0xff]  ;;  %v1680_v52 = vld [vmem:[%s2521_s2 + $0x98] sm:$0xff]  ;;  %v2206_v54 = vsub.f32 %v277_v42, %v2085_v7  ;;  %v2219_v60 = vsub.f32 %v278_v48, %v2085_v7  ;;  %v322_v61 = vrot.slane %v2136_v27, 7  ;;  %v458_v0 = vand.u32 15, %v420_v50  ;;  %v753_v13 = vld [vmem:[%s2521_s2] sm:$0xff]  ;;  %s260_s7 = scalar_lea.vmem %s2523_s4, %s1635_s16 }
  0x1a   : > { %1908 = vmatpush3.msra.mxu1 %v1639_v5  ;;  %1786 = vmatpush3.msra.mxu0 %v1639_v5  ;;  %v755_v53 = vld [vmem:[%s2521_s2 + $0x10] sm:$0xff]  ;;  %v270_v55 = vld [vmem:[%s2079_s23 + $0x38] sm:$0xff]  ;;  %v2216_v59 = vsub.f32 %v269_v47, %v2085_v7  ;;  %v465_v1 = vand.u32 15, %v421_v51  ;;  %v320_v2 = vrot.slane %v2110_v18, 7  ;;  %v371_v3 = vrot.slane %v2136_v27, 1  ;;  %v1677_v25 = vld [vmem:[%s2521_s2 + $0x80] sm:$0xff] }
  0x1b   : > { %1901 = vmatprep.subr.mxu1 %v1638_v8  ;;  %1787 = vmatprep.subr.mxu0 %v1638_v8  ;;  %v1679_v58 = vld [vmem:[%s2521_s2 + $0x90] sm:$0xff]  ;;  %v2234_v5 = vsub.f32 %v270_v55, %v2085_v7  ;;  %v369_v6 = vrot.slane %v2110_v18, 1  ;;  %v368_v9 = vrot.slane %v2100_v14, 1  ;;  %vm2239_vm4 = vcmp.eq.s32.totalorder %v444_v57, 15  ;;  %v1678_v7 = vld [vmem:[%s2521_s2 + $0x88] sm:$0xff] }
  0x1c   : > { %1909 = vmatpush3.msra.mxu1 %v1638_v8  ;;  %1788 = vmatpush3.msra.mxu0 %v1638_v8  ;;  %v366_v8 = vsel %vm318_vm1, 0.0, %v319_v56  ;;  %vm2257_vm5 = vcmp.eq.s32.totalorder %v451_v62, 0  ;;  %v373_v19 = vrot.slane %v2148_v31, 1  ;;  %vm2264_vm6 = vcmp.eq.s32.totalorder %v458_v0, 15 }
  0x1d   : > { %1902 = vmatprep.subr.mxu1 %v1637_v11  ;;  %1789 = vmatprep.subr.mxu0 %v1637_v11  ;;  %vm2268_vm7 = vcmp.eq.s32.totalorder %v465_v1, 0  ;;  %v673_v24 = vsel %vm2222_vm2, 0.0, %v366_v8  ;;  %v324_v29 = vrot.slane %v2148_v31, 7  ;;  %v321_v32 = vsel %vm318_vm1, %v319_v56, %v320_v2 }
  0x1e   : > { %1910 = vmatpush3.msra.mxu1 %v1637_v11  ;;  %1803 = vmatprep.mubr.msk.f32.mxu1 %vm770_vm0, %v2096_v12  ;;  %v370_v33 = vsel %vm367_vm3, %v368_v9, %v369_v6  ;;  %v383_v43 = vrot.slane %v2096_v12, 1  ;;  %v374_v46 = vsel %vm367_vm3, %v371_v3, %v373_v19  ;;  %v328_v48 = vrot.slane %v2187_v45, 7 }
  0x1f   : > { %1790 = vmatpush3.msra.mxu0 %v1637_v11  ;;  %1791 = vmatprep.mubr.msk.f32.mxu0 %vm770_vm0, %v2100_v14  ;;  %v422_v11 = vadd.s32 40, %v2152_v34  ;;  %v323_v14 = vsel %vm318_vm1, %v320_v2, %v322_v61  ;;  %v377_v49 = vrot.slane %v2187_v45, 1  ;;  %v379_v50 = vrot.slane %v2216_v59, 1 }
  0x20   : > { %1804 = vmatmul.mubr.msk.f32.vlgmr.msra.gmra.mxu1 %vm770_vm0, %v2103_v15  ;;  %1815 = vmatprep.subr.mxu1 %v760_v17  ;;  %v325_v51 = vsel %vm318_vm1, %v322_v61, %v324_v29  ;;  %v427_v61 = vadd.s32 80, %v2152_v34  ;;  %v332_v1 = vrot.slane %v2234_v5, 7 }
  0x21   : > { %1792 = vmatmul.mubr.msk.f32.vlgmr.msra.gmra.mxu0 %vm770_vm0, %v2110_v18  ;;  %1816 = vmatpush3.msra.mxu1 %v760_v17  ;;  %v326_v17 = vrot.slane %v2174_v40, 7  ;;  %v423_v18 = vadd.s32 48, %v2152_v34  ;;  %v380_v0 = vsel %vm367_vm3, %v377_v49, %v379_v50 }
  0x22   : > { %1855 = vmatprep.subr.mxu0 %v1684_v21  ;;  %1817 = vmatprep.subr.mxu1 %v759_v22 }
  0x23   : > { %1856 = vmatpush3.msra.mxu0 %v1684_v21  ;;  %1806 = vmatprep.mubr.msk.f32.mxu1 %vm770_vm0, %v2125_v23  ;;  %v327_v38 = vsel %vm318_vm1, %v324_v29, %v326_v17  ;;  %v479_v42 = vand.u32 15, %v423_v18  ;;  %v329_v62 = vsel %vm318_vm1, %v326_v17, %v328_v48  ;;  %v428_v18 = vadd.s32 88, %v2152_v34 }
  0x24   : > { %1818 = vmatpush3.msra.mxu1 %v759_v22  ;;  %1857 = vmatprep.subr.mxu0 %v1683_v26  ;;  %v424_v22 = vadd.s32 56, %v2152_v34 }
  0x25   : > { %1794 = vmatprep.mubr.msk.f32.mxu0 %vm770_vm0, %v2136_v27  ;;  %1807 = vmatmul.mubr.msk.f32.gmra.mxu1 %vm770_vm0, %v2139_v28  ;;  %vm2311_vm8 = vcmp.eq.s32.totalorder %v479_v42, 0 }
  0x26   : > { %1819 = vmatprep.subr.mxu1 %v758_v30  ;;  %1858 = vmatpush3.msra.mxu0 %v1683_v26  ;;  %v372_v26 = vsel %vm367_vm3, %v369_v6, %v371_v3  ;;  %v486_v55 = vand.u32 15, %v424_v22  ;;  %v387_v6 = vrot.slane %v2125_v23, 1 }
  0x27   : > { %1795 = vmatmul.mubr.msk.f32.gmra.mxu0 %vm770_vm0, %v2148_v31  ;;  %1820 = vmatpush3.msra.mxu1 %v758_v30  ;;  %v375_v30 = vrot.slane %v2174_v40, 1  ;;  %v425_v31 = vadd.s32 64, %v2152_v34 }
  0x28   : > { %1859 = vmatprep.subr.mxu0 %v1682_v35  ;;  %1821 = vmatprep.subr.mxu1 %v757_v36  ;;  %vm2338_vm10 = vcmp.eq.s32.totalorder %v486_v55, 15 }
  0x29   : > { %1860 = vmatpush3.msra.mxu0 %v1682_v35  ;;  %1809 = vmatprep.mubr.msk.f32.mxu1 %vm770_vm0, %v2165_v37  ;;  %v675_v35 = vsel %vm2257_vm5, 0.0, %v323_v14  ;;  %v376_v47 = vsel %vm367_vm3, %v373_v19, %v375_v30  ;;  %v493_v57 = vand.u32 15, %v425_v31  ;;  %v378_v63 = vsel %vm367_vm3, %v375_v30, %v377_v49 }
  0x2a   : > { %1822 = vmatpush3.msra.mxu1 %v757_v36  ;;  %1861 = vmatprep.subr.mxu0 %v1681_v39  ;;  %v472_v36 = vand.u32 15, %v422_v11  ;;  %v740_v27 = vsel %vm2264_vm6, 0.0, %v376_v47  ;;  %v429_v14 = vadd.s32 96, %v2152_v34 }
  0x2b   : > { %1797 = vmatprep.mubr.msk.f32.mxu0 %vm770_vm0, %v2174_v40  ;;  %1810 = vmatmul.mubr.msk.f32.gmra.mxu1 %vm770_vm0, %v2177_v41  ;;  %v334_v40 = vrot.slane %v2096_v12, 7  ;;  %vm2345_vm11 = vcmp.eq.s32.totalorder %v493_v57, 0  ;;  %v397_v57 = vrot.slane %v2219_v60, 1 }
  0x2c   : > { %1823 = vmatprep.subr.mxu1 %v756_v44  ;;  %1862 = vmatpush3.msra.mxu0 %v1681_v39  ;;  %v330_v39 = vrot.slane %v2216_v59, 7  ;;  %vm2319_vm9 = vcmp.eq.s32.totalorder %v472_v36, 15  ;;  %v521_v30 = vand.u32 15, %v429_v14  ;;  %v430_v36 = vadd.s32 104, %v2152_v34 }
  0x2d   : > { %1798 = vmatmul.mubr.msk.f32.gmra.mxu0 %vm770_vm0, %v2187_v45  ;;  %1824 = vmatpush3.msra.mxu1 %v756_v44  ;;  %v738_v44 = vsel %vm2239_vm4, 0.0, %v372_v26  ;;  %v742_v11 = vsel %vm2319_vm9, 0.0, %v380_v0  ;;  %v342_v26 = vrot.slane %v2165_v37, 7  ;;  %v415_v0 = vsel %vm367_vm3, %v397_v57, 0.0 }
  0x2e   : > { %1863 = vmatprep.subr.mxu0 %v1680_v52  ;;  %1825 = vmatprep.subr.mxu1 %v755_v53  ;;  %v331_v45 = vsel %vm318_vm1, %v328_v48, %v330_v39  ;;  %v333_v16 = vsel %vm318_vm1, %v330_v39, %v332_v1  ;;  %vm2399_vm14 = vcmp.eq.s32.totalorder %v521_v30, 0  ;;  %v395_v48 = vrot.slane %v2206_v54, 1 }
  0x2f   : > { %1864 = vmatpush3.msra.mxu0 %v1680_v52  ;;  %1812 = vmatprep.mubr.msk.f32.mxu1 %vm770_vm0, %v2206_v54  ;;  %v677_v52 = vsel %vm2268_vm7, 0.0, %v327_v38  ;;  %v679_v2 = vsel %vm2311_vm8, 0.0, %v331_v45  ;;  %v528_v49 = vand.u32 15, %v430_v36 }
  0x30   : > { %1826 = vmatpush3.msra.mxu1 %v755_v53  ;;  %1865 = vmatprep.subr.mxu0 %v1679_v58  ;;  %v381_v53 = vrot.slane %v2234_v5, 1 }
  0x31   : > { %1800 = vmatprep.mubr.msk.f32.mxu0 %vm770_vm0, %v2216_v59  ;;  %1813 = vmatmul.mubr.msk.f32.gmra.mxu1 %vm770_vm0, %v2219_v60  ;;  %vm2429_vm4 = vcmp.eq.s32.totalorder %v528_v49, 15  ;;  %v348_v59 = vrot.slane %v2219_v60, 7 }
  0x32   : > { %1827 = vmatprep.subr.mxu1 %v754_v4  ;;  %1866 = vmatpush3.msra.mxu0 %v1679_v58  ;;  %v426_v58 = vadd.s32 72, %v2152_v34  ;;  %v384_v3 = vsel %vm367_vm3, %v381_v53, %v383_v43  ;;  %v382_v17 = vsel %vm367_vm3, %v379_v50, %v381_v53  ;;  %v432_v50 = vadd.s32 120, %v2152_v34 }
  0x33   : > { %1801 = vmatmul.mubr.msk.f32.gmra.mxu0 %vm770_vm0, %v2234_v5  ;;  %1828 = vmatpush3.msra.mxu1 %v754_v4  ;;  %v385_v4 = vrot.slane %v2103_v15, 1  ;;  %v335_v5 = vsel %vm318_vm1, %v332_v1, %v334_v40  ;;  %v744_v19 = vsel %vm2338_vm10, 0.0, %v384_v3 }
  0x34   : > { %1867 = vmatprep.subr.mxu0 %v1678_v7  ;;  %1829 = vmatprep.subr.mxu1 %v753_v13  ;;  %v500_v10 = vand.u32 15, %v426_v58  ;;  %v681_v20 = vsel %vm2345_vm11, 0.0, %v335_v5  ;;  %v542_v58 = vand.u32 15, %v432_v50 }
  0x35   : > { %1868 = vmatpush3.msra.mxu0 %v1678_v7  ;;  %1830 = vmatpush3.msra.mxu1 %v753_v13  ;;  %v338_v7 = vrot.slane %v2125_v23, 7  ;;  %v507_v13 = vand.u32 15, %v427_v61  ;;  %v336_v23 = vrot.slane %v2103_v15, 7  ;;  %v388_v21 = vsel %vm367_vm3, %v385_v4, %v387_v6 }
  0x36   : > { %1831 = vmatprep.mubr.msk.f32.mxu1 %vm770_vm0, %v673_v24  ;;  %1869 = vmatprep.subr.mxu0 %v1677_v25  ;;  %vm2366_vm12 = vcmp.eq.s32.totalorder %v500_v10, 15  ;;  %v389_v24 = vrot.slane %v2139_v28, 1  ;;  %vm704_vm5 = vcmp.eq.s32.totalorder %v542_v58, 15 }
  0x37   : > { %1832 = vmatmul.mubr.msk.f32.vlgmr.msra.gmra.mxu1 %vm770_vm0, %v321_v32  ;;  %1870 = vmatpush3.msra.mxu0 %v1677_v25  ;;  %v391_v25 = vrot.slane %v2165_v37, 1  ;;  %v339_v29 = vsel %vm318_vm1, %v336_v23, %v338_v7  ;;  %vm2375_vm13 = vcmp.eq.s32.totalorder %v507_v13, 0  ;;  %v431_v32 = vadd.s32 112, %v2152_v34 }
  0x38   : > { %1871 = vmatprep.mubr.msk.f32.mxu0 %vm770_vm0, %v370_v33  ;;  %1834 = vmatprep.mubr.msk.f32.mxu1 %vm770_vm0, %v675_v35  ;;  %v386_v33 = vsel %vm367_vm3, %v383_v43, %v385_v4  ;;  %v340_v35 = vrot.slane %v2139_v28, 7  ;;  %v514_v37 = vand.u32 15, %v428_v18  ;;  %v337_v38 = vsel %vm318_vm1, %v334_v40, %v336_v23 }
  0x39   : > { %1872 = vmatmul.mubr.msk.f32.vlgmr.msra.gmra.mxu0 %vm770_vm0, %v738_v44  ;;  %v746_v39 = vsel %vm2366_vm12, 0.0, %v388_v21  ;;  %v683_v42 = vsel %vm2375_vm13, 0.0, %v339_v29  ;;  %v390_v31 = vsel %vm367_vm3, %v387_v6, %v389_v24  ;;  %v392_v28 = vsel %vm367_vm3, %v389_v24, %v391_v25 }
  0x3a   : > { %1874 = vmatprep.mubr.msk.f32.mxu0 %vm770_vm0, %v374_v46  ;;  %v343_v43 = vsel %vm318_vm1, %v340_v35, %v342_v26  ;;  %v393_v40 = vrot.slane %v2177_v41, 1  ;;  %v346_v44 = vrot.slane %v2206_v54, 7  ;;  %v535_v46 = vand.u32 15, %v431_v32 }
  0x3b   : > { %1835 = vmatmul.mubr.msk.f32.gmra.mxu1 %vm770_vm0, %v325_v51  ;;  %vm2406_vm15 = vcmp.eq.s32.totalorder %v514_v37, 15  ;;  %v341_v51 = vsel %vm318_vm1, %v338_v7, %v340_v35  ;;  %v685_v53 = vsel %vm2399_vm14, 0.0, %v343_v43  ;;  %v752_v1 = vsel %vm704_vm5, 0.0, %v415_v0 }
  0x3c   : > { %1837 = vmatprep.mubr.msk.f32.mxu1 %vm770_vm0, %v677_v52  ;;  %v344_v52 = vrot.slane %v2177_v41, 7  ;;  %v748_v55 = vsel %vm2406_vm15, 0.0, %v392_v28  ;;  %v394_v54 = vsel %vm367_vm3, %v391_v25, %v393_v40  ;;  %vm2423_vm2 = vcmp.eq.s32.totalorder %v535_v46, 0 }
  0x3d   : > { %1875 = vmatmul.mubr.msk.f32.gmra.mxu0 %vm770_vm0, %v740_v27  ;;  %v396_v41 = vsel %vm367_vm3, %v393_v40, %v395_v48  ;;  %v349_v60 = vsel %vm318_vm1, %v346_v44, %v348_v59 }
  0x3e   : > { %1877 = vmatprep.mubr.msk.f32.mxu0 %vm770_vm0, %v378_v63  ;;  %v347_v34 = vsel %vm318_vm1, %v344_v52, %v346_v44  ;;  %v345_v27 = vsel %vm318_vm1, %v342_v26, %v344_v52  ;;  %v398_v63 = vsel %vm367_vm3, %v395_v48, %v397_v57 }
  0x3f   : > { %1838 = vmatmul.mubr.msk.f32.gmra.mxu1 %vm770_vm0, %v329_v62  ;;  %v687_v61 = vsel %vm2423_vm2, 0.0, %v347_v34  ;;  %v750_v62 = vsel %vm2429_vm4, 0.0, %v396_v41 }
  0x40   : > { %1840 = vmatprep.mubr.msk.f32.mxu1 %vm770_vm0, %v679_v2 }
  0x41   : > { %1878 = vmatmul.mubr.msk.f32.gmra.mxu0 %vm770_vm0, %v742_v11 }
  0x42   : > { %1880 = vmatprep.mubr.msk.f32.mxu0 %vm770_vm0, %v382_v17 }
  0x43   : > { %1841 = vmatmul.mubr.msk.f32.gmra.mxu1 %vm770_vm0, %v333_v16 }
  0x44   : > { %1843 = vmatprep.mubr.msk.f32.mxu1 %vm770_vm0, %v681_v20 }
  0x45   : > { %1881 = vmatmul.mubr.msk.f32.gmra.mxu0 %vm770_vm0, %v744_v19 }
  0x46   : > { %1883 = vmatprep.mubr.msk.f32.mxu0 %vm770_vm0, %v386_v33 }
  0x47   : > { %1844 = vmatmul.mubr.msk.f32.gmra.mxu1 %vm770_vm0, %v337_v38 }
  0x48   : > { %1846 = vmatprep.mubr.msk.f32.mxu1 %vm770_vm0, %v683_v42 }
  0x49   : > { %1884 = vmatmul.mubr.msk.f32.gmra.mxu0 %vm770_vm0, %v746_v39 }
  0x4a   : > { %1886 = vmatprep.mubr.msk.f32.mxu0 %vm770_vm0, %v390_v31 }
  0x4b   : > { %1847 = vmatmul.mubr.msk.f32.gmra.mxu1 %vm770_vm0, %v341_v51 }
  0x4c   : > { %1849 = vmatprep.mubr.msk.f32.mxu1 %vm770_vm0, %v685_v53 }
  0x4d   : > { %1887 = vmatmul.mubr.msk.f32.gmra.mxu0 %vm770_vm0, %v748_v55 }
  0x4e   : > { %1889 = vmatprep.mubr.msk.f32.mxu0 %vm770_vm0, %v394_v54 }
  0x4f   : > { %1850 = vmatmul.mubr.msk.f32.gmra.mxu1 %vm770_vm0, %v345_v27 }
  0x50   : > { %1852 = vmatprep.mubr.msk.f32.mxu1 %vm770_vm0, %v687_v61 }
  0x51   : > { %1890 = vmatmul.mubr.msk.f32.gmra.mxu0 %vm770_vm0, %v750_v62 }
  0x52   : > { %1892 = vmatprep.mubr.msk.f32.mxu0 %vm770_vm0, %v398_v63 }
  0x53   : > { %1853 = vmatmul.mubr.msk.f32.gmra.mxu1 %vm770_vm0, %v349_v60 }
  0x55   : > { %1893 = vmatmul.mubr.msk.f32.gmra.mxu0 %vm770_vm0, %v752_v1 }
  0xe0   : > { %v2452_v2 = vpop.f32.mrf.mxu1 }
  0xe1   : > { %v1793_v3 = vpop.f32.mrf.mxu0 }
  0xe2   : > { %v2454_v4 = vpop.f32.mrf.mxu1 }
  0xe3   : > { %v869_v6 = vpop.f32.mrf.mxu0 }
  0xe5   : > { %v2456_v8 = vpop.f32.mrf.mxu1 }
  0xe7   : > { %v1796_v5 = vpop.f32.mrf.mxu0  ;;  %v2458_v9 = vpop.f32.mrf.mxu1 }
  0xe9   : > { %v879_v10 = vpop.f32.mrf.mxu0 }
  0xeb   : > { %v2460_v11 = vpop.f32.mrf.mxu1 }
  0xed   : > { %v1799_v7 = vpop.f32.mrf.mxu0  ;;  %v2462_v13 = vpop.f32.mrf.mxu1 }
  0xef   : > { %v889_v14 = vpop.f32.mrf.mxu0 }
  0xf1   : > { %v2464_v16 = vpop.f32.mrf.mxu1 }
  0xf3   : > { %v1802_v17 = vpop.f32.mrf.mxu0  ;;  %v2466_v18 = vpop.f32.mrf.mxu1 }
  0xf5   : > { %v899_v19 = vpop.f32.mrf.mxu0 }
  0xf7   : > { %v1833_v20 = vpop.f32.mrf.mxu1 }
  0xf8   : > { %v1068_v23 = vadd.f32 %v1833_v20, %v1793_v3 }
  0xf9   : > { %v1873_v21 = vpop.f32.mrf.mxu0  ;;  %v1062_v22 = vpop.f32.mrf.mxu1 }
  0xfa   : > { %v1344_v24 = vadd.f32 %v1873_v21, %v1068_v23  ;;  %v1063_v25 = vadd.f32 %v1062_v22, %v869_v6 }
  0xfb   : > { %v1264_v26 = vpop.f32.mrf.mxu0  ;;  %v1836_v29 = vpop.f32.mrf.mxu1 }
  0xfc   : > { %vm1360_vm0 = vcmp.ge.f32.partialorder %v1344_v24, 0.0  ;;  %v1376_v15 = vmul.f32 0.01, %v1344_v24  ;;  %v1343_v30 = vadd.f32 %v1264_v26, %v1063_v25  ;;  %v1078_v32 = vadd.f32 %v1836_v29, %v1796_v5 }
  0xfd   : > { %v1876_v33 = vpop.f32.mrf.mxu0  ;;  %v1072_v35 = vpop.f32.mrf.mxu1 }
  0xfe   : > { %v1392_v37 = vsel %vm1360_vm0, %v1344_v24, %v1376_v15  ;;  %vm1359_vm1 = vcmp.ge.f32.partialorder %v1343_v30, 0.0  ;;  %v1375_v36 = vmul.f32 0.01, %v1343_v30  ;;  %v1346_v38 = vadd.f32 %v1876_v33, %v1078_v32 }
  0xff   : > { %1408 = vst [vmem:[%s2473_s5 + $0x8] sm:$0xff] %v1392_v37  ;;  %v1073_v39 = vadd.f32 %v1072_v35, %v879_v10  ;;  %v1274_v42 = vpop.f32.mrf.mxu0  ;;  %v1839_v31 = vpop.f32.mrf.mxu1  ;;  %v1446_v51 = vmul.f32 %v1392_v37, %v1392_v37 }
 0x100   : > { %v1391_v28 = vsel %vm1359_vm1, %v1343_v30, %v1375_v36  ;;  %vm1362_vm3 = vcmp.ge.f32.partialorder %v1346_v38, 0.0  ;;  %v1378_v43 = vmul.f32 0.01, %v1346_v38  ;;  %v1088_v12 = vadd.f32 %v1839_v31, %v1799_v7 }
 0x101   : > { %1407 = vst [vmem:[%s2473_s5] sm:$0xff] %v1391_v28  ;;  %v1445_v40 = vmul.f32 %v1391_v28, %v1391_v28  ;;  %v1345_v44 = vadd.f32 %v1274_v42, %v1073_v39  ;;  %v1879_v46 = vpop.f32.mrf.mxu0  ;;  %v1082_v47 = vpop.f32.mrf.mxu1  ;;  %v1423_v52 = vadd.f32 %v1392_v37, %v1391_v28 }
 0x102   : > { %v1394_v48 = vsel %vm1362_vm3, %v1346_v38, %v1378_v43  ;;  %v1348_v49 = vadd.f32 %v1879_v46, %v1088_v12  ;;  %v1083_v50 = vadd.f32 %v1082_v47, %v889_v14 }
 0x103   : > { %1410 = vst [vmem:[%s2473_s5 + $0x18] sm:$0xff] %v1394_v48  ;;  %vm1361_vm6 = vcmp.ge.f32.partialorder %v1345_v44, 0.0  ;;  %v1377_v53 = vmul.f32 0.01, %v1345_v44  ;;  %v1284_v55 = vpop.f32.mrf.mxu0  ;;  %v1842_v54 = vpop.f32.mrf.mxu1  ;;  %v1461_v56 = vadd.f32 %v1446_v51, %v1445_v40  ;;  %v1448_v6 = vmul.f32 %v1394_v48, %v1394_v48 }
 0x104   : > { %vm1364_vm7 = vcmp.ge.f32.partialorder %v1348_v49, 0.0  ;;  %v1380_v34 = vmul.f32 0.01, %v1348_v49  ;;  %v1347_v45 = vadd.f32 %v1284_v55, %v1083_v50  ;;  %v1098_v41 = vadd.f32 %v1842_v54, %v1802_v17 }
 0x105   : > { %v1393_v57 = vsel %vm1361_vm6, %v1345_v44, %v1377_v53  ;;  %v1882_v58 = vpop.f32.mrf.mxu0  ;;  %v1092_v27 = vpop.f32.mrf.mxu1 }
 0x106   : > { %1409 = vst [vmem:[%s2473_s5 + $0x10] sm:$0xff] %v1393_v57  ;;  %v1424_v59 = vadd.f32 %v1423_v52, %v1393_v57  ;;  %v1447_v61 = vmul.f32 %v1393_v57, %v1393_v57  ;;  %v1396_v62 = vsel %vm1364_vm7, %v1348_v49, %v1380_v34  ;;  %vm1363_vm8 = vcmp.ge.f32.partialorder %v1347_v45, 0.0 }
 0x107   : > { %1412 = vst [vmem:[%s2473_s5 + $0x28] sm:$0xff] %v1396_v62  ;;  %v1379_v63 = vmul.f32 0.01, %v1347_v45  ;;  %v1350_v0 = vadd.f32 %v1882_v58, %v1098_v41  ;;  %v1093_v60 = vadd.f32 %v1092_v27, %v899_v19  ;;  %v1294_v1 = vpop.f32.mrf.mxu0  ;;  %v1845_v3 = vpop.f32.mrf.mxu1  ;;  %v1450_v32 = vmul.f32 %v1396_v62, %v1396_v62 }
 0x108   : > { %v1462_v5 = vadd.f32 %v1461_v56, %v1447_v61  ;;  %v1425_v10 = vadd.f32 %v1424_v59, %v1394_v48  ;;  %v1108_v7 = vadd.f32 %v1845_v3, %v2452_v2 }
 0x109   : > { %v1395_v14 = vsel %vm1363_vm8, %v1347_v45, %v1379_v63  ;;  %vm1366_vm9 = vcmp.ge.f32.partialorder %v1350_v0, 0.0  ;;  %v1382_v17 = vmul.f32 0.01, %v1350_v0  ;;  %v1349_v20 = vadd.f32 %v1294_v1, %v1093_v60  ;;  %v1885_v23 = vpop.f32.mrf.mxu0  ;;  %v1102_v21 = vpop.f32.mrf.mxu1 }
 0x10a   : > { %1411 = vst [vmem:[%s2473_s5 + $0x20] sm:$0xff] %v1395_v14  ;;  %v1426_v22 = vadd.f32 %v1425_v10, %v1395_v14  ;;  %v1449_v24 = vmul.f32 %v1395_v14, %v1395_v14  ;;  %v1463_v25 = vadd.f32 %v1462_v5, %v1448_v6  ;;  %v1352_v26 = vadd.f32 %v1885_v23, %v1108_v7 }
 0x10b   : > { %v1398_v19 = vsel %vm1366_vm9, %v1350_v0, %v1382_v17  ;;  %vm1365_vm10 = vcmp.ge.f32.partialorder %v1349_v20, 0.0  ;;  %v1381_v29 = vmul.f32 0.01, %v1349_v20  ;;  %v1103_v15 = vadd.f32 %v1102_v21, %v2454_v4  ;;  %v1304_v30 = vpop.f32.mrf.mxu0  ;;  %v1848_v2 = vpop.f32.mrf.mxu1 }
 0x10c   : > { %v1464_v33 = vadd.f32 %v1463_v25, %v1449_v24  ;;  %1414 = vst [vmem:[%s2473_s5 + $0x38] sm:$0xff] %v1398_v19  ;;  %v1427_v35 = vadd.f32 %v1426_v22, %v1396_v62  ;;  %vm1368_vm11 = vcmp.ge.f32.partialorder %v1352_v26, 0.0  ;;  %v1384_v36 = vmul.f32 0.01, %v1352_v26 }
 0x10d   : > { %v1397_v37 = vsel %vm1365_vm10, %v1349_v20, %v1381_v29  ;;  %v1351_v38 = vadd.f32 %v1304_v30, %v1103_v15  ;;  %v1118_v39 = vadd.f32 %v1848_v2, %v2456_v8  ;;  %v1888_v42 = vpop.f32.mrf.mxu0  ;;  %v1112_v31 = vpop.f32.mrf.mxu1  ;;  %v1452_v49 = vmul.f32 %v1398_v19, %v1398_v19 }
 0x10e   : > { %1413 = vst [vmem:[%s2473_s5 + $0x30] sm:$0xff] %v1397_v37  ;;  %v1428_v28 = vadd.f32 %v1427_v35, %v1397_v37  ;;  %v1451_v43 = vmul.f32 %v1397_v37, %v1397_v37  ;;  %v1465_v12 = vadd.f32 %v1464_v33, %v1450_v32  ;;  %v1113_v4 = vadd.f32 %v1112_v31, %v2458_v9 }
 0x10f   : > { %v1400_v40 = vsel %vm1368_vm11, %v1352_v26, %v1384_v36  ;;  %vm1367_vm12 = vcmp.ge.f32.partialorder %v1351_v38, 0.0  ;;  %v1383_v44 = vmul.f32 0.01, %v1351_v38  ;;  %v1354_v46 = vadd.f32 %v1888_v42, %v1118_v39  ;;  %v1314_v47 = vpop.f32.mrf.mxu0  ;;  %v1851_v48 = vpop.f32.mrf.mxu1 }
 0x110   : > { %v1466_v50 = vadd.f32 %v1465_v12, %v1451_v43  ;;  %1416 = vst [vmem:[%s2473_s5 + $0x48] sm:$0xff] %v1400_v40  ;;  %v1429_v8 = vadd.f32 %v1428_v28, %v1398_v19  ;;  %v1353_v51 = vadd.f32 %v1314_v47, %v1113_v4  ;;  %v1128_v55 = vadd.f32 %v1851_v48, %v2460_v11 }
 0x111   : > { %v1399_v52 = vsel %vm1367_vm12, %v1351_v38, %v1383_v44  ;;  %vm1370_vm13 = vcmp.ge.f32.partialorder %v1354_v46, 0.0  ;;  %v1386_v53 = vmul.f32 0.01, %v1354_v46  ;;  %v1891_v54 = vpop.f32.mrf.mxu0  ;;  %v1122_v9 = vpop.f32.mrf.mxu1  ;;  %v1454_v62 = vmul.f32 %v1400_v40, %v1400_v40 }
 0x112   : > { %1415 = vst [vmem:[%s2473_s5 + $0x40] sm:$0xff] %v1399_v52  ;;  %v1430_v34 = vadd.f32 %v1429_v8, %v1399_v52  ;;  %v1453_v45 = vmul.f32 %v1399_v52, %v1399_v52  ;;  %v1467_v41 = vadd.f32 %v1466_v50, %v1452_v49  ;;  %vm1369_vm14 = vcmp.ge.f32.partialorder %v1353_v51, 0.0 }
 0x113   : > { %v1402_v56 = vsel %vm1370_vm13, %v1354_v46, %v1386_v53  ;;  %v1385_v57 = vmul.f32 0.01, %v1353_v51  ;;  %v1356_v58 = vadd.f32 %v1891_v54, %v1128_v55  ;;  %v1123_v27 = vadd.f32 %v1122_v9, %v2462_v13  ;;  %v1324_v59 = vpop.f32.mrf.mxu0  ;;  %v1854_v61 = vpop.f32.mrf.mxu1 }
 0x114   : > { %v1468_v63 = vadd.f32 %v1467_v41, %v1453_v45  ;;  %1418 = vst [vmem:[%s2473_s5 + $0x58] sm:$0xff] %v1402_v56  ;;  %v1431_v11 = vadd.f32 %v1430_v34, %v1400_v40  ;;  %v1138_v0 = vadd.f32 %v1854_v61, %v2464_v16  ;;  %v1456_v16 = vmul.f32 %v1402_v56, %v1402_v56 }
 0x115   : > { %v1401_v60 = vsel %vm1369_vm14, %v1353_v51, %v1385_v57  ;;  %vm1372_vm15 = vcmp.ge.f32.partialorder %v1356_v58, 0.0  ;;  %v1388_v1 = vmul.f32 0.01, %v1356_v58  ;;  %v1355_v3 = vadd.f32 %v1324_v59, %v1123_v27  ;;  %v1894_v6 = vpop.f32.mrf.mxu0  ;;  %v1132_v5 = vpop.f32.mrf.mxu1 }
 0x116   : > { %1417 = vst [vmem:[%s2473_s5 + $0x50] sm:$0xff] %v1401_v60  ;;  %v1432_v10 = vadd.f32 %v1431_v11, %v1401_v60  ;;  %v1455_v7 = vmul.f32 %v1401_v60, %v1401_v60  ;;  %v1469_v13 = vadd.f32 %v1468_v63, %v1454_v62  ;;  %v1358_v14 = vadd.f32 %v1894_v6, %v1138_v0 }
 0x117   : > { %v1404_v17 = vsel %vm1372_vm15, %v1356_v58, %v1388_v1  ;;  %vm1371_vm2 = vcmp.ge.f32.partialorder %v1355_v3, 0.0  ;;  %v1387_v20 = vmul.f32 0.01, %v1355_v3  ;;  %v1133_v23 = vadd.f32 %v1132_v5, %v2466_v18  ;;  %v1334_v24 = vpop.f32.mrf.mxu0 }
 0x118   : > { %v1470_v21 = vadd.f32 %v1469_v13, %v1455_v7  ;;  %1420 = vst [vmem:[%s2473_s5 + $0x68] sm:$0xff] %v1404_v17  ;;  %v1433_v22 = vadd.f32 %v1432_v10, %v1402_v56  ;;  %vm1374_vm4 = vcmp.ge.f32.partialorder %v1358_v14, 0.0  ;;  %v1390_v26 = vmul.f32 0.01, %v1358_v14 }
 0x119   : > { %v1403_v25 = vsel %vm1371_vm2, %v1355_v3, %v1387_v20  ;;  %v1357_v19 = vadd.f32 %v1334_v24, %v1133_v23  ;;  %v1458_v32 = vmul.f32 %v1404_v17, %v1404_v17 }
 0x11a   : > { %1419 = vst [vmem:[%s2473_s5 + $0x60] sm:$0xff] %v1403_v25  ;;  %v1434_v29 = vadd.f32 %v1433_v22, %v1403_v25  ;;  %v1457_v15 = vmul.f32 %v1403_v25, %v1403_v25  ;;  %v1471_v30 = vadd.f32 %v1470_v21, %v1456_v16  ;;  %v1406_v2 = vsel %vm1374_vm4, %v1358_v14, %v1390_v26 }
 0x11b   : > { %vm1373_vm5 = vcmp.ge.f32.partialorder %v1357_v19, 0.0  ;;  %v1389_v18 = vmul.f32 0.01, %v1357_v19  ;;  %1422 = vst [vmem:[%s2473_s5 + $0x78] sm:$0xff] %v1406_v2  ;;  %v1460_v42 = vmul.f32 %v1406_v2, %v1406_v2 }
 0x11c   : > { %v1472_v33 = vadd.f32 %v1471_v30, %v1457_v15  ;;  %v1435_v35 = vadd.f32 %v1434_v29, %v1404_v17 }
 0x11d   : > { %v1405_v37 = vsel %vm1373_vm5, %v1357_v19, %v1389_v18 }
 0x11e   : > { %1421 = vst [vmem:[%s2473_s5 + $0x70] sm:$0xff] %v1405_v37  ;;  %v1436_v36 = vadd.f32 %v1435_v35, %v1405_v37  ;;  %v1459_v38 = vmul.f32 %v1405_v37, %v1405_v37  ;;  %v1473_v39 = vadd.f32 %v1472_v33, %v1458_v32 }
 0x120   : > { %v1437_v31 = vadd.f32 %v1436_v36, %v1406_v2  ;;  %v1474_v28 = vadd.f32 %v1473_v39, %v1459_v38 }
 0x122   : > { %v1438_v43 = vrot.slane %v1437_v31, 4  ;;  %v1475_v12 = vadd.f32 %v1474_v28, %v1460_v42 }
 0x124   : > { %v1439_v4 = vadd.f32 %v1438_v43, %v1437_v31  ;;  %v1476_v40 = vrot.slane %v1475_v12, 4 }
 0x126   : > { %v1440_v44 = vrot.slane %v1439_v4, 2  ;;  %v1477_v46 = vadd.f32 %v1476_v40, %v1475_v12 }
 0x128   : > { %v1441_v47 = vadd.f32 %v1440_v44, %v1439_v4  ;;  %v1478_v48 = vrot.slane %v1477_v46, 2 }
 0x12a   : > { %v1442_v49 = vrot.slane %v1441_v47, 1  ;;  %v1479_v50 = vadd.f32 %v1478_v48, %v1477_v46 }
 0x12c   : > { %v1443_v8 = vadd.f32 %v1442_v49, %v1441_v47  ;;  %v1480_v51 = vrot.slane %v1479_v50, 1 }
 0x12e   : > { %1444 = vst [vmem:[%s260_s7] sm:$0x1] %v1443_v8  ;;  %v1481_v52 = vadd.f32 %v1480_v51, %v1479_v50 }
 0x130   : > { %1482 = vst [vmem:[%s260_s7 + $0x1] sm:$0x1] %v1481_v52 }
 0x131 PF: > { %s15_s19 = sadd.s32 1, %s1989_s19   ;;  %s2554_s15 = smov %s1981_s17 }
 0x132   : > { %p12_p8 = scmp.ge.s32.totalorder %s15_s19, 6   ;;  %s2555_s16 = smov %s1985_s18 }
 0x133   : > { %s2556_s17 = smov %s2559_s20  ;;  %s2557_s18 = smov %s2563_s21 }
 0x134   :  { %14 = sbr.rel (!%p12_p8) target bundleno = 3 (0x3), region = 76 }

// kernel: tile.53
= control target key start
LH: loop header
LB: loop body
LE: loop exit
PB: predicated region body
PF: predicated region fallthrough
CT: control target
= control target key end

     0   :  { %s28_s0 = inlined_call_operand.vmem [shape: f32[8], index: 0, kind: input, shape index: {}]   ;;  %s29_s1 = inlined_call_operand.vmem [shape: f32[16,8], index: 1, kind: output, shape index: {}]  }
   0x1   :  { %v4_v0 = vld [vmem:[%s28_s0] ss:$0 sm:$0xff] }
   0x2   :  { %5 = vst [vmem:[%s29_s1] sm:$0xff] %v4_v0  ;;  %8 = vst [vmem:[%s29_s1 + $0x8] sm:$0xff] %v4_v0 }

// kernel: mul.22
= control target key start
LH: loop header
LB: loop body
LE: loop exit
PB: predicated region body
PF: predicated region fallthrough
CT: control target
= control target key end

     0   :  { %s133_s10 = smov 120   ;;  %s134_s11 = smov 104   ;;  %vm3_vm0 = vcmask 64512   ;;  %vm9_vm1 = vcmask 1048512   ;;  %vm15_vm2 = vcmask 982912   ;;  %vm21_vm3 = vcmask 917312   ;;  %s209_s0 = inlined_call_operand.vmem [shape: f32[16,8], index: 0, kind: input, shape index: {}]   ;;  %s210_s1 = inlined_call_operand.vmem [shape: f32[128], index: 1, kind: output, shape index: {}]  }
   0x1   :  { %v103_v0 = vld [vmem:[%s209_s0 + $0xf] sm:$0x1]   ;;  %v105_v1 = vld [vmem:[%s209_s0 + $0xd] sm:$0x1]   ;;  %v104_v2 = vld [vmem:[%s209_s0 + $0xe] sm:$0x1]  }
   0x2   :  { %7 = vrot.lane.b32.xlu0 %v103_v0, %s133_s10  ;;  %19 = vrot.lane.b32.xlu1 %v105_v1, %s134_s11  ;;  %v106_v3 = vld [vmem:[%s209_s0 + $0xc] sm:$0x1]   ;;  %s135_s16 = smov 112   ;;  %s136_s17 = smov 96   ;;  %v107_v4 = vld [vmem:[%s209_s0 + $0xb] sm:$0x1]  }
   0x3   :  { %v108_v5 = vld [vmem:[%s209_s0 + $0xa] sm:$0x1]   ;;  %v2_v6 = vld [vmem:[%s209_s0] sm:$0x1]   ;;  %s137_s24 = smov 88   ;;  %s138_s25 = smov 80  }
   0x4   :  { %4 = vst.msk [vmem:[#allocation0] sm:$0x1] %vm3_vm0, %v2_v6   ;;  %v109_v7 = vld [vmem:[%s209_s0 + $0x9] sm:$0x1]   ;;  %v110_v8 = vld [vmem:[%s209_s0 + $0x8] sm:$0x1]  }
   0x5   :  { %s139_s30 = smov 72   ;;  %s140_s2 = smov 64   ;;  %v111_v9 = vld [vmem:[%s209_s0 + $0x7] sm:$0x1]   ;;  %v112_v10 = vld [vmem:[%s209_s0 + $0x6] sm:$0x1]  }
   0x6   :  { %13 = vrot.lane.b32.xlu0 %v104_v2, %s135_s16  ;;  %25 = vrot.lane.b32.xlu1 %v106_v3, %s136_s17  ;;  %s141_s7 = smov 56   ;;  %s142_s8 = smov 48   ;;  %v113_v11 = vld [vmem:[%s209_s0 + $0x5] sm:$0x1]   ;;  %v114_v12 = vld [vmem:[%s209_s0 + $0x4] sm:$0x1]  }
   0x7   :  { %s143_s13 = smov 40   ;;  %s144_s14 = smov 32   ;;  %v115_v13 = vld [vmem:[%s209_s0 + $0x3] sm:$0x1]   ;;  %v116_v14 = vld [vmem:[%s209_s0 + $0x2] sm:$0x1]  }
   0x8   :  { %s145_s19 = smov 24   ;;  %s146_s20 = smov 16   ;;  %v117_v15 = vld [vmem:[%s209_s0 + $0x1] sm:$0x1]   ;;  %vm27_vm4 = vcmask 851712   ;;  %vm33_vm5 = vcmask 786112  }
   0x9   :  { %s147_s0 = smov 8   ;;  %vm39_vm6 = vcmask 720512   ;;  %vm45_vm7 = vcmask 654912   ;;  %vm51_vm8 = vcmask 589312   ;;  %vm57_vm9 = vcmask 523712  }
   0xa   :  { %31 = vrot.lane.b32.xlu0 %v107_v4, %s137_s24  ;;  %37 = vrot.lane.b32.xlu1 %v108_v5, %s138_s25  ;;  %vm63_vm10 = vcmask 458112   ;;  %vm69_vm11 = vcmask 392512   ;;  %vm75_vm12 = vcmask 326912   ;;  %vm81_vm13 = vcmask 261312  }
   0xb   :  { %vm87_vm14 = vcmask 195712   ;;  %vm93_vm15 = vcmask 130112  }
   0xe   :  { %43 = vrot.lane.b32.xlu0 %v109_v7, %s139_s30  ;;  %49 = vrot.lane.b32.xlu1 %v110_v8, %s140_s2 }
  0x12   :  { %55 = vrot.lane.b32.xlu0 %v111_v9, %s141_s7  ;;  %61 = vrot.lane.b32.xlu1 %v112_v10, %s142_s8 }
  0x16   :  { %67 = vrot.lane.b32.xlu0 %v113_v11, %s143_s13  ;;  %73 = vrot.lane.b32.xlu1 %v114_v12, %s144_s14 }
  0x1a   :  { %79 = vrot.lane.b32.xlu0 %v115_v13, %s145_s19  ;;  %85 = vrot.lane.b32.xlu1 %v116_v14, %s146_s20 }
  0x1e   :  { %91 = vrot.lane.b32.xlu0 %v117_v15, %s147_s0 }
  0x74   :  { %v8_v16 = vpop.permute.xlu0 %7   ;;  %v20_v17 = vpop.permute.xlu1 %19  }
  0x75   :  { %10 = vst.msk [vmem:[#allocation0] sm:$0x1] %vm9_vm1, %v8_v16  }
  0x78   :  { %v14_v18 = vpop.permute.xlu0 %13   ;;  %v26_v19 = vpop.permute.xlu1 %25  }
  0x79   :  { %16 = vst.msk [vmem:[#allocation0] sm:$0x1] %vm15_vm2, %v14_v18  }
  0x7a   :  { %22 = vst.msk [vmem:[#allocation0] sm:$0x1] %vm21_vm3, %v20_v17  }
  0x7b   :  { %28 = vst.msk [vmem:[#allocation0] sm:$0x1] %vm27_vm4, %v26_v19  }
  0x7c   :  { %v32_v20 = vpop.permute.xlu0 %31   ;;  %v38_v21 = vpop.permute.xlu1 %37  }
  0x7d   :  { %34 = vst.msk [vmem:[#allocation0] sm:$0x1] %vm33_vm5, %v32_v20  }
  0x7e   :  { %40 = vst.msk [vmem:[#allocation0] sm:$0x1] %vm39_vm6, %v38_v21  }
  0x80   :  { %v44_v22 = vpop.permute.xlu0 %43   ;;  %v50_v23 = vpop.permute.xlu1 %49  }
  0x81   :  { %46 = vst.msk [vmem:[#allocation0] sm:$0x1] %vm45_vm7, %v44_v22  }
  0x82   :  { %52 = vst.msk [vmem:[#allocation0] sm:$0x1] %vm51_vm8, %v50_v23  }
  0x84   :  { %v56_v24 = vpop.permute.xlu0 %55   ;;  %v62_v25 = vpop.permute.xlu1 %61  }
  0x85   :  { %58 = vst.msk [vmem:[#allocation0] sm:$0x1] %vm57_vm9, %v56_v24  }
  0x86   :  { %64 = vst.msk [vmem:[#allocation0] sm:$0x1] %vm63_vm10, %v62_v25  }
  0x88   :  { %v68_v26 = vpop.permute.xlu0 %67   ;;  %v74_v27 = vpop.permute.xlu1 %73  }
  0x89   :  { %70 = vst.msk [vmem:[#allocation0] sm:$0x1] %vm69_vm11, %v68_v26  }
  0x8a   :  { %76 = vst.msk [vmem:[#allocation0] sm:$0x1] %vm75_vm12, %v74_v27  }
  0x8c   :  { %v80_v28 = vpop.permute.xlu0 %79   ;;  %v86_v29 = vpop.permute.xlu1 %85  }
  0x8d   :  { %82 = vst.msk [vmem:[#allocation0] sm:$0x1] %vm81_vm13, %v80_v28  }
  0x8e   :  { %88 = vst.msk [vmem:[#allocation0] sm:$0x1] %vm87_vm14, %v86_v29  }
  0x90   :  { %v92_v30 = vpop.permute.xlu0 %91  }
  0x91   :  { %94 = vst.msk [vmem:[#allocation0] sm:$0x1] %vm93_vm15, %v92_v30  }
  0x98   :  { %v99_v31 = vld [vmem:[#allocation0] sm:$0x1] }
  0x99   :  { %102 = vst [vmem:[%s210_s1] sm:$0x1] %v99_v31 }

// kernel: tile.59
= control target key start
LH: loop header
LB: loop body
LE: loop exit
PB: predicated region body
PF: predicated region fallthrough
CT: control target
= control target key end

     0   :  { %s133_s10 = smov 120   ;;  %s134_s11 = smov 104   ;;  %vm3_vm0 = vcmask 64512   ;;  %vm9_vm1 = vcmask 1048512   ;;  %vm15_vm2 = vcmask 982912   ;;  %vm21_vm3 = vcmask 917312   ;;  %s209_s0 = inlined_call_operand.vmem [shape: f32[16,8], index: 0, kind: input, shape index: {}]   ;;  %s210_s1 = inlined_call_operand.vmem [shape: f32[1,128], index: 1, kind: output, shape index: {}]  }
   0x1   :  { %v103_v0 = vld [vmem:[%s209_s0 + $0xf] sm:$0x1]   ;;  %v105_v1 = vld [vmem:[%s209_s0 + $0xd] sm:$0x1]   ;;  %v104_v2 = vld [vmem:[%s209_s0 + $0xe] sm:$0x1]  }
   0x2   :  { %7 = vrot.lane.b32.xlu0 %v103_v0, %s133_s10  ;;  %19 = vrot.lane.b32.xlu1 %v105_v1, %s134_s11  ;;  %v106_v3 = vld [vmem:[%s209_s0 + $0xc] sm:$0x1]   ;;  %s135_s16 = smov 112   ;;  %s136_s17 = smov 96   ;;  %v107_v4 = vld [vmem:[%s209_s0 + $0xb] sm:$0x1]  }
   0x3   :  { %v108_v5 = vld [vmem:[%s209_s0 + $0xa] sm:$0x1]   ;;  %v2_v6 = vld [vmem:[%s209_s0] sm:$0x1]   ;;  %s137_s24 = smov 88   ;;  %s138_s25 = smov 80  }
   0x4   :  { %4 = vst.msk [vmem:[#allocation0] sm:$0x1] %vm3_vm0, %v2_v6   ;;  %v109_v7 = vld [vmem:[%s209_s0 + $0x9] sm:$0x1]   ;;  %v110_v8 = vld [vmem:[%s209_s0 + $0x8] sm:$0x1]  }
   0x5   :  { %s139_s30 = smov 72   ;;  %s140_s2 = smov 64   ;;  %v111_v9 = vld [vmem:[%s209_s0 + $0x7] sm:$0x1]   ;;  %v112_v10 = vld [vmem:[%s209_s0 + $0x6] sm:$0x1]  }
   0x6   :  { %13 = vrot.lane.b32.xlu0 %v104_v2, %s135_s16  ;;  %25 = vrot.lane.b32.xlu1 %v106_v3, %s136_s17  ;;  %s141_s7 = smov 56   ;;  %s142_s8 = smov 48   ;;  %v113_v11 = vld [vmem:[%s209_s0 + $0x5] sm:$0x1]   ;;  %v114_v12 = vld [vmem:[%s209_s0 + $0x4] sm:$0x1]  }
   0x7   :  { %s143_s13 = smov 40   ;;  %s144_s14 = smov 32   ;;  %v115_v13 = vld [vmem:[%s209_s0 + $0x3] sm:$0x1]   ;;  %v116_v14 = vld [vmem:[%s209_s0 + $0x2] sm:$0x1]  }
   0x8   :  { %s145_s19 = smov 24   ;;  %s146_s20 = smov 16   ;;  %v117_v15 = vld [vmem:[%s209_s0 + $0x1] sm:$0x1]   ;;  %vm27_vm4 = vcmask 851712   ;;  %vm33_vm5 = vcmask 786112  }
   0x9   :  { %s147_s0 = smov 8   ;;  %vm39_vm6 = vcmask 720512   ;;  %vm45_vm7 = vcmask 654912   ;;  %vm51_vm8 = vcmask 589312   ;;  %vm57_vm9 = vcmask 523712  }
   0xa   :  { %31 = vrot.lane.b32.xlu0 %v107_v4, %s137_s24  ;;  %37 = vrot.lane.b32.xlu1 %v108_v5, %s138_s25  ;;  %vm63_vm10 = vcmask 458112   ;;  %vm69_vm11 = vcmask 392512   ;;  %vm75_vm12 = vcmask 326912   ;;  %vm81_vm13 = vcmask 261312  }
   0xb   :  { %vm87_vm14 = vcmask 195712   ;;  %vm93_vm15 = vcmask 130112  }
   0xe   :  { %43 = vrot.lane.b32.xlu0 %v109_v7, %s139_s30  ;;  %49 = vrot.lane.b32.xlu1 %v110_v8, %s140_s2 }
  0x12   :  { %55 = vrot.lane.b32.xlu0 %v111_v9, %s141_s7  ;;  %61 = vrot.lane.b32.xlu1 %v112_v10, %s142_s8 }
  0x16   :  { %67 = vrot.lane.b32.xlu0 %v113_v11, %s143_s13  ;;  %73 = vrot.lane.b32.xlu1 %v114_v12, %s144_s14 }
  0x1a   :  { %79 = vrot.lane.b32.xlu0 %v115_v13, %s145_s19  ;;  %85 = vrot.lane.b32.xlu1 %v116_v14, %s146_s20 }
  0x1e   :  { %91 = vrot.lane.b32.xlu0 %v117_v15, %s147_s0 }
  0x74   :  { %v8_v16 = vpop.permute.xlu0 %7   ;;  %v20_v17 = vpop.permute.xlu1 %19  }
  0x75   :  { %10 = vst.msk [vmem:[#allocation0] sm:$0x1] %vm9_vm1, %v8_v16  }
  0x78   :  { %v14_v18 = vpop.permute.xlu0 %13   ;;  %v26_v19 = vpop.permute.xlu1 %25  }
  0x79   :  { %16 = vst.msk [vmem:[#allocation0] sm:$0x1] %vm15_vm2, %v14_v18  }
  0x7a   :  { %22 = vst.msk [vmem:[#allocation0] sm:$0x1] %vm21_vm3, %v20_v17  }
  0x7b   :  { %28 = vst.msk [vmem:[#allocation0] sm:$0x1] %vm27_vm4, %v26_v19  }
  0x7c   :  { %v32_v20 = vpop.permute.xlu0 %31   ;;  %v38_v21 = vpop.permute.xlu1 %37  }
  0x7d   :  { %34 = vst.msk [vmem:[#allocation0] sm:$0x1] %vm33_vm5, %v32_v20  }
  0x7e   :  { %40 = vst.msk [vmem:[#allocation0] sm:$0x1] %vm39_vm6, %v38_v21  }
  0x80   :  { %v44_v22 = vpop.permute.xlu0 %43   ;;  %v50_v23 = vpop.permute.xlu1 %49  }
  0x81   :  { %46 = vst.msk [vmem:[#allocation0] sm:$0x1] %vm45_vm7, %v44_v22  }
  0x82   :  { %52 = vst.msk [vmem:[#allocation0] sm:$0x1] %vm51_vm8, %v50_v23  }
  0x84   :  { %v56_v24 = vpop.permute.xlu0 %55   ;;  %v62_v25 = vpop.permute.xlu1 %61  }
  0x85   :  { %58 = vst.msk [vmem:[#allocation0] sm:$0x1] %vm57_vm9, %v56_v24  }
  0x86   :  { %64 = vst.msk [vmem:[#allocation0] sm:$0x1] %vm63_vm10, %v62_v25  }
  0x88   :  { %v68_v26 = vpop.permute.xlu0 %67   ;;  %v74_v27 = vpop.permute.xlu1 %73  }
  0x89   :  { %70 = vst.msk [vmem:[#allocation0] sm:$0x1] %vm69_vm11, %v68_v26  }
  0x8a   :  { %76 = vst.msk [vmem:[#allocation0] sm:$0x1] %vm75_vm12, %v74_v27  }
  0x8c   :  { %v80_v28 = vpop.permute.xlu0 %79   ;;  %v86_v29 = vpop.permute.xlu1 %85  }
  0x8d   :  { %82 = vst.msk [vmem:[#allocation0] sm:$0x1] %vm81_vm13, %v80_v28  }
  0x8e   :  { %88 = vst.msk [vmem:[#allocation0] sm:$0x1] %vm87_vm14, %v86_v29  }
  0x90   :  { %v92_v30 = vpop.permute.xlu0 %91  }
  0x91   :  { %94 = vst.msk [vmem:[#allocation0] sm:$0x1] %vm93_vm15, %v92_v30  }
  0x98   :  { %v99_v31 = vld [vmem:[#allocation0] sm:$0x1] }
  0x99   :  { %102 = vst [vmem:[%s210_s1] sm:$0x1] %v99_v31 }

// kernel: res_context_block.6
= control target key start
LH: loop header
LB: loop body
LE: loop exit
PB: predicated region body
PF: predicated region fallthrough
CT: control target
= control target key end

     0   :  { %s1690_s15 = smov 0   ;;  %s1692_s16 = smov 0   ;;  %s2110_s0 = inlined_call_operand.vmem [shape: f32[2,16,16,128], index: 0, kind: input, shape index: {}]   ;;  %s2111_s1 = inlined_call_operand.vmem [shape: f32[1,128], index: 1, kind: input, shape index: {}]   ;;  %s2112_s2 = inlined_call_operand.vmem [shape: f32[3,128,128], index: 2, kind: input, shape index: {}]   ;;  %s2113_s3 = inlined_call_operand.vmem [shape: f32[2,16,16,128], index: 3, kind: output, shape index: {0}]   ;;  %s2114_s4 = inlined_call_operand.vmem [shape: f32[4,2,128], index: 4, kind: output, shape index: {1}]  }
   0x1   :  { %s1694_s17 = smov 0   ;;  %s1696_s18 = smov 0  }
   0x2   :  { %s1698_s19 = smov 0   ;;  %s1700_s20 = smov 0  }
   0x3   :  { %s1702_s21 = smov 0  }
   0x4 LB: > { %s24_s22 = sadd.s32 1, %s1654_s19  ;;  %s27_s23 = sadd.s32 1, %s1658_s20  ;;  %s1662_s21 = sphi %s1702_s21, %s15_s21   ;;  %s1658_s20 = sphi %s1700_s20, %s2121_s20   ;;  %s1654_s19 = sphi %s1698_s19, %s2120_s19   ;;  %s1650_s18 = sphi %s1696_s18, %s2119_s18   ;;  %s1646_s17 = sphi %s1694_s17, %s2118_s17   ;;  %s1642_s16 = sphi %s1692_s16, %s2117_s16   ;;  %s1638_s15 = sphi %s1690_s15, %s2116_s15  }
   0x5   : > { %p25_p0 = scmp.ge.s32.totalorder %s24_s22, 2  ;;  %s1203_s24 = sadd.s32 4294967295, %s1662_s21  }
   0x6   : > { %p43_p1 = scmp.ne.s32.totalorder %s1642_s16, %s1638_s15  ;;  %p44_p2 = scmp.eq.s32.totalorder %s1662_s21, 0 }
   0x7   : > { %s2123_s22 = smov (%p25_p0, %s24_s22), 0  ;;  %s2125_s23 = smov (!%p25_p0, %s27_s23), %s1658_s20 }
   0x8   : > { %p29_p3 = scmp.ge.s32.totalorder %s2125_s23, 2  ;;  %p117_p4 = scmp.eq.s32.totalorder %s1203_s24, 3 }
   0x9   : > { %s32_s25 = ssub.s32 %s1654_s19, %s2123_s22  ;;  %p45_p5 = por %p44_p2, %p43_p1 }
   0xa   : > { %s2127_s23 = smov (%p29_p3, %s2125_s23), 0  ;;  %p1738_p6 = por %p117_p4, %p43_p1 }
   0xb   : > { %s31_s27 = ssub.s32 %s1658_s20, %s2127_s23  ;;  %s36_s29 = sadd.s32 1, %s1642_s16 }
   0xc   : > { %s33_s28 = sor.u32 %s32_s25, %s31_s27  ;;  %p1208_p8 = scmp.ge.s32.totalorder %s1662_s21, 4 }
   0xd   : > { %p34_p7 = scmp.eq.s32.totalorder %s33_s28, 0 }
   0xe   : > { %175 = sbr.rel (%p1208_p8) target bundleno = 33 (0x21), region = 24 }
   0xf   : > { %s1746_s30 = scalar_select %p34_p7, %s1642_s16, %s36_s29  }
  0x13   : > { %178 = sbr.rel (!%p45_p5) target bundleno = 33 (0x21), region = 28  ;;  %s180_s5 = sand.u32 (%p45_p5), 1, %s1642_s16  }
  0x14   : > { %s1210_s6 = sshll.u32 (%p45_p5), %s1658_s20, 5  ;;  %s1209_s7 = sshll.u32 (%p45_p5), %s180_s5, 7 }
  0x15   : > { %s184_s8 = sadd.s32 (%p45_p5), %s1654_s19, %s1210_s6  ;;  %s182_s13 = scalar_lea.vmem (%p45_p5), [#allocation2], %s1209_s7 }
  0x16   : > { %s1211_s9 = sshll.u32 (%p45_p5), %s184_s8, 3 }
  0x17   : > { %s1755_s12 = scalar_lea.vmem (%p45_p5), %s2110_s0, %s1211_s9 }
  0x18   : > { %v245_v0 = vld [vmem:[%s1755_s12] sm:$0xff]  ;;  %v247_v1 = vld [vmem:[%s1755_s12 + $0x10] sm:$0xff] }
  0x19   : > { %v249_v2 = vld [vmem:[%s1755_s12 + $0x20] sm:$0xff]  ;;  %246 = vst [vmem:[%s182_s13] sm:$0xff] %v245_v0  ;;  %248 = vst [vmem:[%s182_s13 + $0x8] sm:$0xff] %v247_v1  ;;  %v251_v3 = vld [vmem:[%s1755_s12 + $0x30] sm:$0xff] }
  0x1a   : > { %250 = vst [vmem:[%s182_s13 + $0x10] sm:$0xff] %v249_v2  ;;  %v253_v4 = vld [vmem:[%s1755_s12 + $0x40] sm:$0xff]  ;;  %v255_v5 = vld [vmem:[%s1755_s12 + $0x50] sm:$0xff]  ;;  %252 = vst [vmem:[%s182_s13 + $0x18] sm:$0xff] %v251_v3 }
  0x1b   : > { %254 = vst [vmem:[%s182_s13 + $0x20] sm:$0xff] %v253_v4  ;;  %256 = vst [vmem:[%s182_s13 + $0x28] sm:$0xff] %v255_v5  ;;  %v257_v6 = vld [vmem:[%s1755_s12 + $0x60] sm:$0xff]  ;;  %v259_v7 = vld [vmem:[%s1755_s12 + $0x70] sm:$0xff] }
  0x1c   : > { %v261_v8 = vld [vmem:[%s1755_s12 + $0x80] sm:$0xff]  ;;  %258 = vst [vmem:[%s182_s13 + $0x30] sm:$0xff] %v257_v6  ;;  %260 = vst [vmem:[%s182_s13 + $0x38] sm:$0xff] %v259_v7  ;;  %v263_v9 = vld [vmem:[%s1755_s12 + $0x90] sm:$0xff] }
  0x1d   : > { %262 = vst [vmem:[%s182_s13 + $0x40] sm:$0xff] %v261_v8  ;;  %v265_v10 = vld [vmem:[%s1755_s12 + $0xa0] sm:$0xff]  ;;  %v267_v11 = vld [vmem:[%s1755_s12 + $0xb0] sm:$0xff]  ;;  %264 = vst [vmem:[%s182_s13 + $0x48] sm:$0xff] %v263_v9 }
  0x1e   : > { %266 = vst [vmem:[%s182_s13 + $0x50] sm:$0xff] %v265_v10  ;;  %268 = vst [vmem:[%s182_s13 + $0x58] sm:$0xff] %v267_v11  ;;  %v269_v12 = vld [vmem:[%s1755_s12 + $0xc0] sm:$0xff]  ;;  %v271_v13 = vld [vmem:[%s1755_s12 + $0xd0] sm:$0xff] }
  0x1f   : > { %v273_v14 = vld [vmem:[%s1755_s12 + $0xe0] sm:$0xff]  ;;  %270 = vst [vmem:[%s182_s13 + $0x60] sm:$0xff] %v269_v12  ;;  %272 = vst [vmem:[%s182_s13 + $0x68] sm:$0xff] %v271_v13  ;;  %v275_v15 = vld [vmem:[%s1755_s12 + $0xf0] sm:$0xff] }
  0x20   : > { %274 = vst [vmem:[%s182_s13 + $0x70] sm:$0xff] %v273_v14  ;;  %276 = vst [vmem:[%s182_s13 + $0x78] sm:$0xff] %v275_v15 }
  0x21 PF: > { %p1212_p9 = scmp.ge.s32.totalorder %s1662_s21, 1  ;;  %p281_p10 = scmp.lt.s32.totalorder %s1662_s21, 5 }
  0x23   : > { %p282_p11 = pnand %p1212_p9, %p281_p10 }
  0x24   : > { %s288_s9 = sand.u32 (!%p282_p11), 1, %s1638_s15  }
  0x25   : > { %285 = sbr.rel (%p282_p11) target bundleno = 376 (0x178), region = 66  ;;  %s1842_s14 = sshll.u32 (!%p282_p11), %s288_s9, 7 }
  0x26   : > { %s1863_s11 = scalar_lea.vmem (!%p282_p11), [#allocation2], %s1842_s14  ;;  %s2022_s10 = scalar_lea.vmem (!%p282_p11), [#allocation3], %s1842_s14 }
  0x27   : > { %s1215_s14 = sshll.u32 (!%p282_p11), %s1650_s18, 1 }
  0x28   : > { %s319_s12 = sadd.s32 (!%p282_p11), %s1646_s17, %s1215_s14 }
  0x29   : > { %p320_p12 = scmp.lt.s32.totalorder (!%p282_p11), %s319_s12, 3 }
  0x2a   : > { %v1233_v16 = vld [vmem:[%s2112_s2 + $0xf8] sm:$0xff]  ;;  %v1232_v18 = vld [vmem:[%s2112_s2 + $0xf0] sm:$0xff]  ;;  %v1231_v20 = vld [vmem:[%s2112_s2 + $0xe8] sm:$0xff]  ;;  %v1664_v55 = vmov 0.0   ;;  %s1251_s27 = sshll.u32 (%p1738_p6), %s1650_s18, 5 }
  0x2b   : > { %v380_v17 = vld [vmem:[%s2112_s2 + $0x78] sm:$0xff]  ;;  %1351 = vmatprep.subr.mxu0 %v1233_v16  ;;  %v379_v19 = vld [vmem:[%s2112_s2 + $0x70] sm:$0xff]  ;;  %v378_v21 = vld [vmem:[%s2112_s2 + $0x68] sm:$0xff]  ;;  %1439 = vmatprep.mubr.f32.mxu1 %v1664_v55  ;;  %s2129_s12 = smov (!%p320_p12, %s319_s12), 3  ;;  %s1004_s26 = sadd.s32 (%p1738_p6), %s1646_s17, %s1251_s27 }
  0x2c   : > { %1407 = vmatprep.subr.mxu1 %v380_v17  ;;  %1352 = vmatpush3.msra.mxu0 %v1233_v16  ;;  %v1230_v22 = vld [vmem:[%s2112_s2 + $0xe0] sm:$0xff]  ;;  %v1229_v24 = vld [vmem:[%s2112_s2 + $0xd8] sm:$0xff]  ;;  %v1228_v26 = vld [vmem:[%s2112_s2 + $0xd0] sm:$0xff]  ;;  %s1216_s13 = sshll.u32 %s2129_s12, 1  ;;  %s1252_s28 = sshll.u32 (%p1738_p6), %s1004_s26, 3 }
  0x2d   : > { %1408 = vmatpush3.msra.mxu1 %v380_v17  ;;  %1353 = vmatprep.subr.mxu0 %v1232_v18  ;;  %v377_v23 = vld [vmem:[%s2112_s2 + $0x60] sm:$0xff]  ;;  %v376_v25 = vld [vmem:[%s2112_s2 + $0x58] sm:$0xff]  ;;  %v375_v27 = vld [vmem:[%s2112_s2 + $0x50] sm:$0xff]  ;;  %s323_s25 = scalar_lea.vmem %s2114_s4, %s1216_s13  ;;  %s1006_s6 = scalar_lea.vmem (%p1738_p6), %s2113_s3, %s1252_s28 }
  0x2e   : > { %1409 = vmatprep.subr.mxu1 %v379_v19  ;;  %1354 = vmatpush3.msra.mxu0 %v1232_v18  ;;  %v1227_v28 = vld [vmem:[%s2112_s2 + $0xc8] sm:$0xff]  ;;  %v1226_v30 = vld [vmem:[%s2112_s2 + $0xc0] sm:$0xff]  ;;  %v1225_v32 = vld [vmem:[%s2112_s2 + $0xb8] sm:$0xff] }
  0x2f   : > { %1410 = vmatpush3.msra.mxu1 %v379_v19  ;;  %1355 = vmatprep.subr.mxu0 %v1231_v20  ;;  %v374_v29 = vld [vmem:[%s2112_s2 + $0x48] sm:$0xff]  ;;  %v373_v31 = vld [vmem:[%s2112_s2 + $0x40] sm:$0xff]  ;;  %v372_v33 = vld [vmem:[%s2112_s2 + $0x38] sm:$0xff] }
  0x30   : > { %1411 = vmatprep.subr.mxu1 %v378_v21  ;;  %1356 = vmatpush3.msra.mxu0 %v1231_v20  ;;  %v1224_v34 = vld [vmem:[%s2112_s2 + $0xb0] sm:$0xff]  ;;  %v1223_v36 = vld [vmem:[%s2112_s2 + $0xa8] sm:$0xff]  ;;  %v1222_v38 = vld [vmem:[%s2112_s2 + $0xa0] sm:$0xff] }
  0x31   : > { %1412 = vmatpush3.msra.mxu1 %v378_v21  ;;  %1357 = vmatprep.subr.mxu0 %v1230_v22  ;;  %v371_v35 = vld [vmem:[%s2112_s2 + $0x30] sm:$0xff]  ;;  %v370_v37 = vld [vmem:[%s2112_s2 + $0x28] sm:$0xff]  ;;  %v369_v39 = vld [vmem:[%s2112_s2 + $0x20] sm:$0xff] }
  0x32   : > { %1413 = vmatprep.subr.mxu1 %v377_v23  ;;  %1358 = vmatpush3.msra.mxu0 %v1230_v22  ;;  %v1221_v40 = vld [vmem:[%s2112_s2 + $0x98] sm:$0xff]  ;;  %v1220_v42 = vld [vmem:[%s2112_s2 + $0x90] sm:$0xff]  ;;  %v326_v44 = vld [vmem:[%s1863_s11] sm:$0xff] }
  0x33   : > { %1414 = vmatpush3.msra.mxu1 %v377_v23  ;;  %1359 = vmatprep.subr.mxu0 %v1229_v24  ;;  %v368_v41 = vld [vmem:[%s2112_s2 + $0x18] sm:$0xff]  ;;  %v367_v43 = vld [vmem:[%s2112_s2 + $0x10] sm:$0xff]  ;;  %v1869_v45 = vld [vmem:[%s2111_s1] ss:$0 sm:$0xff] }
  0x34   : > { %1415 = vmatprep.subr.mxu1 %v376_v25  ;;  %1360 = vmatpush3.msra.mxu0 %v1229_v24  ;;  %v1219_v46 = vld [vmem:[%s2112_s2 + $0x88] sm:$0xff]  ;;  %v1218_v49 = vld [vmem:[%s2112_s2 + $0x80] sm:$0xff]  ;;  %v349_v51 = vsub.f32 %v326_v44, %v1869_v45  ;;  %v328_v53 = vld [vmem:[%s1863_s11 + $0x10] sm:$0xff] }
  0x35   : > { %1416 = vmatpush3.msra.mxu1 %v376_v25  ;;  %1361 = vmatprep.subr.mxu0 %v1228_v26  ;;  %v366_v47 = vld [vmem:[%s2112_s2 + $0x8] sm:$0xff]  ;;  %v365_v50 = vld [vmem:[%s2112_s2] sm:$0xff]  ;;  %v1249_v54 = vld [vmem:[%s2112_s2 + $0x178] sm:$0xff]  ;;  %v1899_v58 = vsub.f32 %v328_v53, %v1869_v45 }
  0x36   : > { %1417 = vmatprep.subr.mxu1 %v375_v27  ;;  %1362 = vmatpush3.msra.mxu0 %v1228_v26  ;;  %v327_v48 = vld [vmem:[%s1863_s11 + $0x8] sm:$0xff]  ;;  %v329_v56 = vld [vmem:[%s1863_s11 + $0x18] sm:$0xff]  ;;  %v1248_v57 = vld [vmem:[%s2112_s2 + $0x170] sm:$0xff] }
  0x37   : > { %1418 = vmatpush3.msra.mxu1 %v375_v27  ;;  %1363 = vmatprep.subr.mxu0 %v1227_v28  ;;  %v1886_v52 = vsub.f32 %v327_v48, %v1869_v45  ;;  %v1902_v59 = vsub.f32 %v329_v56, %v1869_v45  ;;  %v330_v60 = vld [vmem:[%s1863_s11 + $0x20] sm:$0xff]  ;;  %v1247_v61 = vld [vmem:[%s2112_s2 + $0x168] sm:$0xff]  ;;  %v332_v2 = vld [vmem:[%s1863_s11 + $0x30] sm:$0xff] }
  0x38   : > { %1419 = vmatprep.subr.mxu1 %v374_v29  ;;  %1364 = vmatpush3.msra.mxu0 %v1227_v28  ;;  %v331_v62 = vld [vmem:[%s1863_s11 + $0x28] sm:$0xff]  ;;  %v1246_v63 = vld [vmem:[%s2112_s2 + $0x160] sm:$0xff]  ;;  %v1917_v0 = vsub.f32 %v330_v60, %v1869_v45  ;;  %v1245_v3 = vld [vmem:[%s2112_s2 + $0x158] sm:$0xff]  ;;  %v1935_v6 = vsub.f32 %v332_v2, %v1869_v45 }
  0x39   : > { %1420 = vmatpush3.msra.mxu1 %v374_v29  ;;  %1365 = vmatprep.subr.mxu0 %v1226_v30  ;;  %v1920_v1 = vsub.f32 %v331_v62, %v1869_v45  ;;  %v333_v4 = vld [vmem:[%s1863_s11 + $0x38] sm:$0xff]  ;;  %v1244_v5 = vld [vmem:[%s2112_s2 + $0x150] sm:$0xff]  ;;  %v334_v8 = vld [vmem:[%s1863_s11 + $0x40] sm:$0xff] }
  0x3a   : > { %1421 = vmatprep.subr.mxu1 %v373_v31  ;;  %1366 = vmatpush3.msra.mxu0 %v1226_v30  ;;  %v1938_v7 = vsub.f32 %v333_v4, %v1869_v45  ;;  %v1243_v9 = vld [vmem:[%s2112_s2 + $0x148] sm:$0xff]  ;;  %v1242_v11 = vld [vmem:[%s2112_s2 + $0x140] sm:$0xff]  ;;  %v1953_v12 = vsub.f32 %v334_v8, %v1869_v45  ;;  %v336_v14 = vld [vmem:[%s1863_s11 + $0x50] sm:$0xff] }
  0x3b   : > { %1422 = vmatpush3.msra.mxu1 %v373_v31  ;;  %1367 = vmatprep.subr.mxu0 %v1225_v32  ;;  %v335_v10 = vld [vmem:[%s1863_s11 + $0x48] sm:$0xff]  ;;  %v1241_v15 = vld [vmem:[%s2112_s2 + $0x138] sm:$0xff]  ;;  %v1240_v17 = vld [vmem:[%s2112_s2 + $0x130] sm:$0xff]  ;;  %v359_v18 = vsub.f32 %v336_v14, %v1869_v45 }
  0x3c   : > { %1423 = vmatprep.subr.mxu1 %v372_v33  ;;  %1368 = vmatpush3.msra.mxu0 %v1225_v32  ;;  %v1956_v13 = vsub.f32 %v335_v10, %v1869_v45  ;;  %v337_v16 = vld [vmem:[%s1863_s11 + $0x58] sm:$0xff]  ;;  %v338_v20 = vld [vmem:[%s1863_s11 + $0x60] sm:$0xff]  ;;  %v1239_v21 = vld [vmem:[%s2112_s2 + $0x128] sm:$0xff] }
  0x3d   : > { %1424 = vmatpush3.msra.mxu1 %v372_v33  ;;  %1369 = vmatprep.subr.mxu0 %v1224_v34  ;;  %v360_v19 = vsub.f32 %v337_v16, %v1869_v45  ;;  %v339_v22 = vld [vmem:[%s1863_s11 + $0x68] sm:$0xff]  ;;  %v1238_v23 = vld [vmem:[%s2112_s2 + $0x120] sm:$0xff]  ;;  %v361_v24 = vsub.f32 %v338_v20, %v1869_v45  ;;  %v340_v26 = vld [vmem:[%s1863_s11 + $0x70] sm:$0xff] }
  0x3e   : > { %1425 = vmatprep.subr.mxu1 %v371_v35  ;;  %1370 = vmatpush3.msra.mxu0 %v1224_v34  ;;  %v362_v25 = vsub.f32 %v339_v22, %v1869_v45  ;;  %v1237_v27 = vld [vmem:[%s2112_s2 + $0x118] sm:$0xff]  ;;  %v1236_v29 = vld [vmem:[%s2112_s2 + $0x110] sm:$0xff]  ;;  %v363_v30 = vsub.f32 %v340_v26, %v1869_v45  ;;  %v1235_v32 = vld [vmem:[%s2112_s2 + $0x108] sm:$0xff] }
  0x3f   : > { %1426 = vmatpush3.msra.mxu1 %v371_v35  ;;  %1371 = vmatprep.subr.mxu0 %v1223_v36  ;;  %v341_v28 = vld [vmem:[%s1863_s11 + $0x78] sm:$0xff]  ;;  %v1234_v33 = vld [vmem:[%s2112_s2 + $0x100] sm:$0xff] }
  0x40   : > { %1427 = vmatprep.subr.mxu1 %v370_v37  ;;  %1372 = vmatpush3.msra.mxu0 %v1223_v36  ;;  %v364_v31 = vsub.f32 %v341_v28, %v1869_v45 }
  0x41   : > { %1428 = vmatpush3.msra.mxu1 %v370_v37  ;;  %1373 = vmatprep.subr.mxu0 %v1222_v38 }
  0x42   : > { %1429 = vmatprep.subr.mxu1 %v369_v39  ;;  %1374 = vmatpush3.msra.mxu0 %v1222_v38 }
  0x43   : > { %1430 = vmatpush3.msra.mxu1 %v369_v39  ;;  %1375 = vmatprep.subr.mxu0 %v1221_v40 }
  0x44   : > { %1431 = vmatprep.subr.mxu1 %v368_v41  ;;  %1376 = vmatpush3.msra.mxu0 %v1221_v40 }
  0x45   : > { %1432 = vmatpush3.msra.mxu1 %v368_v41  ;;  %1377 = vmatprep.subr.mxu0 %v1220_v42 }
  0x46   : > { %1433 = vmatprep.subr.mxu1 %v367_v43  ;;  %1378 = vmatpush3.msra.mxu0 %v1220_v42 }
  0x47   : > { %1434 = vmatpush3.msra.mxu1 %v367_v43  ;;  %1379 = vmatprep.subr.mxu0 %v1219_v46 }
  0x48   : > { %1435 = vmatprep.subr.mxu1 %v366_v47  ;;  %1380 = vmatpush3.msra.mxu0 %v1219_v46 }
  0x49   : > { %1436 = vmatpush3.msra.mxu1 %v366_v47  ;;  %1381 = vmatprep.subr.mxu0 %v1218_v49 }
  0x4a   : > { %1437 = vmatprep.subr.mxu1 %v365_v50  ;;  %1382 = vmatpush3.msra.mxu0 %v1218_v49 }
  0x4b   : > { %1383 = vmatprep.mubr.f32.mxu0 %v349_v51  ;;  %1438 = vmatpush3.msra.mxu1 %v365_v50 }
  0x4c   : > { %1384 = vmatmul.mubr.f32.vlgmr.msra.gmra.mxu0 %v1886_v52  ;;  %1440 = vmatmul.mubr.f32.vlgmr.msra.gmra.mxu1 %v349_v51 }
  0x4d   : > { %1463 = vmatprep.subr.mxu0 %v1249_v54  ;;  %1519 = vmatprep.subr.mxu1 %v1249_v54 }
  0x4e   : > { %1464 = vmatpush3.msra.mxu0 %v1249_v54  ;;  %1535 = vmatpush3.msra.mxu1 %v1249_v54 }
  0x4f   : > { %1465 = vmatprep.subr.mxu0 %v1248_v57  ;;  %1520 = vmatprep.subr.mxu1 %v1248_v57 }
  0x50   : > { %1386 = vmatprep.mubr.f32.mxu0 %v1899_v58  ;;  %1442 = vmatprep.mubr.f32.mxu1 %v1886_v52 }
  0x51   : > { %1466 = vmatpush3.msra.mxu0 %v1248_v57  ;;  %1536 = vmatpush3.msra.mxu1 %v1248_v57 }
  0x52   : > { %1387 = vmatmul.mubr.f32.gmra.mxu0 %v1902_v59  ;;  %1443 = vmatmul.mubr.f32.gmra.mxu1 %v1899_v58 }
  0x53   : > { %1467 = vmatprep.subr.mxu0 %v1247_v61  ;;  %1521 = vmatprep.subr.mxu1 %v1247_v61 }
  0x54   : > { %1468 = vmatpush3.msra.mxu0 %v1247_v61  ;;  %1537 = vmatpush3.msra.mxu1 %v1247_v61 }
  0x55   : > { %1469 = vmatprep.subr.mxu0 %v1246_v63  ;;  %1522 = vmatprep.subr.mxu1 %v1246_v63 }
  0x56   : > { %1389 = vmatprep.mubr.f32.mxu0 %v1917_v0  ;;  %1445 = vmatprep.mubr.f32.mxu1 %v1902_v59 }
  0x57   : > { %1470 = vmatpush3.msra.mxu0 %v1246_v63  ;;  %1538 = vmatpush3.msra.mxu1 %v1246_v63 }
  0x58   : > { %1390 = vmatmul.mubr.f32.gmra.mxu0 %v1920_v1  ;;  %1446 = vmatmul.mubr.f32.gmra.mxu1 %v1917_v0 }
  0x59   : > { %1471 = vmatprep.subr.mxu0 %v1245_v3  ;;  %1523 = vmatprep.subr.mxu1 %v1245_v3 }
  0x5a   : > { %1472 = vmatpush3.msra.mxu0 %v1245_v3  ;;  %1539 = vmatpush3.msra.mxu1 %v1245_v3 }
  0x5b   : > { %1473 = vmatprep.subr.mxu0 %v1244_v5  ;;  %1524 = vmatprep.subr.mxu1 %v1244_v5 }
  0x5c   : > { %1392 = vmatprep.mubr.f32.mxu0 %v1935_v6  ;;  %1448 = vmatprep.mubr.f32.mxu1 %v1920_v1 }
  0x5d   : > { %1474 = vmatpush3.msra.mxu0 %v1244_v5  ;;  %1540 = vmatpush3.msra.mxu1 %v1244_v5 }
  0x5e   : > { %1393 = vmatmul.mubr.f32.gmra.mxu0 %v1938_v7  ;;  %1449 = vmatmul.mubr.f32.gmra.mxu1 %v1935_v6 }
  0x5f   : > { %1475 = vmatprep.subr.mxu0 %v1243_v9  ;;  %1525 = vmatprep.subr.mxu1 %v1243_v9 }
  0x60   : > { %1476 = vmatpush3.msra.mxu0 %v1243_v9  ;;  %1541 = vmatpush3.msra.mxu1 %v1243_v9 }
  0x61   : > { %1477 = vmatprep.subr.mxu0 %v1242_v11  ;;  %1526 = vmatprep.subr.mxu1 %v1242_v11 }
  0x62   : > { %1395 = vmatprep.mubr.f32.mxu0 %v1953_v12  ;;  %1451 = vmatprep.mubr.f32.mxu1 %v1938_v7 }
  0x63   : > { %1478 = vmatpush3.msra.mxu0 %v1242_v11  ;;  %1542 = vmatpush3.msra.mxu1 %v1242_v11 }
  0x64   : > { %1396 = vmatmul.mubr.f32.gmra.mxu0 %v1956_v13  ;;  %1452 = vmatmul.mubr.f32.gmra.mxu1 %v1953_v12 }
  0x65   : > { %1479 = vmatprep.subr.mxu0 %v1241_v15  ;;  %1527 = vmatprep.subr.mxu1 %v1241_v15 }
  0x66   : > { %1480 = vmatpush3.msra.mxu0 %v1241_v15  ;;  %1543 = vmatpush3.msra.mxu1 %v1241_v15 }
  0x67   : > { %1481 = vmatprep.subr.mxu0 %v1240_v17  ;;  %1528 = vmatprep.subr.mxu1 %v1240_v17 }
  0x68   : > { %1398 = vmatprep.mubr.f32.mxu0 %v359_v18  ;;  %1454 = vmatprep.mubr.f32.mxu1 %v1956_v13 }
  0x69   : > { %1482 = vmatpush3.msra.mxu0 %v1240_v17  ;;  %1544 = vmatpush3.msra.mxu1 %v1240_v17 }
  0x6a   : > { %1399 = vmatmul.mubr.f32.gmra.mxu0 %v360_v19  ;;  %1455 = vmatmul.mubr.f32.gmra.mxu1 %v359_v18 }
  0x6b   : > { %1483 = vmatprep.subr.mxu0 %v1239_v21  ;;  %1529 = vmatprep.subr.mxu1 %v1239_v21 }
  0x6c   : > { %1484 = vmatpush3.msra.mxu0 %v1239_v21  ;;  %1545 = vmatpush3.msra.mxu1 %v1239_v21 }
  0x6d   : > { %1485 = vmatprep.subr.mxu0 %v1238_v23  ;;  %1530 = vmatprep.subr.mxu1 %v1238_v23 }
  0x6e   : > { %1401 = vmatprep.mubr.f32.mxu0 %v361_v24  ;;  %1457 = vmatprep.mubr.f32.mxu1 %v360_v19 }
  0x6f   : > { %1486 = vmatpush3.msra.mxu0 %v1238_v23  ;;  %1546 = vmatpush3.msra.mxu1 %v1238_v23 }
  0x70   : > { %1402 = vmatmul.mubr.f32.gmra.mxu0 %v362_v25  ;;  %1458 = vmatmul.mubr.f32.gmra.mxu1 %v361_v24 }
  0x71   : > { %1487 = vmatprep.subr.mxu0 %v1237_v27  ;;  %1531 = vmatprep.subr.mxu1 %v1237_v27 }
  0x72   : > { %1488 = vmatpush3.msra.mxu0 %v1237_v27  ;;  %1547 = vmatpush3.msra.mxu1 %v1237_v27 }
  0x73   : > { %1489 = vmatprep.subr.mxu0 %v1236_v29  ;;  %1532 = vmatprep.subr.mxu1 %v1236_v29 }
  0x74   : > { %1404 = vmatprep.mubr.f32.mxu0 %v363_v30  ;;  %1460 = vmatprep.mubr.f32.mxu1 %v362_v25 }
  0x75   : > { %1490 = vmatpush3.msra.mxu0 %v1236_v29  ;;  %1548 = vmatpush3.msra.mxu1 %v1236_v29 }
  0x76   : > { %1405 = vmatmul.mubr.f32.gmra.mxu0 %v364_v31  ;;  %1461 = vmatmul.mubr.f32.gmra.mxu1 %v363_v30 }
  0x77   : > { %1491 = vmatprep.subr.mxu0 %v1235_v32  ;;  %1533 = vmatprep.subr.mxu1 %v1235_v32 }
  0x78   : > { %1492 = vmatpush3.msra.mxu0 %v1235_v32  ;;  %1549 = vmatpush3.msra.mxu1 %v1235_v32 }
  0x79   : > { %1493 = vmatprep.subr.mxu0 %v1234_v33  ;;  %1534 = vmatprep.subr.mxu1 %v1234_v33 }
  0x7a   : > { %1494 = vmatpush3.msra.mxu0 %v1234_v33  ;;  %1550 = vmatpush3.msra.mxu1 %v1234_v33 }
  0x7b   : > { %1495 = vmatprep.mubr.f32.mxu0 %v1886_v52  ;;  %1507 = vmatprep.mubr.f32.mxu1 %v1956_v13 }
  0x7c   : > { %1496 = vmatmul.mubr.f32.vlgmr.msra.gmra.mxu0 %v1899_v58  ;;  %1508 = vmatmul.mubr.f32.vlgmr.msra.gmra.mxu1 %v359_v18 }
  0x7d   : > { %1498 = vmatprep.mubr.f32.mxu0 %v1902_v59  ;;  %1510 = vmatprep.mubr.f32.mxu1 %v360_v19 }
  0x80   : > { %1499 = vmatmul.mubr.f32.gmra.mxu0 %v1917_v0  ;;  %1511 = vmatmul.mubr.f32.gmra.mxu1 %v361_v24 }
  0x81   : > { %1501 = vmatprep.mubr.f32.mxu0 %v1920_v1  ;;  %1513 = vmatprep.mubr.f32.mxu1 %v362_v25 }
  0x84   : > { %1502 = vmatmul.mubr.f32.gmra.mxu0 %v1935_v6  ;;  %1514 = vmatmul.mubr.f32.gmra.mxu1 %v363_v30 }
  0x85   : > { %1504 = vmatprep.mubr.f32.mxu0 %v1938_v7  ;;  %1516 = vmatprep.mubr.f32.mxu1 %v364_v31 }
  0x88   : > { %1505 = vmatmul.mubr.f32.gmra.mxu0 %v1953_v12  ;;  %1517 = vmatmul.mubr.f32.gmra.mxu1 %v1664_v55 }
 0x10c   : > { %v1385_v34 = vpop.f32.mrf.mxu0  ;;  %v1441_v35 = vpop.f32.mrf.mxu1 }
 0x10d   : > { %v615_v2 = vadd.f32 %v1441_v35, %v1385_v34 }
 0x10e   : > { %v464_v36 = vpop.f32.mrf.mxu0  ;;  %v609_v37 = vpop.f32.mrf.mxu1 }
 0x10f   : > { %v610_v6 = vadd.f32 %v609_v37, %v464_v36 }
 0x112   : > { %v1388_v38 = vpop.f32.mrf.mxu0  ;;  %v1444_v39 = vpop.f32.mrf.mxu1 }
 0x113   : > { %v625_v7 = vadd.f32 %v1444_v39, %v1388_v38 }
 0x114   : > { %v474_v40 = vpop.f32.mrf.mxu0  ;;  %v619_v41 = vpop.f32.mrf.mxu1 }
 0x115   : > { %v620_v10 = vadd.f32 %v619_v41, %v474_v40 }
 0x118   : > { %v1391_v42 = vpop.f32.mrf.mxu0  ;;  %v1447_v43 = vpop.f32.mrf.mxu1 }
 0x119   : > { %v635_v11 = vadd.f32 %v1447_v43, %v1391_v42 }
 0x11a   : > { %v484_v44 = vpop.f32.mrf.mxu0  ;;  %v629_v45 = vpop.f32.mrf.mxu1 }
 0x11b   : > { %v630_v18 = vadd.f32 %v629_v45, %v484_v44 }
 0x11e   : > { %v1394_v46 = vpop.f32.mrf.mxu0  ;;  %v1450_v47 = vpop.f32.mrf.mxu1 }
 0x11f   : > { %v645_v19 = vadd.f32 %v1450_v47, %v1394_v46 }
 0x120   : > { %v494_v48 = vpop.f32.mrf.mxu0  ;;  %v639_v49 = vpop.f32.mrf.mxu1 }
 0x121   : > { %v2019_v28 = vadd.f32 %v639_v49, %v494_v48 }
 0x124   : > { %v1397_v50 = vpop.f32.mrf.mxu0  ;;  %v1453_v51 = vpop.f32.mrf.mxu1 }
 0x125   : > { %v655_v3 = vadd.f32 %v1453_v51, %v1397_v50 }
 0x126   : > { %v504_v52 = vpop.f32.mrf.mxu0  ;;  %v649_v53 = vpop.f32.mrf.mxu1 }
 0x127   : > { %v650_v12 = vadd.f32 %v649_v53, %v504_v52 }
 0x12a   : > { %v1400_v54 = vpop.f32.mrf.mxu0  ;;  %v1456_v55 = vpop.f32.mrf.mxu1 }
 0x12b   : > { %v665_v13 = vadd.f32 %v1456_v55, %v1400_v54 }
 0x12c   : > { %v514_v56 = vpop.f32.mrf.mxu0  ;;  %v659_v57 = vpop.f32.mrf.mxu1 }
 0x12d   : > { %v660_v29 = vadd.f32 %v659_v57, %v514_v56 }
 0x130   : > { %v1403_v58 = vpop.f32.mrf.mxu0  ;;  %v1459_v59 = vpop.f32.mrf.mxu1 }
 0x131   : > { %v675_v44 = vadd.f32 %v1459_v59, %v1403_v58 }
 0x132   : > { %v524_v60 = vpop.f32.mrf.mxu0  ;;  %v669_v61 = vpop.f32.mrf.mxu1 }
 0x133   : > { %v670_v45 = vadd.f32 %v669_v61, %v524_v60 }
 0x136   : > { %v2009_v62 = vpop.f32.mrf.mxu0  ;;  %v2011_v63 = vpop.f32.mrf.mxu1 }
 0x138   : > { %v2013_v0 = vpop.f32.mrf.mxu0  ;;  %v2015_v1 = vpop.f32.mrf.mxu1 }
 0x13c   : > { %v1497_v4 = vpop.f32.mrf.mxu0  ;;  %v1509_v5 = vpop.f32.mrf.mxu1 }
 0x13d   : > { %v851_v8 = vadd.f32 %v1497_v4, %v615_v2  ;;  %v859_v9 = vadd.f32 %v1509_v5, %v655_v3 }
 0x13e   : > { %v771_v14 = vpop.f32.mrf.mxu0  ;;  %v811_v15 = vpop.f32.mrf.mxu1 }
 0x13f   : > { %vm867_vm0 = vcmp.ge.f32.partialorder %v851_v8, 0.0  ;;  %v883_v16 = vmul.f32 0.01, %v851_v8  ;;  %vm875_vm1 = vcmp.ge.f32.partialorder %v859_v9, 0.0  ;;  %v891_v17 = vmul.f32 0.01, %v859_v9 }
 0x140   : > { %v850_v20 = vadd.f32 %v771_v14, %v610_v6  ;;  %v858_v21 = vadd.f32 %v811_v15, %v650_v12  ;;  %v1500_v22 = vpop.f32.mrf.mxu0  ;;  %v1512_v23 = vpop.f32.mrf.mxu1 }
 0x141   : > { %v899_v24 = vsel %vm867_vm0, %v851_v8, %v883_v16  ;;  %v2017_v25 = vsel %vm875_vm1, %v859_v9, %v891_v17  ;;  %v853_v26 = vadd.f32 %v1500_v22, %v625_v7  ;;  %v861_v27 = vadd.f32 %v1512_v23, %v665_v13 }
 0x142   : > { %915 = vst [vmem:[%s2022_s10 + $0x8] sm:$0xff] %v899_v24  ;;  %923 = vst [vmem:[%s2022_s10 + $0x48] sm:$0xff] %v2017_v25  ;;  %vm866_vm2 = vcmp.ge.f32.partialorder %v850_v20, 0.0  ;;  %v882_v30 = vmul.f32 0.01, %v850_v20  ;;  %v781_v31 = vpop.f32.mrf.mxu0  ;;  %v821_v32 = vpop.f32.mrf.mxu1  ;;  %vm874_vm3 = vcmp.ge.f32.partialorder %v858_v21, 0.0  ;;  %v953_v40 = vmul.f32 %v899_v24, %v899_v24 }
 0x143   : > { %v890_v33 = vmul.f32 0.01, %v858_v21  ;;  %vm869_vm4 = vcmp.ge.f32.partialorder %v853_v26, 0.0  ;;  %v885_v34 = vmul.f32 0.01, %v853_v26  ;;  %vm877_vm5 = vcmp.ge.f32.partialorder %v861_v27, 0.0 }
 0x144   : > { %v898_v35 = vsel %vm866_vm2, %v850_v20, %v882_v30  ;;  %v893_v36 = vmul.f32 0.01, %v861_v27  ;;  %v852_v37 = vadd.f32 %v781_v31, %v620_v10  ;;  %v1503_v38 = vpop.f32.mrf.mxu0  ;;  %v1515_v39 = vpop.f32.mrf.mxu1  ;;  %v860_v52 = vadd.f32 %v821_v32, %v660_v29 }
 0x145   : > { %914 = vst [vmem:[%s2022_s10] sm:$0xff] %v898_v35  ;;  %v952_v41 = vmul.f32 %v898_v35, %v898_v35  ;;  %v2028_v42 = vsel %vm874_vm3, %v858_v21, %v890_v33  ;;  %v901_v43 = vsel %vm869_vm4, %v853_v26, %v885_v34  ;;  %v930_v49 = vadd.f32 %v899_v24, %v898_v35 }
 0x146   : > { %922 = vst [vmem:[%s2022_s10 + $0x40] sm:$0xff] %v2028_v42  ;;  %917 = vst [vmem:[%s2022_s10 + $0x18] sm:$0xff] %v901_v43  ;;  %v2033_v46 = vsel %vm877_vm5, %v861_v27, %v893_v36  ;;  %vm868_vm6 = vcmp.ge.f32.partialorder %v852_v37, 0.0  ;;  %v791_v47 = vpop.f32.mrf.mxu0  ;;  %v831_v48 = vpop.f32.mrf.mxu1  ;;  %v884_v51 = vmul.f32 0.01, %v852_v37  ;;  %v855_v53 = vadd.f32 %v1503_v38, %v635_v11 }
 0x147   : > { %v968_v50 = vadd.f32 %v953_v40, %v952_v41  ;;  %925 = vst [vmem:[%s2022_s10 + $0x58] sm:$0xff] %v2033_v46  ;;  %v863_v54 = vadd.f32 %v1515_v39, %v675_v44  ;;  %v854_v55 = vadd.f32 %v791_v47, %v630_v18  ;;  %v862_v56 = vadd.f32 %v831_v48, %v670_v45 }
 0x148   : > { %v1506_v57 = vpop.f32.mrf.mxu0  ;;  %v900_v58 = vsel %vm868_vm6, %v852_v37, %v884_v51  ;;  %vm876_vm7 = vcmp.ge.f32.partialorder %v860_v52, 0.0  ;;  %v892_v59 = vmul.f32 0.01, %v860_v52  ;;  %v1518_v61 = vpop.f32.mrf.mxu1  ;;  %vm871_vm8 = vcmp.ge.f32.partialorder %v855_v53, 0.0 }
 0x149   : > { %v857_v60 = vadd.f32 %v1506_v57, %v645_v19  ;;  %916 = vst [vmem:[%s2022_s10 + $0x10] sm:$0xff] %v900_v58  ;;  %v931_v2 = vadd.f32 %v930_v49, %v900_v58  ;;  %v954_v3 = vmul.f32 %v900_v58, %v900_v58  ;;  %v887_v4 = vmul.f32 0.01, %v855_v53 }
 0x14a   : > { %v908_v5 = vsel %vm876_vm7, %v860_v52, %v892_v59  ;;  %vm879_vm9 = vcmp.ge.f32.partialorder %v863_v54, 0.0  ;;  %v895_v6 = vmul.f32 0.01, %v863_v54  ;;  %vm870_vm10 = vcmp.ge.f32.partialorder %v854_v55, 0.0  ;;  %v801_v14 = vpop.f32.mrf.mxu0  ;;  %v841_v15 = vpop.f32.mrf.mxu1 }
 0x14b   : > { %v955_v7 = vmul.f32 %v901_v43, %v901_v43  ;;  %v969_v8 = vadd.f32 %v968_v50, %v954_v3  ;;  %924 = vst [vmem:[%s2022_s10 + $0x50] sm:$0xff] %v908_v5  ;;  %v903_v9 = vsel %vm871_vm8, %v855_v53, %v887_v4  ;;  %v886_v10 = vmul.f32 0.01, %v854_v55 }
 0x14c   : > { %v685_v11 = vadd.f32 %v2011_v63, %v2009_v62  ;;  %919 = vst [vmem:[%s2022_s10 + $0x28] sm:$0xff] %v903_v9  ;;  %v911_v12 = vsel %vm879_vm9, %v863_v54, %v895_v6  ;;  %v932_v13 = vadd.f32 %v931_v2, %v901_v43  ;;  %vm878_vm11 = vcmp.ge.f32.partialorder %v862_v56, 0.0 }
 0x14d   : > { %v680_v16 = vadd.f32 %v2015_v1, %v2013_v0  ;;  %927 = vst [vmem:[%s2022_s10 + $0x68] sm:$0xff] %v911_v12  ;;  %v902_v17 = vsel %vm870_vm10, %v854_v55, %v886_v10  ;;  %v970_v18 = vadd.f32 %v969_v8, %v955_v7  ;;  %v894_v19 = vmul.f32 0.01, %v862_v56 }
 0x14e   : > { %918 = vst [vmem:[%s2022_s10 + $0x20] sm:$0xff] %v902_v17  ;;  %v933_v20 = vadd.f32 %v932_v13, %v902_v17  ;;  %v956_v21 = vmul.f32 %v902_v17, %v902_v17  ;;  %vm873_vm12 = vcmp.ge.f32.partialorder %v857_v60, 0.0  ;;  %v889_v62 = vmul.f32 0.01, %v857_v60  ;;  %v1067_v17 = vld [vmem:[%s2022_s10 + $0x8] sm:$0xff] (%p1738_p6) }
 0x14f   : > { %v910_v63 = vsel %vm878_vm11, %v862_v56, %v894_v19  ;;  %v865_v22 = vadd.f32 %v1518_v61, %v685_v11  ;;  %v856_v23 = vadd.f32 %v801_v14, %v2019_v28  ;;  %v864_v24 = vadd.f32 %v841_v15, %v680_v16  ;;  %v1065_v16 = vld [vmem:[%s2022_s10] sm:$0xff] (%p1738_p6)  ;;  %v1071_v19 = vld [vmem:[%s2022_s10 + $0x18] sm:$0xff] (%p1738_p6)  ;;  %1068 = vst [vmem:[%s1006_s6 + $0x10] sm:$0xff] (%p1738_p6), %v1067_v17 }
 0x150   : > { %v957_v26 = vmul.f32 %v903_v9, %v903_v9  ;;  %v971_v27 = vadd.f32 %v970_v18, %v956_v21  ;;  %926 = vst [vmem:[%s2022_s10 + $0x60] sm:$0xff] %v910_v63  ;;  %v905_v0 = vsel %vm873_vm12, %v857_v60, %v889_v62  ;;  %v934_v29 = vadd.f32 %v933_v20, %v903_v9  ;;  %v1069_v18 = vld [vmem:[%s2022_s10 + $0x10] sm:$0xff] (%p1738_p6) }
 0x151   : > { %921 = vst [vmem:[%s2022_s10 + $0x38] sm:$0xff] %v905_v0  ;;  %vm881_vm13 = vcmp.ge.f32.partialorder %v865_v22, 0.0  ;;  %v897_v1 = vmul.f32 0.01, %v865_v22  ;;  %vm872_vm14 = vcmp.ge.f32.partialorder %v856_v23, 0.0  ;;  %vm880_vm15 = vcmp.ge.f32.partialorder %v864_v24, 0.0  ;;  %1066 = vst [vmem:[%s1006_s6] sm:$0xff] (%p1738_p6), %v1065_v16 }
 0x152   : > { %v888_v30 = vmul.f32 0.01, %v856_v23  ;;  %v896_v31 = vmul.f32 0.01, %v864_v24  ;;  %v972_v33 = vadd.f32 %v971_v27, %v957_v26  ;;  %v959_v37 = vmul.f32 %v905_v0, %v905_v0  ;;  %v1087_v26 = vld [vmem:[%s2022_s10 + $0x58] sm:$0xff] (%p1738_p6)  ;;  %1070 = vst [vmem:[%s1006_s6 + $0x20] sm:$0xff] (%p1738_p6), %v1069_v18 }
 0x153   : > { %v913_v32 = vsel %vm881_vm13, %v865_v22, %v897_v1  ;;  %v960_v40 = vmul.f32 %v2028_v42, %v2028_v42  ;;  %v961_v44 = vmul.f32 %v2017_v25, %v2017_v25  ;;  %v962_v48 = vmul.f32 %v908_v5, %v908_v5  ;;  %v1075_v21 = vld [vmem:[%s2022_s10 + $0x28] sm:$0xff] (%p1738_p6)  ;;  %v1081_v22 = vld [vmem:[%s2022_s10 + $0x40] sm:$0xff] (%p1738_p6)  ;;  %1072 = vst [vmem:[%s1006_s6 + $0x30] sm:$0xff] (%p1738_p6), %v1071_v19 }
 0x154   : > { %929 = vst [vmem:[%s2022_s10 + $0x78] sm:$0xff] %v913_v32  ;;  %v904_v28 = vsel %vm872_vm14, %v856_v23, %v888_v30  ;;  %v912_v34 = vsel %vm880_vm15, %v864_v24, %v896_v31  ;;  %v963_v51 = vmul.f32 %v2033_v46, %v2033_v46  ;;  %v964_v54 = vmul.f32 %v910_v63, %v910_v63  ;;  %v1083_v23 = vld [vmem:[%s2022_s10 + $0x48] sm:$0xff] (%p1738_p6)  ;;  %v1085_v24 = vld [vmem:[%s2022_s10 + $0x50] sm:$0xff] (%p1738_p6) }
 0x155   : > { %920 = vst [vmem:[%s2022_s10 + $0x30] sm:$0xff] %v904_v28  ;;  %v935_v35 = vadd.f32 %v934_v29, %v904_v28  ;;  %v958_v36 = vmul.f32 %v904_v28, %v904_v28  ;;  %928 = vst [vmem:[%s2022_s10 + $0x70] sm:$0xff] %v912_v34  ;;  %v965_v56 = vmul.f32 %v911_v12, %v911_v12  ;;  %v1073_v20 = vld [vmem:[%s2022_s10 + $0x20] sm:$0xff] (%p1738_p6) }
 0x156   : > { %v967_v61 = vmul.f32 %v913_v32, %v913_v32  ;;  %1074 = vst [vmem:[%s1006_s6 + $0x40] sm:$0xff] (%p1738_p6), %v1073_v20  ;;  %1076 = vst [vmem:[%s1006_s6 + $0x50] sm:$0xff] (%p1738_p6), %v1075_v21 }
 0x157   : > { %v936_v38 = vadd.f32 %v935_v35, %v905_v0  ;;  %v973_v39 = vadd.f32 %v972_v33, %v958_v36  ;;  %1082 = vst [vmem:[%s1006_s6 + $0x80] sm:$0xff] (%p1738_p6), %v1081_v22  ;;  %1084 = vst [vmem:[%s1006_s6 + $0x90] sm:$0xff] (%p1738_p6), %v1083_v23  ;;  %v1089_v27 = vld [vmem:[%s2022_s10 + $0x60] sm:$0xff] (%p1738_p6)  ;;  %v1091_v0 = vld [vmem:[%s2022_s10 + $0x68] sm:$0xff] (%p1738_p6) }
 0x158   : > { %1086 = vst [vmem:[%s1006_s6 + $0xa0] sm:$0xff] (%p1738_p6), %v1085_v24  ;;  %1088 = vst [vmem:[%s1006_s6 + $0xb0] sm:$0xff] (%p1738_p6), %v1087_v26 }
 0x159   : > { %v937_v41 = vadd.f32 %v936_v38, %v2028_v42  ;;  %v974_v43 = vadd.f32 %v973_v39, %v959_v37  ;;  %1090 = vst [vmem:[%s1006_s6 + $0xc0] sm:$0xff] (%p1738_p6), %v1089_v27  ;;  %1092 = vst [vmem:[%s1006_s6 + $0xd0] sm:$0xff] (%p1738_p6), %v1091_v0 }
 0x15b   : > { %v938_v45 = vadd.f32 %v937_v41, %v2017_v25  ;;  %v975_v47 = vadd.f32 %v974_v43, %v960_v40  ;;  %v966_v25 = vmul.f32 %v912_v34, %v912_v34  ;;  %v1095_v29 = vld [vmem:[%s2022_s10 + $0x78] sm:$0xff] (%p1738_p6) }
 0x15c   : > { %v1077_v62 = vld [vmem:[%s2022_s10 + $0x30] sm:$0xff] (%p1738_p6)  ;;  %1096 = vst [vmem:[%s1006_s6 + $0xf0] sm:$0xff] (%p1738_p6), %v1095_v29 }
 0x15d   : > { %v976_v49 = vadd.f32 %v975_v47, %v961_v44  ;;  %v939_v50 = vadd.f32 %v938_v45, %v908_v5  ;;  %1078 = vst [vmem:[%s1006_s6 + $0x60] sm:$0xff] (%p1738_p6), %v1077_v62  ;;  %v1093_v1 = vld [vmem:[%s2022_s10 + $0x70] sm:$0xff] (%p1738_p6) }
 0x15e   : > { %1094 = vst [vmem:[%s1006_s6 + $0xe0] sm:$0xff] (%p1738_p6), %v1093_v1 }
 0x15f   : > { %v940_v52 = vadd.f32 %v939_v50, %v2033_v46  ;;  %v977_v53 = vadd.f32 %v976_v49, %v962_v48 }
 0x161   : > { %v941_v42 = vadd.f32 %v940_v52, %v910_v63  ;;  %v978_v55 = vadd.f32 %v977_v53, %v963_v51  ;;  %v1079_v63 = vld [vmem:[%s2022_s10 + $0x38] sm:$0xff] (%p1738_p6) }
 0x162   : > { %1080 = vst [vmem:[%s1006_s6 + $0x70] sm:$0xff] (%p1738_p6), %v1079_v63 }
 0x163   : > { %v942_v57 = vadd.f32 %v941_v42, %v911_v12  ;;  %v979_v58 = vadd.f32 %v978_v55, %v964_v54 }
 0x165   : > { %v943_v59 = vadd.f32 %v942_v57, %v912_v34  ;;  %v980_v60 = vadd.f32 %v979_v58, %v965_v56 }
 0x167   : > { %v944_v2 = vadd.f32 %v943_v59, %v913_v32  ;;  %v981_v3 = vadd.f32 %v980_v60, %v966_v25 }
 0x169   : > { %v945_v4 = vrot.slane %v944_v2, 4  ;;  %v982_v5 = vadd.f32 %v981_v3, %v967_v61 }
 0x16b   : > { %v946_v46 = vadd.f32 %v945_v4, %v944_v2  ;;  %v983_v6 = vrot.slane %v982_v5, 4 }
 0x16d   : > { %v947_v7 = vrot.slane %v946_v46, 2  ;;  %v984_v8 = vadd.f32 %v983_v6, %v982_v5 }
 0x16f   : > { %v948_v9 = vadd.f32 %v947_v7, %v946_v46  ;;  %v985_v10 = vrot.slane %v984_v8, 2 }
 0x171   : > { %v949_v11 = vrot.slane %v948_v9, 1  ;;  %v986_v12 = vadd.f32 %v985_v10, %v984_v8 }
 0x173   : > { %v950_v13 = vadd.f32 %v949_v11, %v948_v9  ;;  %v987_v14 = vrot.slane %v986_v12, 1  ;;  %1002 = sbr.rel (!%p1738_p6) target bundleno = 376 (0x178), region = 74 }
 0x175   : > { %951 = vst [vmem:[%s323_s25] sm:$0x1] %v950_v13  ;;  %v988_v15 = vadd.f32 %v987_v14, %v986_v12 }
 0x177   : > { %989 = vst [vmem:[%s323_s25 + $0x1] sm:$0x1] %v988_v15 }
 0x178 PF: > { %s15_s21 = sadd.s32 1, %s1662_s21   ;;  %s2116_s15 = smov %s1642_s16 }
 0x179   : > { %p12_p13 = scmp.ge.s32.totalorder %s15_s21, 6   ;;  %s2117_s16 = smov %s1746_s30 }
 0x17a   : > { %s2118_s17 = smov %s1654_s19  ;;  %s2119_s18 = smov %s1658_s20 }
 0x17b   : > { %s2120_s19 = smov %s2123_s22  ;;  %s2121_s20 = smov %s2127_s23 }
 0x17c   :  { %14 = sbr.rel (!%p12_p13) target bundleno = 4 (0x4), region = 157 }

// kernel: res_context_block.8
= control target key start
LH: loop header
LB: loop body
LE: loop exit
PB: predicated region body
PF: predicated region fallthrough
CT: control target
= control target key end

     0   :  { %s2015_s15 = smov 0   ;;  %s2017_s16 = smov 0   ;;  %s2462_s0 = inlined_call_operand.vmem [shape: f32[2,16,16,128], index: 0, kind: input, shape index: {}]   ;;  %s2463_s1 = inlined_call_operand.vmem [shape: f32[1,128], index: 1, kind: input, shape index: {}]   ;;  %s2464_s2 = inlined_call_operand.vmem [shape: f32[3,128,128], index: 2, kind: input, shape index: {}]   ;;  %s2465_s3 = inlined_call_operand.vmem [shape: f32[2,16,16,128], index: 3, kind: output, shape index: {0}]   ;;  %s2466_s4 = inlined_call_operand.vmem [shape: f32[4,2,128], index: 4, kind: output, shape index: {1}]  }
   0x1   :  { %s2019_s17 = smov 0   ;;  %s2021_s18 = smov 0  }
   0x2   :  { %s2023_s19 = smov 0  }
   0x3 LB: > { %s24_s20 = sadd.s32 1, %s1980_s17  ;;  %s27_s21 = sadd.s32 1, %s1984_s18  ;;  %s1988_s19 = sphi %s2023_s19, %s15_s19   ;;  %s1984_s18 = sphi %s2021_s18, %s2472_s18   ;;  %s1980_s17 = sphi %s2019_s17, %s2471_s17   ;;  %s1976_s16 = sphi %s2017_s16, %s2470_s16   ;;  %s1972_s15 = sphi %s2015_s15, %s2469_s15  }
   0x4   : > { %p25_p0 = scmp.ge.s32.totalorder %s24_s20, 2  ;;  %p1520_p1 = scmp.ge.s32.totalorder %s1988_s19, 1 }
   0x5   : > { %p191_p2 = scmp.lt.s32.totalorder %s1988_s19, 5 }
   0x6   : > { %s2474_s20 = smov (%p25_p0, %s24_s20), 0  ;;  %s2476_s21 = smov (!%p25_p0, %s27_s21), %s1984_s18 }
   0x7   : > { %p192_p3 = pnand %p1520_p1, %p191_p2  ;;  %p29_p4 = scmp.ge.s32.totalorder %s2476_s21, 2 }
   0x8   : > { %s1521_s28 = sshll.u32 (!%p192_p3), %s1972_s15, 3  ;;  %p234_p5 = scmp.lt.s32.totalorder (!%p192_p3), %s1976_s16, 1 }
   0x9   : > { %s2478_s21 = smov (%p29_p4, %s2476_s21), 0  ;;  %195 = sbr.rel (%p192_p3) target bundleno = 348 (0x15c), region = 32 }
   0xa   : > { %p236_p6 = scmp.lt.s32.totalorder (!%p192_p3), %s1521_s28, 15 }
   0xe   : > { %v1547_v0 = vld [vmem:[%s2464_s2 + $0xf8] sm:$0xff]  ;;  %v1546_v2 = vld [vmem:[%s2464_s2 + $0xf0] sm:$0xff]  ;;  %v1545_v4 = vld [vmem:[%s2464_s2 + $0xe8] sm:$0xff]  ;;  %s2070_s9 = scalar_select %p234_p5, %s1976_s16, 1  ;;  %v416_v22 = vlaneseq  ;;  %vm318_vm0 = vcmask 1040384   ;;  %vm367_vm9 = vcmask 1046528  }
   0xf   : > { %v768_v1 = vld [vmem:[%s2464_s2 + $0x78] sm:$0xff]  ;;  %1710 = vmatprep.subr.mxu0 %v1547_v0  ;;  %v767_v3 = vld [vmem:[%s2464_s2 + $0x70] sm:$0xff]  ;;  %v766_v5 = vld [vmem:[%s2464_s2 + $0x68] sm:$0xff]  ;;  %s2480_s28 = smov (!%p236_p6, %s1521_s28), 15 }
  0x10   : > { %1766 = vmatprep.subr.mxu1 %v768_v1  ;;  %1711 = vmatpush3.msra.mxu0 %v1547_v0  ;;  %v1544_v6 = vld [vmem:[%s2464_s2 + $0xe0] sm:$0xff]  ;;  %v1543_v8 = vld [vmem:[%s2464_s2 + $0xd8] sm:$0xff]  ;;  %s1522_s25 = sshll.u32 %s2480_s28, 1  ;;  %s1523_s26 = sshll.u32 %s2070_s9, 5  ;;  %v1542_v10 = vld [vmem:[%s2464_s2 + $0xd0] sm:$0xff]  ;;  %v2153_v31 = vshrl.u32 %v416_v22, 7 }
  0x11   : > { %1767 = vmatpush3.msra.mxu1 %v768_v1  ;;  %1712 = vmatprep.subr.mxu0 %v1546_v2  ;;  %v765_v7 = vld [vmem:[%s2464_s2 + $0x60] sm:$0xff]  ;;  %v764_v9 = vld [vmem:[%s2464_s2 + $0x58] sm:$0xff]  ;;  %v763_v11 = vld [vmem:[%s2464_s2 + $0x50] sm:$0xff]  ;;  %s2097_s9 = sadd.s32 %s1523_s26, %s1522_s25 }
  0x12   : > { %1768 = vmatprep.subr.mxu1 %v767_v3  ;;  %1713 = vmatpush3.msra.mxu0 %v1546_v2  ;;  %v1541_v12 = vld [vmem:[%s2464_s2 + $0xc8] sm:$0xff]  ;;  %v1540_v14 = vld [vmem:[%s2464_s2 + $0xc0] sm:$0xff]  ;;  %s1524_s14 = sshll.u32 %s2097_s9, 3  ;;  %v1539_v16 = vld [vmem:[%s2464_s2 + $0xb8] sm:$0xff]  ;;  %v437_v39 = vand.u32 15, %v2153_v31  ;;  %v419_v43 = vadd.s32 16, %v2153_v31 }
  0x13   : > { %1769 = vmatpush3.msra.mxu1 %v767_v3  ;;  %1714 = vmatprep.subr.mxu0 %v1545_v4  ;;  %v762_v13 = vld [vmem:[%s2464_s2 + $0x48] sm:$0xff]  ;;  %v761_v15 = vld [vmem:[%s2464_s2 + $0x40] sm:$0xff]  ;;  %v760_v17 = vld [vmem:[%s2464_s2 + $0x38] sm:$0xff]  ;;  %s2123_s7 = scalar_lea.vmem %s2462_s0, %s1524_s14  ;;  %v421_v56 = vadd.s32 32, %v2153_v31  ;;  %s2399_s27 = scalar_lea.vmem %s2465_s3, %s1524_s14 }
  0x14   : > { %1770 = vmatprep.subr.mxu1 %v766_v5  ;;  %1715 = vmatpush3.msra.mxu0 %v1545_v4  ;;  %v1538_v18 = vld [vmem:[%s2464_s2 + $0xb0] sm:$0xff]  ;;  %v1537_v20 = vld [vmem:[%s2464_s2 + $0xa8] sm:$0xff]  ;;  %v263_v23 = vld [vmem:[%s2123_s7] sm:$0xff]  ;;  %vm1598_vm1 = vcmp.ne.s32.totalorder %v437_v39, 0  ;;  %v451_v51 = vand.u32 15, %v419_v43  ;;  %v423_v4 = vadd.s32 48, %v2153_v31 }
  0x15   : > { %1771 = vmatpush3.msra.mxu1 %v766_v5  ;;  %1716 = vmatprep.subr.mxu0 %v1544_v6  ;;  %v759_v19 = vld [vmem:[%s2464_s2 + $0x30] sm:$0xff]  ;;  %v758_v21 = vld [vmem:[%s2464_s2 + $0x28] sm:$0xff]  ;;  %v2135_v24 = vld [vmem:[%s2463_s1] ss:$0 sm:$0xff]  ;;  %v465_v63 = vand.u32 15, %v421_v56  ;;  %s1529_s9 = sshll.u32 %s1976_s16, 1 }
  0x16   : > { %1772 = vmatprep.subr.mxu1 %v765_v7  ;;  %1717 = vmatpush3.msra.mxu0 %v1544_v6  ;;  %v1536_v25 = vld [vmem:[%s2464_s2 + $0xa0] sm:$0xff]  ;;  %v264_v27 = vld [vmem:[%s2123_s7 + $0x8] sm:$0xff]  ;;  %v1535_v28 = vld [vmem:[%s2464_s2 + $0x98] sm:$0xff]  ;;  %v2151_v30 = vsub.f32 %v263_v23, %v2135_v24  ;;  %vm1599_vm2 = vcmp.ne.s32.totalorder %v451_v51, 0  ;;  %s256_s14 = sadd.s32 %s1972_s15, %s1529_s9 }
  0x17   : > { %1773 = vmatpush3.msra.mxu1 %v765_v7  ;;  %1718 = vmatprep.subr.mxu0 %v1543_v8  ;;  %v757_v26 = vld [vmem:[%s2464_s2 + $0x20] sm:$0xff]  ;;  %v756_v29 = vld [vmem:[%s2464_s2 + $0x18] sm:$0xff]  ;;  %v2156_v32 = vsub.f32 %v264_v27, %v2135_v24  ;;  %v1534_v33 = vld [vmem:[%s2464_s2 + $0x90] sm:$0xff]  ;;  %vm1600_vm3 = vcmp.ne.s32.totalorder %v465_v63, 0  ;;  %p257_p7 = scmp.lt.s32.totalorder %s256_s14, 3 }
  0x18   : > { %1774 = vmatprep.subr.mxu1 %v764_v9  ;;  %1719 = vmatpush3.msra.mxu0 %v1543_v8  ;;  %v755_v34 = vld [vmem:[%s2464_s2 + $0x10] sm:$0xff]  ;;  %v1533_v36 = vld [vmem:[%s2464_s2 + $0x88] sm:$0xff]  ;;  %v319_v38 = vrot.slane %v2151_v30, 7  ;;  %v266_v40 = vld [vmem:[%s2123_s7 + $0x18] sm:$0xff] }
  0x19   : > { %1775 = vmatpush3.msra.mxu1 %v764_v9  ;;  %1720 = vmatprep.subr.mxu0 %v1542_v10  ;;  %v265_v35 = vld [vmem:[%s2123_s7 + $0x10] sm:$0xff]  ;;  %v754_v37 = vld [vmem:[%s2464_s2 + $0x8] sm:$0xff]  ;;  %v320_v41 = vrot.slane %v2156_v32, 7  ;;  %v1532_v44 = vld [vmem:[%s2464_s2 + $0x80] sm:$0xff]  ;;  %v2186_v46 = vsub.f32 %v266_v40, %v2135_v24  ;;  %s2482_s14 = smov (!%p257_p7, %s256_s14), 3 }
  0x1a   : > { %1776 = vmatprep.subr.mxu1 %v763_v11  ;;  %1721 = vmatpush3.msra.mxu0 %v1542_v10  ;;  %v2176_v42 = vsub.f32 %v265_v35, %v2135_v24  ;;  %v753_v45 = vld [vmem:[%s2464_s2] sm:$0xff]  ;;  %v366_v47 = vsel %vm318_vm0, 0.0, %v319_v38  ;;  %v1579_v52 = vld [vmem:[%s2464_s2 + $0x178] sm:$0xff]  ;;  %v268_v53 = vld [vmem:[%s2123_s7 + $0x28] sm:$0xff]  ;;  %s1530_s16 = sshll.u32 %s2482_s14, 1 }
  0x1b   : > { %1777 = vmatpush3.msra.mxu1 %v763_v11  ;;  %1722 = vmatprep.subr.mxu0 %v1541_v12  ;;  %v267_v48 = vld [vmem:[%s2123_s7 + $0x20] sm:$0xff]  ;;  %v321_v49 = vsel %vm318_vm0, %v319_v38, %v320_v41  ;;  %v324_v54 = vrot.slane %v2186_v46, 7  ;;  %v1578_v57 = vld [vmem:[%s2464_s2 + $0x170] sm:$0xff]  ;;  %v2208_v59 = vsub.f32 %v268_v53, %v2135_v24  ;;  %v1577_v0 = vld [vmem:[%s2464_s2 + $0x168] sm:$0xff]  ;;  %v479_v11 = vand.u32 15, %v423_v4  ;;  %s260_s30 = scalar_lea.vmem %s2466_s4, %s1530_s16 }
  0x1c   : > { %1778 = vmatprep.subr.mxu1 %v762_v13  ;;  %1723 = vmatpush3.msra.mxu0 %v1541_v12  ;;  %v322_v50 = vrot.slane %v2176_v42, 7  ;;  %v2199_v55 = vsub.f32 %v267_v48, %v2135_v24  ;;  %v269_v60 = vld [vmem:[%s2123_s7 + $0x30] sm:$0xff]  ;;  %v270_v1 = vld [vmem:[%s2123_s7 + $0x38] sm:$0xff]  ;;  %v1576_v5 = vld [vmem:[%s2464_s2 + $0x160] sm:$0xff] }
  0x1d   : > { %1779 = vmatpush3.msra.mxu1 %v762_v13  ;;  %1724 = vmatprep.subr.mxu0 %v1540_v14  ;;  %v328_v2 = vrot.slane %v2208_v59, 7  ;;  %v2220_v3 = vsub.f32 %v269_v60, %v2135_v24  ;;  %v2229_v7 = vsub.f32 %v270_v1, %v2135_v24  ;;  %v271_v8 = vld [vmem:[%s2123_s7 + $0x40] sm:$0xff]  ;;  %v1575_v12 = vld [vmem:[%s2464_s2 + $0x158] sm:$0xff]  ;;  %v272_v13 = vld [vmem:[%s2123_s7 + $0x48] sm:$0xff]  ;;  %vm1601_vm4 = vcmp.ne.s32.totalorder %v479_v11, 0 }
  0x1e   : > { %1780 = vmatprep.subr.mxu1 %v761_v15  ;;  %1725 = vmatpush3.msra.mxu0 %v1540_v14  ;;  %v323_v58 = vsel %vm318_vm0, %v320_v41, %v322_v50  ;;  %v325_v61 = vsel %vm318_vm0, %v322_v50, %v324_v54  ;;  %v326_v62 = vrot.slane %v2199_v55, 7  ;;  %v1571_v40 = vld [vmem:[%s2464_s2 + $0x138] sm:$0xff]  ;;  %v276_v41 = vld [vmem:[%s2123_s7 + $0x68] sm:$0xff]  ;;  %v277_v50 = vld [vmem:[%s2123_s7 + $0x70] sm:$0xff]  ;;  %v431_v60 = vadd.s32 112, %v2153_v31 }
  0x1f   : > { %1781 = vmatpush3.msra.mxu1 %v761_v15  ;;  %1726 = vmatprep.subr.mxu0 %v1539_v16  ;;  %v330_v10 = vrot.slane %v2220_v3, 7  ;;  %v332_v14 = vrot.slane %v2229_v7, 7  ;;  %v2241_v15 = vsub.f32 %v271_v8, %v2135_v24  ;;  %v278_v56 = vld [vmem:[%s2123_s7 + $0x78] sm:$0xff]  ;;  %v371_v11 = vrot.slane %v2176_v42, 1 }
  0x20   : > { %1782 = vmatprep.subr.mxu1 %v760_v17  ;;  %1727 = vmatpush3.msra.mxu0 %v1539_v16  ;;  %v327_v6 = vsel %vm318_vm0, %v324_v54, %v326_v62  ;;  %v329_v9 = vsel %vm318_vm0, %v326_v62, %v328_v2  ;;  %v425_v16 = vadd.s32 64, %v2153_v31  ;;  %v1569_v54 = vld [vmem:[%s2464_s2 + $0x128] sm:$0xff]  ;;  %v2313_v63 = vsub.f32 %v278_v56, %v2135_v24  ;;  %v1567_v4 = vld [vmem:[%s2464_s2 + $0x118] sm:$0xff] }
  0x21   : > { %1783 = vmatpush3.msra.mxu1 %v760_v17  ;;  %1728 = vmatprep.subr.mxu0 %v1538_v18  ;;  %v1574_v17 = vld [vmem:[%s2464_s2 + $0x150] sm:$0xff]  ;;  %v334_v22 = vrot.slane %v2241_v15, 7 }
  0x22   : > { %1784 = vmatprep.subr.mxu1 %v759_v19  ;;  %1729 = vmatpush3.msra.mxu0 %v1538_v18  ;;  %v331_v18 = vsel %vm318_vm0, %v328_v2, %v330_v10  ;;  %v493_v23 = vand.u32 15, %v425_v16  ;;  %v535_v2 = vand.u32 15, %v431_v60  ;;  %v1565_v16 = vld [vmem:[%s2464_s2 + $0x108] sm:$0xff] }
  0x23   : > { %1785 = vmatpush3.msra.mxu1 %v759_v19  ;;  %1730 = vmatprep.subr.mxu0 %v1537_v20  ;;  %v2250_v19 = vsub.f32 %v272_v13, %v2135_v24  ;;  %v368_v13 = vrot.slane %v2151_v30, 1 }
  0x24   : > { %1786 = vmatprep.subr.mxu1 %v758_v21  ;;  %1731 = vmatpush3.msra.mxu0 %v1537_v20  ;;  %v273_v20 = vld [vmem:[%s2123_s7 + $0x50] sm:$0xff]  ;;  %vm1602_vm5 = vcmp.ne.s32.totalorder %v493_v23, 0  ;;  %vm1605_vm8 = vcmp.ne.s32.totalorder %v535_v2, 0 }
  0x25   : > { %1787 = vmatpush3.msra.mxu1 %v758_v21  ;;  %1732 = vmatprep.subr.mxu0 %v1536_v25  ;;  %v333_v21 = vsel %vm318_vm0, %v330_v10, %v332_v14  ;;  %v336_v27 = vrot.slane %v2250_v19, 7 }
  0x26   : > { %1788 = vmatprep.subr.mxu1 %v757_v26  ;;  %1733 = vmatpush3.msra.mxu0 %v1536_v25  ;;  %v1573_v25 = vld [vmem:[%s2464_s2 + $0x148] sm:$0xff] }
  0x27   : > { %1789 = vmatpush3.msra.mxu1 %v757_v26  ;;  %1734 = vmatprep.subr.mxu0 %v1535_v28  ;;  %v274_v26 = vld [vmem:[%s2123_s7 + $0x58] sm:$0xff] }
  0x28   : > { %1790 = vmatprep.subr.mxu1 %v756_v29  ;;  %1735 = vmatpush3.msra.mxu0 %v1535_v28  ;;  %v2262_v28 = vsub.f32 %v273_v20, %v2135_v24  ;;  %v2271_v35 = vsub.f32 %v274_v26, %v2135_v24  ;;  %v428_v20 = vadd.s32 88, %v2153_v31  ;;  %v375_v26 = vrot.slane %v2199_v55, 1 }
  0x29   : > { %1791 = vmatpush3.msra.mxu1 %v756_v29  ;;  %1736 = vmatprep.subr.mxu0 %v1534_v33  ;;  %v427_v29 = vadd.s32 80, %v2153_v31 }
  0x2a   : > { %1792 = vmatprep.subr.mxu1 %v755_v34  ;;  %1737 = vmatpush3.msra.mxu0 %v1534_v33  ;;  %v1572_v33 = vld [vmem:[%s2464_s2 + $0x140] sm:$0xff]  ;;  %v338_v38 = vrot.slane %v2262_v28, 7  ;;  %v340_v43 = vrot.slane %v2271_v35, 7 }
  0x2b   : > { %1793 = vmatpush3.msra.mxu1 %v755_v34  ;;  %1738 = vmatprep.subr.mxu0 %v1533_v36  ;;  %v335_v34 = vsel %vm318_vm0, %v332_v14, %v334_v22  ;;  %v507_v39 = vand.u32 15, %v427_v29  ;;  %v369_v14 = vrot.slane %v2156_v32, 1 }
  0x2c   : > { %1794 = vmatprep.subr.mxu1 %v754_v37  ;;  %1739 = vmatpush3.msra.mxu0 %v1533_v36  ;;  %v275_v36 = vld [vmem:[%s2123_s7 + $0x60] sm:$0xff]  ;;  %v339_v48 = vsel %vm318_vm0, %v336_v27, %v338_v38  ;;  %v341_v51 = vsel %vm318_vm0, %v338_v38, %v340_v43  ;;  %v377_v38 = vrot.slane %v2208_v59, 1 }
  0x2d   : > { %1795 = vmatpush3.msra.mxu1 %v754_v37  ;;  %1740 = vmatprep.subr.mxu0 %v1532_v44  ;;  %v337_v37 = vsel %vm318_vm0, %v334_v22, %v336_v27  ;;  %vm1603_vm6 = vcmp.ne.s32.totalorder %v507_v39, 0  ;;  %v373_v22 = vrot.slane %v2186_v46, 1  ;;  %v370_v23 = vsel %vm367_vm9, %v368_v13, %v369_v14 }
  0x2e   : > { %1796 = vmatprep.subr.mxu1 %v753_v45  ;;  %1741 = vmatpush3.msra.mxu0 %v1532_v44  ;;  %v2283_v44 = vsub.f32 %v275_v36, %v2135_v24 }
  0x2f   : > { %1742 = vmatprep.mubr.f32.mxu0 %v2151_v30  ;;  %1797 = vmatpush3.msra.mxu1 %v753_v45  ;;  %v429_v45 = vadd.s32 96, %v2153_v31  ;;  %v374_v36 = vsel %vm367_vm9, %v371_v11, %v373_v22 }
  0x30   : > { %1798 = vmatprep.mubr.msk.f32.mxu1 %vm1598_vm1, %v366_v47  ;;  %1743 = vmatmul.mubr.f32.vlgmr.msra.gmra.mxu0 %v2156_v32  ;;  %v1570_v47 = vld [vmem:[%s2464_s2 + $0x130] sm:$0xff]  ;;  %v1564_v32 = vld [vmem:[%s2464_s2 + $0x100] sm:$0xff]  ;;  %v391_v27 = vrot.slane %v2283_v44, 1 }
  0x31   : > { %1799 = vmatmul.mubr.f32.vlgmr.msra.gmra.mxu1 %v321_v49  ;;  %1822 = vmatprep.subr.mxu0 %v1579_v52  ;;  %v2292_v49 = vsub.f32 %v276_v41, %v2135_v24  ;;  %v521_v53 = vand.u32 15, %v429_v45 }
  0x32   : > { %1878 = vmatprep.subr.mxu1 %v1579_v52  ;;  %1823 = vmatpush3.msra.mxu0 %v1579_v52 }
  0x33   : > { %1894 = vmatpush3.msra.mxu1 %v1579_v52  ;;  %1824 = vmatprep.subr.mxu0 %v1578_v57  ;;  %v342_v52 = vrot.slane %v2283_v44, 7  ;;  %vm1604_vm7 = vcmp.ne.s32.totalorder %v521_v53, 0  ;;  %v393_v39 = vrot.slane %v2292_v49, 1 }
  0x34   : > { %1879 = vmatprep.subr.mxu1 %v1578_v57  ;;  %1745 = vmatprep.mubr.f32.mxu0 %v2176_v42  ;;  %v420_v42 = vadd.s32 24, %v2153_v31 }
  0x35   : > { %1801 = vmatprep.mubr.msk.f32.mxu1 %vm1599_vm2, %v323_v58  ;;  %1825 = vmatpush3.msra.mxu0 %v1578_v57  ;;  %v2304_v58 = vsub.f32 %v277_v50, %v2135_v24  ;;  %v343_v62 = vsel %vm318_vm0, %v340_v43, %v342_v52  ;;  %v348_v24 = vrot.slane %v2313_v63, 7  ;;  %v379_v43 = vrot.slane %v2220_v3, 1 }
  0x36   : > { %1895 = vmatpush3.msra.mxu1 %v1578_v57  ;;  %1746 = vmatmul.mubr.f32.gmra.mxu0 %v2186_v46  ;;  %v344_v57 = vrot.slane %v2292_v49, 7  ;;  %v458_v29 = vand.u32 15, %v420_v42  ;;  %v394_v50 = vsel %vm367_vm9, %v391_v27, %v393_v39 }
  0x37   : > { %1802 = vmatmul.mubr.f32.gmra.mxu1 %v325_v61  ;;  %1826 = vmatprep.subr.mxu0 %v1577_v0  ;;  %v1568_v61 = vld [vmem:[%s2464_s2 + $0x120] sm:$0xff]  ;;  %v346_v1 = vrot.slane %v2304_v58, 7 }
  0x38   : > { %1880 = vmatprep.subr.mxu1 %v1577_v0  ;;  %1827 = vmatpush3.msra.mxu0 %v1577_v0  ;;  %vm1607_vm12 = vcmp.ne.s32.totalorder %v458_v29, 15 }
  0x39   : > { %1896 = vmatpush3.msra.mxu1 %v1577_v0  ;;  %1828 = vmatprep.subr.mxu0 %v1576_v5  ;;  %v345_v0 = vsel %vm318_vm0, %v342_v52, %v344_v57  ;;  %v347_v8 = vsel %vm318_vm0, %v344_v57, %v346_v1  ;;  %v397_v52 = vrot.slane %v2313_v63, 1 }
  0x3a   : > { %1881 = vmatprep.subr.mxu1 %v1576_v5  ;;  %1748 = vmatprep.mubr.f32.mxu0 %v2199_v55  ;;  %v430_v55 = vadd.s32 104, %v2153_v31 }
  0x3b   : > { %1804 = vmatprep.mubr.msk.f32.mxu1 %vm1600_vm3, %v327_v6  ;;  %1829 = vmatpush3.msra.mxu0 %v1576_v5  ;;  %v1566_v6 = vld [vmem:[%s2464_s2 + $0x110] sm:$0xff] }
  0x3c   : > { %1897 = vmatpush3.msra.mxu1 %v1576_v5  ;;  %1749 = vmatmul.mubr.f32.gmra.mxu0 %v2208_v59  ;;  %v418_v5 = vadd.s32 8, %v2153_v31  ;;  %v528_v45 = vand.u32 15, %v430_v55 }
  0x3d   : > { %1805 = vmatmul.mubr.f32.gmra.mxu1 %v329_v9  ;;  %1830 = vmatprep.subr.mxu0 %v1575_v12  ;;  %v426_v9 = vadd.s32 72, %v2153_v31 }
  0x3e   : > { %1882 = vmatprep.subr.mxu1 %v1575_v12  ;;  %1831 = vmatpush3.msra.mxu0 %v1575_v12  ;;  %v444_v10 = vand.u32 15, %v418_v5  ;;  %vm1612_vm15 = vcmp.ne.s32.totalorder %v528_v45, 15 }
  0x3f   : > { %1898 = vmatpush3.msra.mxu1 %v1575_v12  ;;  %1832 = vmatprep.subr.mxu0 %v1574_v17  ;;  %v349_v12 = vsel %vm318_vm0, %v346_v1, %v348_v24  ;;  %v500_v30 = vand.u32 15, %v426_v9 }
  0x40   : > { %1883 = vmatprep.subr.mxu1 %v1574_v17  ;;  %1751 = vmatprep.mubr.f32.mxu0 %v2220_v3  ;;  %vm2349_vm10 = vcmp.ne.s32.totalorder %v444_v10, 15  ;;  %v380_v3 = vsel %vm367_vm9, %v377_v38, %v379_v43 }
  0x41   : > { %1807 = vmatprep.mubr.msk.f32.mxu1 %vm1601_vm4, %v331_v18  ;;  %1833 = vmatpush3.msra.mxu0 %v1574_v17  ;;  %v385_v18 = vrot.slane %v2250_v19, 1  ;;  %vm1610_vm11 = vcmp.ne.s32.totalorder %v500_v30, 15 }
  0x42   : > { %1899 = vmatpush3.msra.mxu1 %v1574_v17  ;;  %1752 = vmatmul.mubr.f32.gmra.mxu0 %v2229_v7  ;;  %v383_v17 = vrot.slane %v2241_v15, 1 }
  0x43   : > { %1808 = vmatmul.mubr.f32.gmra.mxu1 %v333_v21  ;;  %1834 = vmatprep.subr.mxu0 %v1573_v25  ;;  %v387_v21 = vrot.slane %v2262_v28, 1 }
  0x44   : > { %1884 = vmatprep.subr.mxu1 %v1573_v25  ;;  %1835 = vmatpush3.msra.mxu0 %v1573_v25  ;;  %v386_v46 = vsel %vm367_vm9, %v383_v17, %v385_v18 }
  0x45   : > { %1900 = vmatpush3.msra.mxu1 %v1573_v25  ;;  %1836 = vmatprep.subr.mxu0 %v1572_v33 }
  0x46   : > { %1885 = vmatprep.subr.mxu1 %v1572_v33  ;;  %1754 = vmatprep.mubr.f32.mxu0 %v2241_v15 }
  0x47   : > { %1810 = vmatprep.mubr.msk.f32.mxu1 %vm1602_vm5, %v335_v34  ;;  %1837 = vmatpush3.msra.mxu0 %v1572_v33  ;;  %v388_v34 = vsel %vm367_vm9, %v385_v18, %v387_v21 }
  0x48   : > { %1901 = vmatpush3.msra.mxu1 %v1572_v33  ;;  %1755 = vmatmul.mubr.f32.gmra.mxu0 %v2250_v19  ;;  %v389_v19 = vrot.slane %v2271_v35, 1  ;;  %v514_v33 = vand.u32 15, %v428_v20 }
  0x49   : > { %1811 = vmatmul.mubr.f32.gmra.mxu1 %v337_v37  ;;  %1838 = vmatprep.subr.mxu0 %v1571_v40 }
  0x4a   : > { %1886 = vmatprep.subr.mxu1 %v1571_v40  ;;  %1839 = vmatpush3.msra.mxu0 %v1571_v40  ;;  %v390_v37 = vsel %vm367_vm9, %v387_v21, %v389_v19  ;;  %v392_v41 = vsel %vm367_vm9, %v389_v19, %v391_v27  ;;  %vm1611_vm13 = vcmp.ne.s32.totalorder %v514_v33, 15 }
  0x4b   : > { %1902 = vmatpush3.msra.mxu1 %v1571_v40  ;;  %1840 = vmatprep.subr.mxu0 %v1570_v47  ;;  %v376_v40 = vsel %vm367_vm9, %v373_v22, %v375_v26 }
  0x4c   : > { %1887 = vmatprep.subr.mxu1 %v1570_v47  ;;  %1757 = vmatprep.mubr.f32.mxu0 %v2262_v28  ;;  %v372_v28 = vsel %vm367_vm9, %v369_v14, %v371_v11 }
  0x4d   : > { %1813 = vmatprep.mubr.msk.f32.mxu1 %vm1603_vm6, %v339_v48  ;;  %1841 = vmatpush3.msra.mxu0 %v1570_v47  ;;  %v432_v48 = vadd.s32 120, %v2153_v31 }
  0x4e   : > { %1903 = vmatpush3.msra.mxu1 %v1570_v47  ;;  %1758 = vmatmul.mubr.f32.gmra.mxu0 %v2271_v35  ;;  %v422_v35 = vadd.s32 40, %v2153_v31  ;;  %v424_v47 = vadd.s32 56, %v2153_v31 }
  0x4f   : > { %1814 = vmatmul.mubr.f32.gmra.mxu1 %v341_v51  ;;  %1842 = vmatprep.subr.mxu0 %v1569_v54  ;;  %v381_v51 = vrot.slane %v2229_v7, 1  ;;  %v542_v31 = vand.u32 15, %v432_v48 }
  0x50   : > { %1888 = vmatprep.subr.mxu1 %v1569_v54  ;;  %1843 = vmatpush3.msra.mxu0 %v1569_v54  ;;  %v472_v59 = vand.u32 15, %v422_v35 }
  0x51   : > { %1904 = vmatpush3.msra.mxu1 %v1569_v54  ;;  %1844 = vmatprep.subr.mxu0 %v1568_v61  ;;  %v486_v54 = vand.u32 15, %v424_v47  ;;  %v382_v56 = vsel %vm367_vm9, %v379_v43, %v381_v51  ;;  %v384_v7 = vsel %vm367_vm9, %v381_v51, %v383_v17  ;;  %vm1613_vm1 = vcmp.ne.s32.totalorder %v542_v31, 15 }
  0x52   : > { %1889 = vmatprep.subr.mxu1 %v1568_v61  ;;  %1760 = vmatprep.mubr.f32.mxu0 %v2283_v44  ;;  %v395_v44 = vrot.slane %v2304_v58, 1  ;;  %vm1608_vm14 = vcmp.ne.s32.totalorder %v472_v59, 15 }
  0x53   : > { %1816 = vmatprep.mubr.msk.f32.mxu1 %vm1604_vm7, %v343_v62  ;;  %1845 = vmatpush3.msra.mxu0 %v1568_v61  ;;  %vm1609_vm0 = vcmp.ne.s32.totalorder %v486_v54, 15 }
  0x54   : > { %1905 = vmatpush3.msra.mxu1 %v1568_v61  ;;  %1761 = vmatmul.mubr.f32.gmra.mxu0 %v2292_v49  ;;  %v378_v49 = vsel %vm367_vm9, %v375_v26, %v377_v38  ;;  %v396_v53 = vsel %vm367_vm9, %v393_v39, %v395_v44  ;;  %v398_v57 = vsel %vm367_vm9, %v395_v44, %v397_v52 }
  0x55   : > { %1817 = vmatmul.mubr.f32.gmra.mxu1 %v345_v0  ;;  %1846 = vmatprep.subr.mxu0 %v1567_v4 }
  0x56   : > { %1890 = vmatprep.subr.mxu1 %v1567_v4  ;;  %1847 = vmatpush3.msra.mxu0 %v1567_v4 }
  0x57   : > { %1906 = vmatpush3.msra.mxu1 %v1567_v4  ;;  %1848 = vmatprep.subr.mxu0 %v1566_v6 }
  0x58   : > { %1891 = vmatprep.subr.mxu1 %v1566_v6  ;;  %1763 = vmatprep.mubr.f32.mxu0 %v2304_v58  ;;  %v415_v58 = vsel %vm367_vm9, %v397_v52, 0.0 }
  0x59   : > { %1819 = vmatprep.mubr.msk.f32.mxu1 %vm1605_vm8, %v347_v8  ;;  %1849 = vmatpush3.msra.mxu0 %v1566_v6 }
  0x5a   : > { %1907 = vmatpush3.msra.mxu1 %v1566_v6  ;;  %1764 = vmatmul.mubr.f32.gmra.mxu0 %v2313_v63 }
  0x5b   : > { %1820 = vmatmul.mubr.f32.gmra.mxu1 %v349_v12  ;;  %1850 = vmatprep.subr.mxu0 %v1565_v16 }
  0x5c   : > { %1892 = vmatprep.subr.mxu1 %v1565_v16  ;;  %1851 = vmatpush3.msra.mxu0 %v1565_v16 }
  0x5d   : > { %1908 = vmatpush3.msra.mxu1 %v1565_v16  ;;  %1852 = vmatprep.subr.mxu0 %v1564_v32 }
  0x5e   : > { %1893 = vmatprep.subr.mxu1 %v1564_v32  ;;  %1853 = vmatpush3.msra.mxu0 %v1564_v32 }
  0x5f   : > { %1909 = vmatpush3.msra.mxu1 %v1564_v32  ;;  %1854 = vmatprep.mubr.f32.mxu0 %v370_v23 }
  0x60   : > { %1866 = vmatprep.mubr.f32.mxu1 %v386_v46  ;;  %1855 = vmatmul.mubr.msk.f32.vlgmr.msra.gmra.mxu0 %vm2349_vm10, %v372_v28 }
  0x61   : > { %1867 = vmatmul.mubr.msk.f32.vlgmr.msra.gmra.mxu1 %vm1610_vm11, %v388_v34  ;;  %1857 = vmatprep.mubr.f32.mxu0 %v374_v36 }
  0x62   : > { %1869 = vmatprep.mubr.f32.mxu1 %v390_v37 }
  0x64   : > { %1858 = vmatmul.mubr.msk.f32.gmra.mxu0 %vm1607_vm12, %v376_v40 }
  0x65   : > { %1870 = vmatmul.mubr.msk.f32.gmra.mxu1 %vm1611_vm13, %v392_v41  ;;  %1860 = vmatprep.mubr.f32.mxu0 %v378_v49 }
  0x66   : > { %1872 = vmatprep.mubr.f32.mxu1 %v394_v50 }
  0x68   : > { %1861 = vmatmul.mubr.msk.f32.gmra.mxu0 %vm1608_vm14, %v380_v3 }
  0x69   : > { %1873 = vmatmul.mubr.msk.f32.gmra.mxu1 %vm1612_vm15, %v396_v53  ;;  %1863 = vmatprep.mubr.f32.mxu0 %v382_v56 }
  0x6a   : > { %1875 = vmatprep.mubr.f32.mxu1 %v398_v57 }
  0x6c   : > { %1864 = vmatmul.mubr.msk.f32.gmra.mxu0 %vm1609_vm0, %v384_v7 }
  0x6d   : > { %1876 = vmatmul.mubr.msk.f32.gmra.mxu1 %vm1613_vm1, %v415_v58 }
  0xf0   : > { %v1744_v60 = vpop.f32.mrf.mxu0 }
  0xf1   : > { %v1800_v61 = vpop.f32.mrf.mxu1 }
  0xf2   : > { %v852_v62 = vpop.f32.mrf.mxu0  ;;  %v1003_v27 = vadd.f32 %v1800_v61, %v1744_v60 }
  0xf3   : > { %v997_v63 = vpop.f32.mrf.mxu1 }
  0xf4   : > { %v998_v33 = vadd.f32 %v997_v63, %v852_v62 }
  0xf6   : > { %v1747_v0 = vpop.f32.mrf.mxu0 }
  0xf7   : > { %v1803_v1 = vpop.f32.mrf.mxu1 }
  0xf8   : > { %v862_v2 = vpop.f32.mrf.mxu0  ;;  %v1013_v34 = vadd.f32 %v1803_v1, %v1747_v0 }
  0xf9   : > { %v1007_v4 = vpop.f32.mrf.mxu1 }
  0xfa   : > { %v1008_v36 = vadd.f32 %v1007_v4, %v862_v2 }
  0xfc   : > { %v1750_v5 = vpop.f32.mrf.mxu0 }
  0xfd   : > { %v1806_v24 = vpop.f32.mrf.mxu1 }
  0xfe   : > { %v872_v6 = vpop.f32.mrf.mxu0  ;;  %v1023_v37 = vadd.f32 %v1806_v24, %v1750_v5 }
  0xff   : > { %v1017_v15 = vpop.f32.mrf.mxu1 }
 0x100   : > { %v1018_v59 = vadd.f32 %v1017_v15, %v872_v6 }
 0x102   : > { %v1753_v8 = vpop.f32.mrf.mxu0 }
 0x103   : > { %v1809_v9 = vpop.f32.mrf.mxu1 }
 0x104   : > { %v882_v10 = vpop.f32.mrf.mxu0  ;;  %v1033_v45 = vadd.f32 %v1809_v9, %v1753_v8 }
 0x105   : > { %v1027_v11 = vpop.f32.mrf.mxu1 }
 0x106   : > { %v2403_v54 = vadd.f32 %v1027_v11, %v882_v10 }
 0x108   : > { %v1756_v12 = vpop.f32.mrf.mxu0 }
 0x109   : > { %v1812_v13 = vpop.f32.mrf.mxu1 }
 0x10a   : > { %v892_v14 = vpop.f32.mrf.mxu0  ;;  %v1043_v46 = vadd.f32 %v1812_v13, %v1756_v12 }
 0x10b   : > { %v1037_v16 = vpop.f32.mrf.mxu1 }
 0x10c   : > { %v1038_v38 = vadd.f32 %v1037_v16, %v892_v14 }
 0x10e   : > { %v1759_v17 = vpop.f32.mrf.mxu0 }
 0x10f   : > { %v1815_v18 = vpop.f32.mrf.mxu1 }
 0x110   : > { %v902_v42 = vpop.f32.mrf.mxu0  ;;  %v1053_v39 = vadd.f32 %v1815_v18, %v1759_v17 }
 0x111   : > { %v1047_v20 = vpop.f32.mrf.mxu1 }
 0x112   : > { %v1048_v31 = vadd.f32 %v1047_v20, %v902_v42 }
 0x114   : > { %v1762_v21 = vpop.f32.mrf.mxu0 }
 0x115   : > { %v1818_v30 = vpop.f32.mrf.mxu1 }
 0x116   : > { %v912_v32 = vpop.f32.mrf.mxu0  ;;  %v1063_v6 = vadd.f32 %v1818_v30, %v1762_v21 }
 0x117   : > { %v1057_v22 = vpop.f32.mrf.mxu1 }
 0x118   : > { %v1058_v15 = vadd.f32 %v1057_v22, %v912_v32 }
 0x11a   : > { %v2386_v19 = vpop.f32.mrf.mxu0 }
 0x11b   : > { %v2388_v23 = vpop.f32.mrf.mxu1 }
 0x11c   : > { %v2390_v25 = vpop.f32.mrf.mxu0 }
 0x11d   : > { %v2392_v26 = vpop.f32.mrf.mxu1 }
 0x120   : > { %v1856_v28 = vpop.f32.mrf.mxu0 }
 0x121   : > { %v1868_v29 = vpop.f32.mrf.mxu1  ;;  %v1239_v35 = vadd.f32 %v1856_v28, %v1003_v27 }
 0x122   : > { %v1247_v55 = vadd.f32 %v1868_v29, %v1043_v46  ;;  %v1159_v40 = vpop.f32.mrf.mxu0 }
 0x123   : > { %v1199_v41 = vpop.f32.mrf.mxu1  ;;  %vm1255_vm2 = vcmp.ge.f32.partialorder %v1239_v35, 0.0  ;;  %v1271_v43 = vmul.f32 0.01, %v1239_v35  ;;  %v1238_v47 = vadd.f32 %v1159_v40, %v998_v33 }
 0x124   : > { %vm1263_vm3 = vcmp.ge.f32.partialorder %v1247_v55, 0.0  ;;  %v1279_v44 = vmul.f32 0.01, %v1247_v55  ;;  %v1246_v48 = vadd.f32 %v1199_v41, %v1038_v38  ;;  %v1859_v49 = vpop.f32.mrf.mxu0 }
 0x125   : > { %v1871_v50 = vpop.f32.mrf.mxu1  ;;  %v1287_v51 = vsel %vm1255_vm2, %v1239_v35, %v1271_v43  ;;  %v1241_v3 = vadd.f32 %v1859_v49, %v1013_v34  ;;  %vm1254_vm4 = vcmp.ge.f32.partialorder %v1238_v47, 0.0  ;;  %v1270_v56 = vmul.f32 0.01, %v1238_v47 }
 0x126   : > { %v2401_v52 = vsel %vm1263_vm3, %v1247_v55, %v1279_v44  ;;  %v1249_v53 = vadd.f32 %v1871_v50, %v1053_v39  ;;  %1303 = vst [vmem:[%s2399_s27 + $0x8] sm:$0xff] %v1287_v51  ;;  %v1169_v57 = vpop.f32.mrf.mxu0  ;;  %vm1262_vm5 = vcmp.ge.f32.partialorder %v1246_v48, 0.0  ;;  %v1278_v58 = vmul.f32 0.01, %v1246_v48 }
 0x127   : > { %1311 = vst [vmem:[%s2399_s27 + $0x48] sm:$0xff] %v2401_v52  ;;  %v1209_v7 = vpop.f32.mrf.mxu1  ;;  %vm1257_vm6 = vcmp.ge.f32.partialorder %v1241_v3, 0.0  ;;  %v1273_v60 = vmul.f32 0.01, %v1241_v3  ;;  %v1286_v61 = vsel %vm1254_vm4, %v1238_v47, %v1270_v56  ;;  %v1240_v63 = vadd.f32 %v1169_v57, %v1008_v36 }
 0x128   : > { %vm1265_vm7 = vcmp.ge.f32.partialorder %v1249_v53, 0.0  ;;  %v1281_v62 = vmul.f32 0.01, %v1249_v53  ;;  %v1862_v0 = vpop.f32.mrf.mxu0  ;;  %v1341_v2 = vmul.f32 %v1287_v51, %v1287_v51  ;;  %1302 = vst [vmem:[%s2399_s27] sm:$0xff] %v1286_v61  ;;  %v1340_v4 = vmul.f32 %v1286_v61, %v1286_v61 }
 0x129   : > { %v1874_v1 = vpop.f32.mrf.mxu1  ;;  %v2409_v5 = vsel %vm1262_vm5, %v1246_v48, %v1278_v58  ;;  %v1289_v24 = vsel %vm1257_vm6, %v1241_v3, %v1273_v60  ;;  %vm1256_vm8 = vcmp.ge.f32.partialorder %v1240_v63, 0.0  ;;  %v1318_v11 = vadd.f32 %v1287_v51, %v1286_v61 }
 0x12a   : > { %1310 = vst [vmem:[%s2399_s27 + $0x40] sm:$0xff] %v2409_v5  ;;  %1305 = vst [vmem:[%s2399_s27 + $0x18] sm:$0xff] %v1289_v24  ;;  %v2414_v8 = vsel %vm1265_vm7, %v1249_v53, %v1281_v62  ;;  %v1179_v9 = vpop.f32.mrf.mxu0  ;;  %v1356_v12 = vadd.f32 %v1341_v2, %v1340_v4  ;;  %v1272_v13 = vmul.f32 0.01, %v1240_v63  ;;  %v1248_v14 = vadd.f32 %v1209_v7, %v1048_v31 }
 0x12b   : > { %v1219_v10 = vpop.f32.mrf.mxu1  ;;  %1313 = vst [vmem:[%s2399_s27 + $0x58] sm:$0xff] %v2414_v8  ;;  %v1243_v16 = vadd.f32 %v1862_v0, %v1023_v37  ;;  %v1251_v17 = vadd.f32 %v1874_v1, %v1063_v6  ;;  %v1242_v18 = vadd.f32 %v1179_v9, %v1018_v59  ;;  %v1343_v34 = vmul.f32 %v1289_v24, %v1289_v24 }
 0x12c   : > { %v1250_v42 = vadd.f32 %v1219_v10, %v1058_v15  ;;  %v1865_v20 = vpop.f32.mrf.mxu0  ;;  %v1288_v21 = vsel %vm1256_vm8, %v1240_v63, %v1272_v13  ;;  %vm1264_vm9 = vcmp.ge.f32.partialorder %v1248_v14, 0.0  ;;  %v1280_v30 = vmul.f32 0.01, %v1248_v14 }
 0x12d   : > { %v1245_v32 = vadd.f32 %v1865_v20, %v1033_v45  ;;  %v1877_v22 = vpop.f32.mrf.mxu1  ;;  %1304 = vst [vmem:[%s2399_s27 + $0x10] sm:$0xff] %v1288_v21  ;;  %v1319_v27 = vadd.f32 %v1318_v11, %v1288_v21  ;;  %v1342_v46 = vmul.f32 %v1288_v21, %v1288_v21  ;;  %vm1259_vm10 = vcmp.ge.f32.partialorder %v1243_v16, 0.0 }
 0x12e   : > { %v1275_v28 = vmul.f32 0.01, %v1243_v16  ;;  %v1296_v29 = vsel %vm1264_vm9, %v1248_v14, %v1280_v30  ;;  %vm1267_vm11 = vcmp.ge.f32.partialorder %v1251_v17, 0.0  ;;  %v1283_v33 = vmul.f32 0.01, %v1251_v17  ;;  %v1189_v40 = vpop.f32.mrf.mxu0 }
 0x12f   : > { %vm1258_vm12 = vcmp.ge.f32.partialorder %v1242_v18, 0.0  ;;  %v1357_v35 = vadd.f32 %v1356_v12, %v1342_v46  ;;  %1312 = vst [vmem:[%s2399_s27 + $0x50] sm:$0xff] %v1296_v29  ;;  %v1274_v36 = vmul.f32 0.01, %v1242_v18  ;;  %v1073_v37 = vadd.f32 %v2388_v23, %v2386_v19  ;;  %v1229_v41 = vpop.f32.mrf.mxu1 }
 0x130   : > { %v1291_v55 = vsel %vm1259_vm10, %v1243_v16, %v1275_v28  ;;  %v1299_v38 = vsel %vm1267_vm11, %v1251_v17, %v1283_v33  ;;  %v1320_v39 = vadd.f32 %v1319_v27, %v1289_v24  ;;  %vm1266_vm13 = vcmp.ge.f32.partialorder %v1250_v42, 0.0 }
 0x131   : > { %1307 = vst [vmem:[%s2399_s27 + $0x28] sm:$0xff] %v1291_v55  ;;  %v1068_v43 = vadd.f32 %v2392_v26, %v2390_v25  ;;  %1315 = vst [vmem:[%s2399_s27 + $0x68] sm:$0xff] %v1299_v38  ;;  %v1290_v44 = vsel %vm1258_vm12, %v1242_v18, %v1274_v36  ;;  %v1358_v59 = vadd.f32 %v1357_v35, %v1343_v34  ;;  %v1282_v45 = vmul.f32 0.01, %v1250_v42 }
 0x132   : > { %1306 = vst [vmem:[%s2399_s27 + $0x20] sm:$0xff] %v1290_v44  ;;  %v1321_v47 = vadd.f32 %v1320_v39, %v1290_v44  ;;  %v1344_v48 = vmul.f32 %v1290_v44, %v1290_v44  ;;  %vm1261_vm14 = vcmp.ge.f32.partialorder %v1245_v32, 0.0  ;;  %v1277_v19 = vmul.f32 0.01, %v1245_v32 }
 0x133   : > { %v1298_v23 = vsel %vm1266_vm13, %v1250_v42, %v1282_v45  ;;  %v1253_v49 = vadd.f32 %v1877_v22, %v1073_v37  ;;  %v1244_v50 = vadd.f32 %v1189_v40, %v2403_v54  ;;  %v1252_v51 = vadd.f32 %v1229_v41, %v1068_v43 }
 0x134   : > { %v1345_v3 = vmul.f32 %v1291_v55, %v1291_v55  ;;  %v1359_v53 = vadd.f32 %v1358_v59, %v1344_v48  ;;  %1314 = vst [vmem:[%s2399_s27 + $0x60] sm:$0xff] %v1298_v23  ;;  %v1293_v25 = vsel %vm1261_vm14, %v1245_v32, %v1277_v19  ;;  %v1322_v31 = vadd.f32 %v1321_v47, %v1291_v55 }
 0x135   : > { %1309 = vst [vmem:[%s2399_s27 + $0x38] sm:$0xff] %v1293_v25  ;;  %vm1269_vm15 = vcmp.ge.f32.partialorder %v1253_v49, 0.0  ;;  %v1285_v26 = vmul.f32 0.01, %v1253_v49  ;;  %vm1260_vm0 = vcmp.ge.f32.partialorder %v1244_v50, 0.0  ;;  %vm1268_vm1 = vcmp.ge.f32.partialorder %v1252_v51, 0.0 }
 0x136   : > { %v1276_v56 = vmul.f32 0.01, %v1244_v50  ;;  %v1284_v57 = vmul.f32 0.01, %v1252_v51  ;;  %v1360_v58 = vadd.f32 %v1359_v53, %v1345_v3  ;;  %v1347_v63 = vmul.f32 %v1293_v25, %v1293_v25 }
 0x137   : > { %v1301_v7 = vsel %vm1269_vm15, %v1253_v49, %v1285_v26  ;;  %v1348_v2 = vmul.f32 %v2409_v5, %v2409_v5  ;;  %v1349_v6 = vmul.f32 %v2401_v52, %v2401_v52  ;;  %v1350_v10 = vmul.f32 %v1296_v29, %v1296_v29 }
 0x138   : > { %1317 = vst [vmem:[%s2399_s27 + $0x78] sm:$0xff] %v1301_v7  ;;  %v1292_v54 = vsel %vm1260_vm0, %v1244_v50, %v1276_v56  ;;  %v1300_v60 = vsel %vm1268_vm1, %v1252_v51, %v1284_v57  ;;  %v1351_v13 = vmul.f32 %v2414_v8, %v2414_v8  ;;  %v1352_v17 = vmul.f32 %v1298_v23, %v1298_v23 }
 0x139   : > { %1308 = vst [vmem:[%s2399_s27 + $0x30] sm:$0xff] %v1292_v54  ;;  %v1323_v61 = vadd.f32 %v1322_v31, %v1292_v54  ;;  %v1346_v62 = vmul.f32 %v1292_v54, %v1292_v54  ;;  %1316 = vst [vmem:[%s2399_s27 + $0x70] sm:$0xff] %v1300_v60  ;;  %v1353_v42 = vmul.f32 %v1299_v38, %v1299_v38 }
 0x13a   : > { %v1355_v22 = vmul.f32 %v1301_v7, %v1301_v7 }
 0x13b   : > { %v1324_v0 = vadd.f32 %v1323_v61, %v1293_v25  ;;  %v1361_v1 = vadd.f32 %v1360_v58, %v1346_v62 }
 0x13d   : > { %v1325_v4 = vadd.f32 %v1324_v0, %v2409_v5  ;;  %v1362_v24 = vadd.f32 %v1361_v1, %v1347_v63 }
 0x13f   : > { %v1326_v15 = vadd.f32 %v1325_v4, %v2401_v52  ;;  %v1363_v9 = vadd.f32 %v1362_v24, %v1348_v2  ;;  %v1354_v52 = vmul.f32 %v1300_v60, %v1300_v60 }
 0x141   : > { %v1364_v11 = vadd.f32 %v1363_v9, %v1349_v6  ;;  %v1327_v12 = vadd.f32 %v1326_v15, %v1296_v29 }
 0x143   : > { %v1328_v14 = vadd.f32 %v1327_v12, %v2414_v8  ;;  %v1365_v16 = vadd.f32 %v1364_v11, %v1350_v10 }
 0x145   : > { %v1329_v5 = vadd.f32 %v1328_v14, %v1298_v23  ;;  %v1366_v18 = vadd.f32 %v1365_v16, %v1351_v13 }
 0x147   : > { %v1330_v20 = vadd.f32 %v1329_v5, %v1299_v38  ;;  %v1367_v21 = vadd.f32 %v1366_v18, %v1352_v17 }
 0x149   : > { %v1331_v30 = vadd.f32 %v1330_v20, %v1300_v60  ;;  %v1368_v32 = vadd.f32 %v1367_v21, %v1353_v42 }
 0x14b   : > { %v1332_v27 = vadd.f32 %v1331_v30, %v1301_v7  ;;  %v1369_v46 = vadd.f32 %v1368_v32, %v1354_v52 }
 0x14d   : > { %v1333_v28 = vrot.slane %v1332_v27, 4  ;;  %v1370_v29 = vadd.f32 %v1369_v46, %v1355_v22 }
 0x14f   : > { %v1334_v8 = vadd.f32 %v1333_v28, %v1332_v27  ;;  %v1371_v33 = vrot.slane %v1370_v29, 4 }
 0x151   : > { %v1335_v34 = vrot.slane %v1334_v8, 2  ;;  %v1372_v35 = vadd.f32 %v1371_v33, %v1370_v29 }
 0x153   : > { %v1336_v55 = vadd.f32 %v1335_v34, %v1334_v8  ;;  %v1373_v36 = vrot.slane %v1372_v35, 2 }
 0x155   : > { %v1337_v37 = vrot.slane %v1336_v55, 1  ;;  %v1374_v38 = vadd.f32 %v1373_v36, %v1372_v35 }
 0x157   : > { %v1338_v39 = vadd.f32 %v1337_v37, %v1336_v55  ;;  %v1375_v40 = vrot.slane %v1374_v38, 1 }
 0x159   : > { %1339 = vst [vmem:[%s260_s30] sm:$0x1] %v1338_v39  ;;  %v1376_v41 = vadd.f32 %v1375_v40, %v1374_v38 }
 0x15b   : > { %1377 = vst [vmem:[%s260_s30 + $0x1] sm:$0x1] %v1376_v41 }
 0x15c PF: > { %s15_s19 = sadd.s32 1, %s1988_s19   ;;  %s2469_s15 = smov %s1980_s17 }
 0x15d   : > { %p12_p8 = scmp.ge.s32.totalorder %s15_s19, 6   ;;  %s2470_s16 = smov %s1984_s18 }
 0x15e   : > { %s2471_s17 = smov %s2474_s20  ;;  %s2472_s18 = smov %s2478_s21 }
 0x15f   :  { %14 = sbr.rel (!%p12_p8) target bundleno = 3 (0x3), region = 76 }

// kernel: res_context_block.9
= control target key start
LH: loop header
LB: loop body
LE: loop exit
PB: predicated region body
PF: predicated region fallthrough
CT: control target
= control target key end

     0   :  { %s625_s15 = smov 0   ;;  %s900_s0 = inlined_call_operand.vmem [shape: f32[512,128], index: 0, kind: input, shape index: {}]   ;;  %s901_s1 = inlined_call_operand.vmem [shape: f32[512,128], index: 1, kind: input, shape index: {}]   ;;  %s902_s2 = inlined_call_operand.vmem [shape: f32[2,128], index: 2, kind: input, shape index: {}]   ;;  %s903_s3 = inlined_call_operand.vmem [shape: f32[2,128], index: 3, kind: input, shape index: {}]   ;;  %s904_s4 = inlined_call_operand.vmem [shape: f32[512,128], index: 4, kind: output, shape index: {}]  }
   0x1 LB: > { %s567_s16 = sadd.s32 4294967295, %s598_s15   ;;  %p571_p0 = scmp.ge.s32.totalorder %s598_s15, 1  ;;  %s598_s15 = sphi %s625_s15, %s14_s15  }
   0x2   : > { %p174_p1 = scmp.lt.s32.totalorder %s598_s15, 3 }
   0x4   : > { %p175_p2 = pnand %p571_p0, %p174_p1 }
   0x5   : > { %s572_s17 = sshll.u32 (!%p175_p2), %s567_s16, 5 }
   0x6   : > { %178 = sbr.rel (%p175_p2) target bundleno = 62 (0x3e), region = 36  ;;  %p206_p3 = scmp.lt.s32.totalorder (!%p175_p2), %s572_s17, 63 }
   0xb   : > { %s906_s17 = smov (!%p206_p3, %s572_s17), 63  ;;  %v638_v0 = vld [vmem:[%s902_s2] ss:$0 sm:$0xff]  ;;  %v660_v2 = vld [vmem:[%s902_s2 + $0x1] ss:$0 sm:$0xff] }
   0xc   : > { %s633_s18 = sshll.u32 %s906_s17, 3  ;;  %v643_v1 = vld [vmem:[%s903_s3] ss:$0 sm:$0xff]  ;;  %v687_v25 = vld [vmem:[%s903_s3 + $0x1] ss:$0 sm:$0xff] }
   0xd   : > { %s649_s25 = scalar_lea.vmem %s900_s0, %s633_s18  ;;  %s655_s28 = scalar_lea.vmem %s901_s1, %s633_s18 }
   0xe   : > { %v223_v3 = vld [vmem:[%s649_s25] sm:$0xff]  ;;  %v224_v5 = vld [vmem:[%s649_s25 + $0x8] sm:$0xff]  ;;  %v225_v10 = vld [vmem:[%s649_s25 + $0x10] sm:$0xff]  ;;  %s701_s9 = scalar_lea.vmem %s904_s4, %s633_s18 }
   0xf   : > { %v329_v4 = vld [vmem:[%s655_s28] sm:$0xff]  ;;  %v260_v6 = vmul.f32 %v638_v0, %v223_v3  ;;  %v261_v8 = vmul.f32 %v638_v0, %v224_v5  ;;  %v330_v9 = vld [vmem:[%s655_s28 + $0x8] sm:$0xff]  ;;  %v331_v11 = vld [vmem:[%s655_s28 + $0x10] sm:$0xff]  ;;  %v262_v13 = vmul.f32 %v638_v0, %v225_v10 }
  0x10   : > { %v366_v7 = vmul.f32 %v643_v1, %v329_v4  ;;  %v367_v12 = vmul.f32 %v643_v1, %v330_v9  ;;  %v368_v14 = vmul.f32 %v643_v1, %v331_v11  ;;  %v226_v15 = vld [vmem:[%s649_s25 + $0x18] sm:$0xff]  ;;  %v227_v17 = vld [vmem:[%s649_s25 + $0x20] sm:$0xff]  ;;  %v228_v23 = vld [vmem:[%s649_s25 + $0x28] sm:$0xff] }
  0x11   : > { %v332_v16 = vld [vmem:[%s655_s28 + $0x18] sm:$0xff]  ;;  %v297_v18 = vadd.f32 %v660_v2, %v260_v6  ;;  %v298_v19 = vadd.f32 %v660_v2, %v261_v8  ;;  %v263_v20 = vmul.f32 %v638_v0, %v226_v15  ;;  %v333_v22 = vld [vmem:[%s655_s28 + $0x20] sm:$0xff]  ;;  %v334_v24 = vld [vmem:[%s655_s28 + $0x28] sm:$0xff]  ;;  %v299_v26 = vadd.f32 %v660_v2, %v262_v13 }
  0x12   : > { %v369_v21 = vmul.f32 %v643_v1, %v332_v16  ;;  %v264_v27 = vmul.f32 %v638_v0, %v227_v17  ;;  %v370_v28 = vmul.f32 %v643_v1, %v333_v22  ;;  %v265_v29 = vmul.f32 %v638_v0, %v228_v23  ;;  %v229_v30 = vld [vmem:[%s649_s25 + $0x30] sm:$0xff]  ;;  %v230_v40 = vld [vmem:[%s649_s25 + $0x38] sm:$0xff]  ;;  %v231_v42 = vld [vmem:[%s649_s25 + $0x40] sm:$0xff] }
  0x13   : > { %v335_v31 = vld [vmem:[%s655_s28 + $0x30] sm:$0xff]  ;;  %v398_v32 = vadd.f32 %v366_v7, %v297_v18  ;;  %v399_v33 = vadd.f32 %v367_v12, %v298_v19  ;;  %v300_v34 = vadd.f32 %v660_v2, %v263_v20  ;;  %v371_v35 = vmul.f32 %v643_v1, %v334_v24  ;;  %v336_v41 = vld [vmem:[%s655_s28 + $0x38] sm:$0xff]  ;;  %v337_v47 = vld [vmem:[%s655_s28 + $0x40] sm:$0xff] }
  0x14   : > { %v400_v36 = vadd.f32 %v368_v14, %v299_v26  ;;  %v301_v37 = vadd.f32 %v660_v2, %v264_v27  ;;  %v302_v38 = vadd.f32 %v660_v2, %v265_v29  ;;  %v266_v39 = vmul.f32 %v638_v0, %v229_v30  ;;  %v232_v52 = vld [vmem:[%s649_s25 + $0x48] sm:$0xff]  ;;  %v233_v58 = vld [vmem:[%s649_s25 + $0x50] sm:$0xff]  ;;  %v234_v60 = vld [vmem:[%s649_s25 + $0x58] sm:$0xff] }
  0x15   : > { %v435_v43 = vadd.f32 %v687_v25, %v398_v32  ;;  %v436_v44 = vadd.f32 %v687_v25, %v399_v33  ;;  %v401_v45 = vadd.f32 %v369_v21, %v300_v34  ;;  %v372_v46 = vmul.f32 %v643_v1, %v335_v31  ;;  %v338_v53 = vld [vmem:[%s655_s28 + $0x48] sm:$0xff]  ;;  %v339_v59 = vld [vmem:[%s655_s28 + $0x50] sm:$0xff]  ;;  %v340_v4 = vld [vmem:[%s655_s28 + $0x58] sm:$0xff] }
  0x16   : > { %v437_v48 = vadd.f32 %v687_v25, %v400_v36  ;;  %v402_v49 = vadd.f32 %v370_v28, %v301_v37  ;;  %v403_v50 = vadd.f32 %v371_v35, %v302_v38  ;;  %v303_v51 = vadd.f32 %v660_v2, %v266_v39  ;;  %v235_v9 = vld [vmem:[%s649_s25 + $0x60] sm:$0xff]  ;;  %v236_v15 = vld [vmem:[%s649_s25 + $0x68] sm:$0xff]  ;;  %v237_v26 = vld [vmem:[%s649_s25 + $0x70] sm:$0xff] }
  0x17   : > { %467 = vst [vmem:[%s701_s9] sm:$0xff] %v435_v43  ;;  %468 = vst [vmem:[%s701_s9 + $0x8] sm:$0xff] %v436_v44  ;;  %v438_v54 = vadd.f32 %v687_v25, %v401_v45  ;;  %v267_v55 = vmul.f32 %v638_v0, %v230_v40  ;;  %v373_v56 = vmul.f32 %v643_v1, %v336_v41  ;;  %v341_v10 = vld [vmem:[%s655_s28 + $0x60] sm:$0xff]  ;;  %v342_v20 = vld [vmem:[%s655_s28 + $0x68] sm:$0xff] }
  0x18   : > { %v268_v57 = vmul.f32 %v638_v0, %v231_v42  ;;  %469 = vst [vmem:[%s701_s9 + $0x10] sm:$0xff] %v437_v48  ;;  %v439_v61 = vadd.f32 %v687_v25, %v402_v49  ;;  %v440_v62 = vadd.f32 %v687_v25, %v403_v50  ;;  %v404_v63 = vadd.f32 %v372_v46, %v303_v51  ;;  %v343_v27 = vld [vmem:[%s655_s28 + $0x70] sm:$0xff]  ;;  %v238_v32 = vld [vmem:[%s649_s25 + $0x78] sm:$0xff]  ;;  %v239_v38 = vld [vmem:[%s649_s25 + $0x80] sm:$0xff] }
  0x19   : > { %v374_v3 = vmul.f32 %v643_v1, %v337_v47  ;;  %470 = vst [vmem:[%s701_s9 + $0x18] sm:$0xff] %v438_v54  ;;  %v304_v5 = vadd.f32 %v660_v2, %v267_v55  ;;  %v269_v7 = vmul.f32 %v638_v0, %v232_v52  ;;  %v375_v8 = vmul.f32 %v643_v1, %v338_v53  ;;  %v344_v37 = vld [vmem:[%s655_s28 + $0x78] sm:$0xff]  ;;  %v345_v43 = vld [vmem:[%s655_s28 + $0x80] sm:$0xff]  ;;  %v240_v44 = vld [vmem:[%s649_s25 + $0x88] sm:$0xff] }
  0x1a   : > { %v305_v6 = vadd.f32 %v660_v2, %v268_v57  ;;  %471 = vst [vmem:[%s701_s9 + $0x20] sm:$0xff] %v439_v61  ;;  %472 = vst [vmem:[%s701_s9 + $0x28] sm:$0xff] %v440_v62  ;;  %v441_v11 = vadd.f32 %v687_v25, %v404_v63  ;;  %v270_v12 = vmul.f32 %v638_v0, %v233_v58  ;;  %v346_v49 = vld [vmem:[%s655_s28 + $0x88] sm:$0xff]  ;;  %v241_v54 = vld [vmem:[%s649_s25 + $0x90] sm:$0xff] }
  0x1b   : > { %v376_v13 = vmul.f32 %v643_v1, %v339_v59  ;;  %v271_v14 = vmul.f32 %v638_v0, %v234_v60  ;;  %v405_v16 = vadd.f32 %v373_v56, %v304_v5  ;;  %v306_v18 = vadd.f32 %v660_v2, %v269_v7  ;;  %v347_v55 = vld [vmem:[%s655_s28 + $0x90] sm:$0xff]  ;;  %v242_v60 = vld [vmem:[%s649_s25 + $0x98] sm:$0xff]  ;;  %v243_v5 = vld [vmem:[%s649_s25 + $0xa0] sm:$0xff] }
  0x1c   : > { %v406_v17 = vadd.f32 %v374_v3, %v305_v6  ;;  %v377_v19 = vmul.f32 %v643_v1, %v340_v4  ;;  %473 = vst [vmem:[%s701_s9 + $0x30] sm:$0xff] %v441_v11  ;;  %v307_v21 = vadd.f32 %v660_v2, %v270_v12  ;;  %v272_v23 = vmul.f32 %v638_v0, %v235_v9  ;;  %v348_v61 = vld [vmem:[%s655_s28 + $0x98] sm:$0xff]  ;;  %v244_v11 = vld [vmem:[%s649_s25 + $0xa8] sm:$0xff] }
  0x1d   : > { %v308_v22 = vadd.f32 %v660_v2, %v271_v14  ;;  %v378_v24 = vmul.f32 %v643_v1, %v341_v10  ;;  %v442_v28 = vadd.f32 %v687_v25, %v405_v16  ;;  %v407_v30 = vadd.f32 %v375_v8, %v306_v18  ;;  %v349_v10 = vld [vmem:[%s655_s28 + $0xa0] sm:$0xff]  ;;  %v350_v16 = vld [vmem:[%s655_s28 + $0xa8] sm:$0xff] }
  0x1e   : > { %v443_v29 = vadd.f32 %v687_v25, %v406_v17  ;;  %v273_v31 = vmul.f32 %v638_v0, %v236_v15  ;;  %v408_v33 = vadd.f32 %v376_v13, %v307_v21  ;;  %v309_v35 = vadd.f32 %v660_v2, %v272_v23  ;;  %v245_v21 = vld [vmem:[%s649_s25 + $0xb0] sm:$0xff] }
  0x1f   : > { %v409_v34 = vadd.f32 %v377_v19, %v308_v22  ;;  %v379_v36 = vmul.f32 %v643_v1, %v342_v20  ;;  %474 = vst [vmem:[%s701_s9 + $0x38] sm:$0xff] %v442_v28  ;;  %v444_v39 = vadd.f32 %v687_v25, %v407_v30  ;;  %v274_v41 = vmul.f32 %v638_v0, %v237_v26  ;;  %v351_v22 = vld [vmem:[%s655_s28 + $0xb0] sm:$0xff]  ;;  %v246_v28 = vld [vmem:[%s649_s25 + $0xb8] sm:$0xff] }
  0x20   : > { %475 = vst [vmem:[%s701_s9 + $0x40] sm:$0xff] %v443_v29  ;;  %v310_v40 = vadd.f32 %v660_v2, %v273_v31  ;;  %v380_v42 = vmul.f32 %v643_v1, %v343_v27  ;;  %v445_v45 = vadd.f32 %v687_v25, %v408_v33  ;;  %v410_v47 = vadd.f32 %v378_v24, %v309_v35  ;;  %v352_v29 = vld [vmem:[%s655_s28 + $0xb8] sm:$0xff] }
  0x21   : > { %v446_v46 = vadd.f32 %v687_v25, %v409_v34  ;;  %v275_v48 = vmul.f32 %v638_v0, %v238_v32  ;;  %476 = vst [vmem:[%s701_s9 + $0x48] sm:$0xff] %v444_v39  ;;  %v311_v51 = vadd.f32 %v660_v2, %v274_v41  ;;  %v381_v52 = vmul.f32 %v643_v1, %v344_v37  ;;  %v247_v34 = vld [vmem:[%s649_s25 + $0xc0] sm:$0xff] }
  0x22   : > { %v411_v50 = vadd.f32 %v379_v36, %v310_v40  ;;  %v276_v53 = vmul.f32 %v638_v0, %v239_v38  ;;  %477 = vst [vmem:[%s701_s9 + $0x50] sm:$0xff] %v445_v45  ;;  %v447_v56 = vadd.f32 %v687_v25, %v410_v47  ;;  %v382_v58 = vmul.f32 %v643_v1, %v345_v43  ;;  %v353_v39 = vld [vmem:[%s655_s28 + $0xc0] sm:$0xff]  ;;  %v248_v40 = vld [vmem:[%s649_s25 + $0xc8] sm:$0xff] }
  0x23   : > { %478 = vst [vmem:[%s701_s9 + $0x58] sm:$0xff] %v446_v46  ;;  %v312_v57 = vadd.f32 %v660_v2, %v275_v48  ;;  %v277_v59 = vmul.f32 %v638_v0, %v240_v44  ;;  %v412_v63 = vadd.f32 %v380_v42, %v311_v51  ;;  %v383_v4 = vmul.f32 %v643_v1, %v346_v49  ;;  %v354_v45 = vld [vmem:[%s655_s28 + $0xc8] sm:$0xff]  ;;  %v355_v51 = vld [vmem:[%s655_s28 + $0xd0] sm:$0xff] }
  0x24   : > { %v448_v62 = vadd.f32 %v687_v25, %v411_v50  ;;  %v313_v3 = vadd.f32 %v660_v2, %v276_v53  ;;  %479 = vst [vmem:[%s701_s9 + $0x60] sm:$0xff] %v447_v56  ;;  %v278_v8 = vmul.f32 %v638_v0, %v241_v54  ;;  %v384_v9 = vmul.f32 %v643_v1, %v347_v55  ;;  %v249_v50 = vld [vmem:[%s649_s25 + $0xd0] sm:$0xff]  ;;  %v250_v56 = vld [vmem:[%s649_s25 + $0xd8] sm:$0xff] }
  0x25   : > { %v413_v6 = vadd.f32 %v381_v52, %v312_v57  ;;  %v314_v7 = vadd.f32 %v660_v2, %v277_v59  ;;  %v449_v12 = vadd.f32 %v687_v25, %v412_v63  ;;  %v279_v14 = vmul.f32 %v638_v0, %v242_v60  ;;  %v356_v57 = vld [vmem:[%s655_s28 + $0xd8] sm:$0xff] }
  0x26   : > { %480 = vst [vmem:[%s701_s9 + $0x68] sm:$0xff] %v448_v62  ;;  %v414_v13 = vadd.f32 %v382_v58, %v313_v3  ;;  %v385_v15 = vmul.f32 %v643_v1, %v348_v61  ;;  %v315_v19 = vadd.f32 %v660_v2, %v278_v8  ;;  %v280_v20 = vmul.f32 %v638_v0, %v243_v5  ;;  %v251_v62 = vld [vmem:[%s649_s25 + $0xe0] sm:$0xff] }
  0x27   : > { %v450_v17 = vadd.f32 %v687_v25, %v413_v6  ;;  %v415_v18 = vadd.f32 %v383_v4, %v314_v7  ;;  %481 = vst [vmem:[%s701_s9 + $0x70] sm:$0xff] %v449_v12  ;;  %v316_v24 = vadd.f32 %v660_v2, %v279_v14  ;;  %v386_v26 = vmul.f32 %v643_v1, %v349_v10  ;;  %v357_v6 = vld [vmem:[%s655_s28 + $0xe0] sm:$0xff]  ;;  %v252_v7 = vld [vmem:[%s649_s25 + $0xe8] sm:$0xff] }
  0x28   : > { %v451_v23 = vadd.f32 %v687_v25, %v414_v13  ;;  %v281_v27 = vmul.f32 %v638_v0, %v244_v11  ;;  %v416_v31 = vadd.f32 %v384_v9, %v315_v19  ;;  %v317_v32 = vadd.f32 %v660_v2, %v280_v20  ;;  %v358_v12 = vld [vmem:[%s655_s28 + $0xe8] sm:$0xff] }
  0x29   : > { %482 = vst [vmem:[%s701_s9 + $0x78] sm:$0xff] %v450_v17  ;;  %v452_v30 = vadd.f32 %v687_v25, %v415_v18  ;;  %v387_v33 = vmul.f32 %v643_v1, %v350_v16  ;;  %v417_v35 = vadd.f32 %v385_v15, %v316_v24  ;;  %v282_v37 = vmul.f32 %v638_v0, %v245_v21  ;;  %v253_v17 = vld [vmem:[%s649_s25 + $0xf0] sm:$0xff]  ;;  %v360_v24 = vld [vmem:[%s655_s28 + $0xf8] sm:$0xff] }
  0x2a   : > { %483 = vst [vmem:[%s701_s9 + $0x80] sm:$0xff] %v451_v23  ;;  %v318_v36 = vadd.f32 %v660_v2, %v281_v27  ;;  %v388_v38 = vmul.f32 %v643_v1, %v351_v22  ;;  %v453_v41 = vadd.f32 %v687_v25, %v416_v31  ;;  %v418_v42 = vadd.f32 %v386_v26, %v317_v32  ;;  %v359_v18 = vld [vmem:[%s655_s28 + $0xf0] sm:$0xff]  ;;  %v254_v23 = vld [vmem:[%s649_s25 + $0xf8] sm:$0xff] }
  0x2b   : > { %484 = vst [vmem:[%s701_s9 + $0x88] sm:$0xff] %v452_v30  ;;  %v283_v43 = vmul.f32 %v638_v0, %v246_v28  ;;  %v389_v44 = vmul.f32 %v643_v1, %v352_v29  ;;  %v454_v46 = vadd.f32 %v687_v25, %v417_v35  ;;  %v319_v48 = vadd.f32 %v660_v2, %v282_v37 }
  0x2c   : > { %v419_v47 = vadd.f32 %v387_v33, %v318_v36  ;;  %v284_v49 = vmul.f32 %v638_v0, %v247_v34  ;;  %485 = vst [vmem:[%s701_s9 + $0x90] sm:$0xff] %v453_v41  ;;  %v455_v52 = vadd.f32 %v687_v25, %v418_v42  ;;  %v390_v54 = vmul.f32 %v643_v1, %v353_v39 }
  0x2d   : > { %v320_v53 = vadd.f32 %v660_v2, %v283_v43  ;;  %v285_v55 = vmul.f32 %v638_v0, %v248_v40  ;;  %486 = vst [vmem:[%s701_s9 + $0x98] sm:$0xff] %v454_v46  ;;  %v420_v59 = vadd.f32 %v388_v38, %v319_v48  ;;  %v391_v61 = vmul.f32 %v643_v1, %v354_v45 }
  0x2e   : > { %v456_v58 = vadd.f32 %v687_v25, %v419_v47  ;;  %v321_v60 = vadd.f32 %v660_v2, %v284_v49  ;;  %487 = vst [vmem:[%s701_s9 + $0xa0] sm:$0xff] %v455_v52  ;;  %v286_v4 = vmul.f32 %v638_v0, %v249_v50  ;;  %v392_v5 = vmul.f32 %v643_v1, %v355_v51 }
  0x2f   : > { %v421_v63 = vadd.f32 %v389_v44, %v320_v53  ;;  %v322_v3 = vadd.f32 %v660_v2, %v285_v55  ;;  %v457_v8 = vadd.f32 %v687_v25, %v420_v59  ;;  %v287_v10 = vmul.f32 %v638_v0, %v250_v56 }
  0x30   : > { %488 = vst [vmem:[%s701_s9 + $0xa8] sm:$0xff] %v456_v58  ;;  %v422_v9 = vadd.f32 %v390_v54, %v321_v60  ;;  %v393_v11 = vmul.f32 %v643_v1, %v356_v57  ;;  %v323_v15 = vadd.f32 %v660_v2, %v286_v4  ;;  %v288_v16 = vmul.f32 %v638_v0, %v251_v62 }
  0x31   : > { %v458_v13 = vadd.f32 %v687_v25, %v421_v63  ;;  %v423_v14 = vadd.f32 %v391_v61, %v322_v3  ;;  %489 = vst [vmem:[%s701_s9 + $0xb0] sm:$0xff] %v457_v8  ;;  %v324_v20 = vadd.f32 %v660_v2, %v287_v10  ;;  %v394_v21 = vmul.f32 %v643_v1, %v357_v6 }
  0x32   : > { %v459_v19 = vadd.f32 %v687_v25, %v422_v9  ;;  %v289_v22 = vmul.f32 %v638_v0, %v252_v7  ;;  %v424_v27 = vadd.f32 %v392_v5, %v323_v15  ;;  %v325_v28 = vadd.f32 %v660_v2, %v288_v16 }
  0x33   : > { %490 = vst [vmem:[%s701_s9 + $0xb8] sm:$0xff] %v458_v13  ;;  %v460_v26 = vadd.f32 %v687_v25, %v423_v14  ;;  %v395_v29 = vmul.f32 %v643_v1, %v358_v12  ;;  %v425_v30 = vadd.f32 %v393_v11, %v324_v20  ;;  %v290_v32 = vmul.f32 %v638_v0, %v253_v17 }
  0x34   : > { %491 = vst [vmem:[%s701_s9 + $0xc0] sm:$0xff] %v459_v19  ;;  %v326_v31 = vadd.f32 %v660_v2, %v289_v22  ;;  %v396_v33 = vmul.f32 %v643_v1, %v359_v18  ;;  %v461_v34 = vadd.f32 %v687_v25, %v424_v27  ;;  %v426_v35 = vadd.f32 %v394_v21, %v325_v28 }
  0x35   : > { %492 = vst [vmem:[%s701_s9 + $0xc8] sm:$0xff] %v460_v26  ;;  %v291_v36 = vmul.f32 %v638_v0, %v254_v23  ;;  %v397_v37 = vmul.f32 %v643_v1, %v360_v24  ;;  %v462_v38 = vadd.f32 %v687_v25, %v425_v30  ;;  %v327_v40 = vadd.f32 %v660_v2, %v290_v32 }
  0x36   : > { %v427_v39 = vadd.f32 %v395_v29, %v326_v31  ;;  %493 = vst [vmem:[%s701_s9 + $0xd0] sm:$0xff] %v461_v34  ;;  %v463_v41 = vadd.f32 %v687_v25, %v426_v35 }
  0x37   : > { %v328_v42 = vadd.f32 %v660_v2, %v291_v36  ;;  %494 = vst [vmem:[%s701_s9 + $0xd8] sm:$0xff] %v462_v38  ;;  %v428_v44 = vadd.f32 %v396_v33, %v327_v40 }
  0x38   : > { %v464_v43 = vadd.f32 %v687_v25, %v427_v39  ;;  %495 = vst [vmem:[%s701_s9 + $0xe0] sm:$0xff] %v463_v41 }
  0x39   : > { %v429_v0 = vadd.f32 %v397_v37, %v328_v42  ;;  %v465_v1 = vadd.f32 %v687_v25, %v428_v44 }
  0x3a   : > { %496 = vst [vmem:[%s701_s9 + $0xe8] sm:$0xff] %v464_v43 }
  0x3b   : > { %v466_v45 = vadd.f32 %v687_v25, %v429_v0  ;;  %497 = vst [vmem:[%s701_s9 + $0xf0] sm:$0xff] %v465_v1 }
  0x3d   : > { %498 = vst [vmem:[%s701_s9 + $0xf8] sm:$0xff] %v466_v45 }
  0x3e PF: > { %s14_s15 = sadd.s32 1, %s598_s15  }
  0x3f   : > { %p11_p4 = scmp.ge.s32.totalorder %s14_s15, 4  }
  0x41   :  { %13 = sbr.rel (!%p11_p4) target bundleno = 1 (0x1), region = 69 }

</bundles_post_ra>
